<compile_context>
chip_gen: v6e
topology: v6e:2x2x1
jax: 0.10.0
libtpu: 0.0.40
codegen_flags: <defaults>
</compile_context>

<pallas_src>
import functools

import jax
import jax.numpy as jnp
from jax.experimental import pallas as pl
from jax.experimental.pallas import tpu as pltpu


# ---------------------------------------------------------------------------
# Fused kernel: U-Net(A) + A-update, batch folded into the lane axis (C, N*H*W).
# ---------------------------------------------------------------------------
def _fused_a_net_kernel(x_ref,
                        w1_ref, b1_ref, w2_ref, b2_ref, w3_ref, b3_ref,
                        w4_ref, b4_ref, w5_ref, b5_ref,
                        mfull_ref, mhalf_ref, par_ref,
                        o_ref, *, W, L, t_clamp, weight_a_prior):
    x = x_ref[...].astype(jnp.float32)          # (8, L), L = N*H*W, lane-dense
    img, a, t, jj = x[0:3], x[3:4], x[4:5], x[5:8]

    def shift(v, d):
        """out[p] = v[p + d] (mod L) along the flat lane axis (d static int)."""
        return v if d == 0 else pltpu.roll(v, shift=(-d) % L, axis=1)

    def conv3x3(feat, w_ref, b_ref, m_ref, step, relu):
        """3x3 'same' conv on a flat (c_in, L) slab.

        step=1: full-resolution taps (+-1, +-W), masks = per-pixel validity.
        step=2: half-resolution conv evaluated on the block-replicated grid
                (taps +-2, +-2W, masks = block-coordinate validity).
        c_in >= 8: one im2col MXU matmul (bf16 operands, f32 accumulate).
        c_in == 1: pure-VPU broadcast-multiply accumulation (no MXU, no concat).
        """
        c_in = feat.shape[0]
        taps = [(dy, dx) for dy in (-1, 0, 1) for dx in (-1, 0, 1)]
        if c_in == 1:
            wf = w_ref[...].astype(jnp.float32)                 # (c_out, 9)
            out = wf[:, 4:5] * feat                             # center tap init
            for tap, (dy, dx) in enumerate(taps):
                if dy == 0 and dx == 0:
                    continue
                d = (dy * W + dx) * step
                out = out + wf[:, tap:tap + 1] * (shift(feat, d) * m_ref[tap])
        else:
            pieces = []
            for tap, (dy, dx) in enumerate(taps):
                d = (dy * W + dx) * step
                src = shift(feat, d)
                if not (dy == 0 and dx == 0):
                    src = src * m_ref[tap]                      # zero halo wrap
                pieces.append(src)
            slab = jnp.concatenate(pieces, axis=0).astype(jnp.bfloat16)  # (9c_in, L)
            out = jnp.dot(w_ref[...], slab, preferred_element_type=jnp.float32)
        out = out + b_ref[...]                                  # (c_out, 1) bias
        if relu:
            out = jnp.maximum(out, 0.0)
        return out

    # ----- stand-in 1->1 channel U-Net on A (ngf features) -------------------
    e1 = conv3x3(a, w1_ref, b1_ref, mfull_ref, 1, relu=True)           # (ngf, L)

    # 2x2 average pooling, kept block-replicated at full resolution: every lane
    # of a 2x2 block holds the pooled value, so nearest upsample later is free.
    px = par_ref[0:1, :]            # 1.0 where x is even
    py = par_ref[1:2, :]            # 1.0 where y is even
    hsum = jnp.where(px != 0.0, e1 + shift(e1, 1), e1 + shift(e1, -1))
    vsum = jnp.where(py != 0.0, hsum + shift(hsum, W), hsum + shift(hsum, -W))
    pooled = 0.25 * vsum                                                # (ngf, L)

    h1 = conv3x3(pooled, w2_ref, b2_ref, mhalf_ref, 2, relu=True)       # (2ngf, L)
    h2 = conv3x3(h1, w3_ref, b3_ref, mhalf_ref, 2, relu=True)           # (2ngf, L)
    # nearest 2x upsample == identity on the replicated grid
    d1 = conv3x3(h2, w4_ref, b4_ref, mfull_ref, 1, relu=True) + e1      # skip add
    a_prior = conv3x3(d1, w5_ref, b5_ref, mfull_ref, 1, relu=False)     # (1, L)

    # ----- A update (all f32 on the VPU) --------------------------------------
    one_m_t = 1.0 - t
    delta_f = (jj * t + a * one_m_t - img) * one_m_t
    tc = jnp.maximum(t, t_clamp)                 # torch.clamp(t, min=t_clamp)
    inv_tc = 1.0 / tc                            # exact division (parity w/ ref)
    delta_g = ((img - a) * inv_tc + a - jj) * (1.0 - inv_tc)
    mean_fg = jnp.mean(delta_f + delta_g, axis=0, keepdims=True)   # mean_f + mean_g
    a_new = a - weight_a_prior * (mean_fg + a_prior)
    o_ref[...] = a_new.astype(o_ref.dtype)


# ---------------------------------------------------------------------------
# Wrapper-side constant builders (weight repack, tap masks, parity masks).
# ---------------------------------------------------------------------------
def _conv_pack(w, b):
    """(C_out, C_in, 3, 3), (C_out,) -> (C_out, 9*C_in) bf16, (C_out, 1) f32.

    Column order = (kh, kw, c_in) to match the in-kernel im2col slab rows."""
    c_out, c_in = w.shape[0], w.shape[1]
    w_r = jnp.transpose(w, (0, 2, 3, 1)).reshape(c_out, 9 * c_in).astype(jnp.bfloat16)
    b_r = b.reshape(c_out, 1).astype(jnp.float32)
    return w_r, b_r


def _tap_masks(n, h, w, step):
    """(9, 1, n*h*w) f32 validity masks for the 9 conv taps ('same' zero pad).

    step=1: per-pixel validity; step=2: block-coordinate validity for the
    replicated half-resolution convs."""
    yy = jnp.repeat(jnp.arange(h), w)
    xx = jnp.tile(jnp.arange(w), h)
    if step == 2:
        yy, xx, hh, ww = yy // 2, xx // 2, h // 2, w // 2
    else:
        hh, ww = h, w
    rows = []
    for dy in (-1, 0, 1):
        for dx in (-1, 0, 1):
            valid = (yy + dy >= 0) & (yy + dy < hh) & (xx + dx >= 0) & (xx + dx < ww)
            rows.append(valid.astype(jnp.float32))
    m = jnp.stack(rows).reshape(9, 1, h * w)
    return jnp.tile(m, (1, 1, n))


def _parity(n, h, w):
    """(2, n*h*w) f32: row 0 = 1.0 where x even, row 1 = 1.0 where y even."""
    yy = jnp.repeat(jnp.arange(h), w)
    xx = jnp.tile(jnp.arange(w), h)
    par = jnp.stack([(xx % 2 == 0).astype(jnp.float32),
                     (yy % 2 == 0).astype(jnp.float32)])
    return jnp.tile(par, (1, n))


def a_net_forward(x, params, *, t_clamp, weight_a_prior):
    """x: (N, 8, H, W) with channels [I(3), A(1), t(1), J(3)] -> (N, 1, H, W)."""
    n, c, h, w = x.shape
    assert c == 8 and h % 2 == 0 and w % 2 == 0
    # keep the im2col slab concat sublane-aligned (f32 tile = 8 rows)
    assert params["w2"].shape[1] % 8 == 0, "n_feats must be a multiple of 8"
    L = n * h * w

    packed = [_conv_pack(params[f"w{i}"], params[f"b{i}"]) for i in range(1, 6)]
    m_full = _tap_masks(n, h, w, 1)
    m_half = _tap_masks(n, h, w, 2)
    par = _parity(n, h, w)

    const_inputs = []
    for w_r, b_r in packed:
        const_inputs += [w_r, b_r]
    const_inputs += [m_full, m_half, par]

    def full_spec(arr):
        return pl.BlockSpec(arr.shape, lambda i, _nd=arr.ndim: (0,) * _nd)

    kernel = functools.partial(_fused_a_net_kernel, W=w, L=L,
                               t_clamp=t_clamp, weight_a_prior=weight_a_prior)

    # Fold the batch into the lane axis: (N, 8, H, W) -> (8, N*H*W).
    x_flat = jnp.transpose(x, (1, 0, 2, 3)).reshape(8, L)

    out_flat = pl.pallas_call(
        kernel,
        out_shape=jax.ShapeDtypeStruct((1, L), x.dtype),
        grid=(1,),
        in_specs=[pl.BlockSpec((8, L), lambda i: (0, 0))]
                 + [full_spec(a) for a in const_inputs],
        out_specs=pl.BlockSpec((1, L), lambda i: (0, 0)),
        compiler_params=pltpu.CompilerParams(
            dimension_semantics=("arbitrary",),
            vmem_limit_bytes=32 * 1024 * 1024),
    )(x_flat, *const_inputs)

    return jnp.transpose(out_flat.reshape(1, n, h, w), (1, 0, 2, 3))


# ---------------------------------------------------------------------------
# Synthetic U-Net parameters (1 -> 1 channels, ngf features).
# ---------------------------------------------------------------------------
def init_unet_params(key, ngf):
    def conv_p(k, c_in, c_out):
        kw, kb = jax.random.split(k)
        w = 0.1 * jax.random.normal(kw, (c_out, c_in, 3, 3), jnp.float32)
        b = 0.01 * jax.random.normal(kb, (c_out,), jnp.float32)
        return w, b

    ks = jax.random.split(key, 5)
    params = {}
    params["w1"], params["b1"] = conv_p(ks[0], 1, ngf)
    params["w2"], params["b2"] = conv_p(ks[1], ngf, 2 * ngf)
    params["w3"], params["b3"] = conv_p(ks[2], 2 * ngf, 2 * ngf)
    params["w4"], params["b4"] = conv_p(ks[3], 2 * ngf, ngf)
    params["w5"], params["b5"] = conv_p(ks[4], ngf, 1)
    return params


if __name__ == "__main__":
    # args stand-in
    n_feats = 8
    t_clamp = 0.05
    weight_A_prior = 0.1

    key = jax.random.PRNGKey(0)
    k_x, k_p = jax.random.split(key)

    # Input: (N=2, C=8, H=16, W=16); channels = [I(3), A(1), t(1), J(3)]
    x = jax.random.uniform(k_x, (2, 8, 16, 16), dtype=jnp.float32,
                           minval=0.05, maxval=1.0)
    params = init_unet_params(k_p, n_feats)

    fwd = jax.jit(functools.partial(a_net_forward, t_clamp=t_clamp,
                                    weight_a_prior=weight_A_prior))
    out = fwd(x, params)
    jax.block_until_ready(out)
    assert out.shape == (2, 1, 16, 16), out.shape
    print("KERNEL_OK")
</pallas_src>

<mosaic_0001>
module attributes {stable_mosaic.version = 11 : i64} {
  func.func @_fused_a_net_kernel(%arg0: i32, %arg1: memref<8x512xf32, #tpu.memory_space<vmem>>, %arg2: memref<8x9xbf16, #tpu.memory_space<vmem>>, %arg3: memref<8x1xf32, #tpu.memory_space<vmem>>, %arg4: memref<16x72xbf16, #tpu.memory_space<vmem>>, %arg5: memref<16x1xf32, #tpu.memory_space<vmem>>, %arg6: memref<16x144xbf16, #tpu.memory_space<vmem>>, %arg7: memref<16x1xf32, #tpu.memory_space<vmem>>, %arg8: memref<8x144xbf16, #tpu.memory_space<vmem>>, %arg9: memref<8x1xf32, #tpu.memory_space<vmem>>, %arg10: memref<1x72xbf16, #tpu.memory_space<vmem>>, %arg11: memref<1x1xf32, #tpu.memory_space<vmem>>, %arg12: memref<9x1x512xf32, #tpu.memory_space<vmem>>, %arg13: memref<9x1x512xf32, #tpu.memory_space<vmem>>, %arg14: memref<2x512xf32, #tpu.memory_space<vmem>>, %arg15: memref<1x512xf32, #tpu.memory_space<vmem>>) attributes {dimension_semantics = [#tpu.dimension_semantics<arbitrary>], iteration_bounds = array<i64: 1>, scalar_prefetch = 0 : i64, scratch_operands = 0 : i64, tpu.core_type = #tpu.core_type<tc>, window_params = [{pipeline_mode = #tpu.pipeline_mode<synchronous>, transform_indices = @transform_0, window_bounds = array<i64: 8, 512>}, {pipeline_mode = #tpu.pipeline_mode<synchronous>, transform_indices = @transform_1, window_bounds = array<i64: 8, 9>}, {pipeline_mode = #tpu.pipeline_mode<synchronous>, transform_indices = @transform_2, window_bounds = array<i64: 8, 1>}, {pipeline_mode = #tpu.pipeline_mode<synchronous>, transform_indices = @transform_3, window_bounds = array<i64: 16, 72>}, {pipeline_mode = #tpu.pipeline_mode<synchronous>, transform_indices = @transform_4, window_bounds = array<i64: 16, 1>}, {pipeline_mode = #tpu.pipeline_mode<synchronous>, transform_indices = @transform_5, window_bounds = array<i64: 16, 144>}, {pipeline_mode = #tpu.pipeline_mode<synchronous>, transform_indices = @transform_6, window_bounds = array<i64: 16, 1>}, {pipeline_mode = #tpu.pipeline_mode<synchronous>, transform_indices = @transform_7, window_bounds = array<i64: 8, 144>}, {pipeline_mode = #tpu.pipeline_mode<synchronous>, transform_indices = @transform_8, window_bounds = array<i64: 8, 1>}, {pipeline_mode = #tpu.pipeline_mode<synchronous>, transform_indices = @transform_9, window_bounds = array<i64: 1, 72>}, {pipeline_mode = #tpu.pipeline_mode<synchronous>, transform_indices = @transform_10, window_bounds = array<i64: 1, 1>}, {pipeline_mode = #tpu.pipeline_mode<synchronous>, transform_indices = @transform_11, window_bounds = array<i64: 9, 1, 512>}, {pipeline_mode = #tpu.pipeline_mode<synchronous>, transform_indices = @transform_12, window_bounds = array<i64: 9, 1, 512>}, {pipeline_mode = #tpu.pipeline_mode<synchronous>, transform_indices = @transform_13, window_bounds = array<i64: 2, 512>}, {pipeline_mode = #tpu.pipeline_mode<synchronous>, transform_indices = @transform_14, window_bounds = array<i64: 1, 512>}]} {
    %c0 = arith.constant 0 : index
    %c0_0 = arith.constant 0 : index
    %0 = vector.load %arg1[%c0, %c0_0] : memref<8x512xf32, #tpu.memory_space<vmem>>, vector<8x512xf32>
    %1 = vector.extract_strided_slice %0 {offsets = [0, 0], sizes = [3, 512], strides = [1, 1]} : vector<8x512xf32> to vector<3x512xf32>
    %2 = vector.extract_strided_slice %0 {offsets = [3, 0], sizes = [1, 512], strides = [1, 1]} : vector<8x512xf32> to vector<1x512xf32>
    %3 = vector.extract_strided_slice %0 {offsets = [4, 0], sizes = [1, 512], strides = [1, 1]} : vector<8x512xf32> to vector<1x512xf32>
    %4 = vector.extract_strided_slice %0 {offsets = [5, 0], sizes = [3, 512], strides = [1, 1]} : vector<8x512xf32> to vector<3x512xf32>
    %c0_1 = arith.constant 0 : index
    %c0_2 = arith.constant 0 : index
    %5 = vector.load %arg2[%c0_1, %c0_2] : memref<8x9xbf16, #tpu.memory_space<vmem>>, vector<8x9xbf16>
    %6 = arith.extf %5 : vector<8x9xbf16> to vector<8x9xf32>
    %7 = vector.extract_strided_slice %6 {offsets = [0, 4], sizes = [8, 1], strides = [1, 1]} : vector<8x9xf32> to vector<8x1xf32>
    %8 = vector.broadcast %7 : vector<8x1xf32> to vector<8x512xf32>
    %9 = vector.broadcast %2 : vector<1x512xf32> to vector<8x512xf32>
    %10 = arith.mulf %8, %9 : vector<8x512xf32>
    %11 = vector.extract_strided_slice %6 {offsets = [0, 0], sizes = [8, 1], strides = [1, 1]} : vector<8x9xf32> to vector<8x1xf32>
    %c17_i32 = arith.constant 17 : i32
    %12 = tpu.dynamic_rotate %2 by %c17_i32 dim 1 : vector<1x512xf32>, i32 -> vector<1x512xf32>
    %c0_3 = arith.constant 0 : index
    %c0_4 = arith.constant 0 : index
    %c0_5 = arith.constant 0 : index
    %13 = vector.load %arg12[%c0_3, %c0_4, %c0_5] : memref<9x1x512xf32, #tpu.memory_space<vmem>>, vector<1x1x512xf32>
    %14 = vector.shape_cast %13 : vector<1x1x512xf32> to vector<1x512xf32>
    %15 = arith.mulf %12, %14 : vector<1x512xf32>
    %16 = vector.broadcast %11 : vector<8x1xf32> to vector<8x512xf32>
    %17 = vector.broadcast %15 : vector<1x512xf32> to vector<8x512xf32>
    %18 = arith.mulf %16, %17 : vector<8x512xf32>
    %19 = arith.addf %10, %18 : vector<8x512xf32>
    %20 = vector.extract_strided_slice %6 {offsets = [0, 1], sizes = [8, 1], strides = [1, 1]} : vector<8x9xf32> to vector<8x1xf32>
    %c16_i32 = arith.constant 16 : i32
    %21 = tpu.dynamic_rotate %2 by %c16_i32 dim 1 : vector<1x512xf32>, i32 -> vector<1x512xf32>
    %c1 = arith.constant 1 : index
    %c0_6 = arith.constant 0 : index
    %c0_7 = arith.constant 0 : index
    %22 = vector.load %arg12[%c1, %c0_6, %c0_7] : memref<9x1x512xf32, #tpu.memory_space<vmem>>, vector<1x1x512xf32>
    %23 = vector.shape_cast %22 : vector<1x1x512xf32> to vector<1x512xf32>
    %24 = arith.mulf %21, %23 : vector<1x512xf32>
    %25 = vector.broadcast %20 : vector<8x1xf32> to vector<8x512xf32>
    %26 = vector.broadcast %24 : vector<1x512xf32> to vector<8x512xf32>
    %27 = arith.mulf %25, %26 : vector<8x512xf32>
    %28 = arith.addf %19, %27 : vector<8x512xf32>
    %29 = vector.extract_strided_slice %6 {offsets = [0, 2], sizes = [8, 1], strides = [1, 1]} : vector<8x9xf32> to vector<8x1xf32>
    %c15_i32 = arith.constant 15 : i32
    %30 = tpu.dynamic_rotate %2 by %c15_i32 dim 1 : vector<1x512xf32>, i32 -> vector<1x512xf32>
    %c2 = arith.constant 2 : index
    %c0_8 = arith.constant 0 : index
    %c0_9 = arith.constant 0 : index
    %31 = vector.load %arg12[%c2, %c0_8, %c0_9] : memref<9x1x512xf32, #tpu.memory_space<vmem>>, vector<1x1x512xf32>
    %32 = vector.shape_cast %31 : vector<1x1x512xf32> to vector<1x512xf32>
    %33 = arith.mulf %30, %32 : vector<1x512xf32>
    %34 = vector.broadcast %29 : vector<8x1xf32> to vector<8x512xf32>
    %35 = vector.broadcast %33 : vector<1x512xf32> to vector<8x512xf32>
    %36 = arith.mulf %34, %35 : vector<8x512xf32>
    %37 = arith.addf %28, %36 : vector<8x512xf32>
    %38 = vector.extract_strided_slice %6 {offsets = [0, 3], sizes = [8, 1], strides = [1, 1]} : vector<8x9xf32> to vector<8x1xf32>
    %c1_i32 = arith.constant 1 : i32
    %39 = tpu.dynamic_rotate %2 by %c1_i32 dim 1 : vector<1x512xf32>, i32 -> vector<1x512xf32>
    %c3 = arith.constant 3 : index
    %c0_10 = arith.constant 0 : index
    %c0_11 = arith.constant 0 : index
    %40 = vector.load %arg12[%c3, %c0_10, %c0_11] : memref<9x1x512xf32, #tpu.memory_space<vmem>>, vector<1x1x512xf32>
    %41 = vector.shape_cast %40 : vector<1x1x512xf32> to vector<1x512xf32>
    %42 = arith.mulf %39, %41 : vector<1x512xf32>
    %43 = vector.broadcast %38 : vector<8x1xf32> to vector<8x512xf32>
    %44 = vector.broadcast %42 : vector<1x512xf32> to vector<8x512xf32>
    %45 = arith.mulf %43, %44 : vector<8x512xf32>
    %46 = arith.addf %37, %45 : vector<8x512xf32>
    %47 = vector.extract_strided_slice %6 {offsets = [0, 5], sizes = [8, 1], strides = [1, 1]} : vector<8x9xf32> to vector<8x1xf32>
    %c511_i32 = arith.constant 511 : i32
    %48 = tpu.dynamic_rotate %2 by %c511_i32 dim 1 : vector<1x512xf32>, i32 -> vector<1x512xf32>
    %c5 = arith.constant 5 : index
    %c0_12 = arith.constant 0 : index
    %c0_13 = arith.constant 0 : index
    %49 = vector.load %arg12[%c5, %c0_12, %c0_13] : memref<9x1x512xf32, #tpu.memory_space<vmem>>, vector<1x1x512xf32>
    %50 = vector.shape_cast %49 : vector<1x1x512xf32> to vector<1x512xf32>
    %51 = arith.mulf %48, %50 : vector<1x512xf32>
    %52 = vector.broadcast %47 : vector<8x1xf32> to vector<8x512xf32>
    %53 = vector.broadcast %51 : vector<1x512xf32> to vector<8x512xf32>
    %54 = arith.mulf %52, %53 : vector<8x512xf32>
    %55 = arith.addf %46, %54 : vector<8x512xf32>
    %56 = vector.extract_strided_slice %6 {offsets = [0, 6], sizes = [8, 1], strides = [1, 1]} : vector<8x9xf32> to vector<8x1xf32>
    %c497_i32 = arith.constant 497 : i32
    %57 = tpu.dynamic_rotate %2 by %c497_i32 dim 1 : vector<1x512xf32>, i32 -> vector<1x512xf32>
    %c6 = arith.constant 6 : index
    %c0_14 = arith.constant 0 : index
    %c0_15 = arith.constant 0 : index
    %58 = vector.load %arg12[%c6, %c0_14, %c0_15] : memref<9x1x512xf32, #tpu.memory_space<vmem>>, vector<1x1x512xf32>
    %59 = vector.shape_cast %58 : vector<1x1x512xf32> to vector<1x512xf32>
    %60 = arith.mulf %57, %59 : vector<1x512xf32>
    %61 = vector.broadcast %56 : vector<8x1xf32> to vector<8x512xf32>
    %62 = vector.broadcast %60 : vector<1x512xf32> to vector<8x512xf32>
    %63 = arith.mulf %61, %62 : vector<8x512xf32>
    %64 = arith.addf %55, %63 : vector<8x512xf32>
    %65 = vector.extract_strided_slice %6 {offsets = [0, 7], sizes = [8, 1], strides = [1, 1]} : vector<8x9xf32> to vector<8x1xf32>
    %c496_i32 = arith.constant 496 : i32
    %66 = tpu.dynamic_rotate %2 by %c496_i32 dim 1 : vector<1x512xf32>, i32 -> vector<1x512xf32>
    %c7 = arith.constant 7 : index
    %c0_16 = arith.constant 0 : index
    %c0_17 = arith.constant 0 : index
    %67 = vector.load %arg12[%c7, %c0_16, %c0_17] : memref<9x1x512xf32, #tpu.memory_space<vmem>>, vector<1x1x512xf32>
    %68 = vector.shape_cast %67 : vector<1x1x512xf32> to vector<1x512xf32>
    %69 = arith.mulf %66, %68 : vector<1x512xf32>
    %70 = vector.broadcast %65 : vector<8x1xf32> to vector<8x512xf32>
    %71 = vector.broadcast %69 : vector<1x512xf32> to vector<8x512xf32>
    %72 = arith.mulf %70, %71 : vector<8x512xf32>
    %73 = arith.addf %64, %72 : vector<8x512xf32>
    %74 = vector.extract_strided_slice %6 {offsets = [0, 8], sizes = [8, 1], strides = [1, 1]} : vector<8x9xf32> to vector<8x1xf32>
    %c495_i32 = arith.constant 495 : i32
    %75 = tpu.dynamic_rotate %2 by %c495_i32 dim 1 : vector<1x512xf32>, i32 -> vector<1x512xf32>
    %c8 = arith.constant 8 : index
    %c0_18 = arith.constant 0 : index
    %c0_19 = arith.constant 0 : index
    %76 = vector.load %arg12[%c8, %c0_18, %c0_19] : memref<9x1x512xf32, #tpu.memory_space<vmem>>, vector<1x1x512xf32>
    %77 = vector.shape_cast %76 : vector<1x1x512xf32> to vector<1x512xf32>
    %78 = arith.mulf %75, %77 : vector<1x512xf32>
    %79 = vector.broadcast %74 : vector<8x1xf32> to vector<8x512xf32>
    %80 = vector.broadcast %78 : vector<1x512xf32> to vector<8x512xf32>
    %81 = arith.mulf %79, %80 : vector<8x512xf32>
    %82 = arith.addf %73, %81 : vector<8x512xf32>
    %c0_20 = arith.constant 0 : index
    %c0_21 = arith.constant 0 : index
    %83 = vector.load %arg3[%c0_20, %c0_21] : memref<8x1xf32, #tpu.memory_space<vmem>>, vector<8x1xf32>
    %84 = vector.broadcast %83 : vector<8x1xf32> to vector<8x512xf32>
    %85 = arith.addf %82, %84 : vector<8x512xf32>
    %cst = arith.constant 0.000000e+00 : f32
    %86 = vector.broadcast %cst : f32 to vector<8x512xf32>
    %87 = arith.maximumf %85, %86 : vector<8x512xf32>
    %c0_22 = arith.constant 0 : index
    %c0_23 = arith.constant 0 : index
    %88 = vector.load %arg14[%c0_22, %c0_23] : memref<2x512xf32, #tpu.memory_space<vmem>>, vector<1x512xf32>
    %c1_24 = arith.constant 1 : index
    %c0_25 = arith.constant 0 : index
    %89 = vector.load %arg14[%c1_24, %c0_25] : memref<2x512xf32, #tpu.memory_space<vmem>>, vector<1x512xf32>
    %cst_26 = arith.constant 0.000000e+00 : f32
    %90 = vector.broadcast %cst_26 : f32 to vector<1x512xf32>
    %91 = arith.cmpf one, %88, %90 : vector<1x512xf32>
    %c511_i32_27 = arith.constant 511 : i32
    %92 = tpu.dynamic_rotate %87 by %c511_i32_27 dim 1 : vector<8x512xf32>, i32 -> vector<8x512xf32>
    %93 = arith.addf %87, %92 : vector<8x512xf32>
    %c1_i32_28 = arith.constant 1 : i32
    %94 = tpu.dynamic_rotate %87 by %c1_i32_28 dim 1 : vector<8x512xf32>, i32 -> vector<8x512xf32>
    %95 = arith.addf %87, %94 : vector<8x512xf32>
    %96 = vector.shape_cast %91 : vector<1x512xi1> to vector<1x512xi1>
    %97 = vector.broadcast %96 : vector<1x512xi1> to vector<8x512xi1>
    %98 = arith.select %97, %93, %95 : vector<8x512xi1>, vector<8x512xf32>
    %cst_29 = arith.constant 0.000000e+00 : f32
    %99 = vector.broadcast %cst_29 : f32 to vector<1x512xf32>
    %100 = arith.cmpf one, %89, %99 : vector<1x512xf32>
    %c496_i32_30 = arith.constant 496 : i32
    %101 = tpu.dynamic_rotate %98 by %c496_i32_30 dim 1 : vector<8x512xf32>, i32 -> vector<8x512xf32>
    %102 = arith.addf %98, %101 : vector<8x512xf32>
    %c16_i32_31 = arith.constant 16 : i32
    %103 = tpu.dynamic_rotate %98 by %c16_i32_31 dim 1 : vector<8x512xf32>, i32 -> vector<8x512xf32>
    %104 = arith.addf %98, %103 : vector<8x512xf32>
    %105 = vector.shape_cast %100 : vector<1x512xi1> to vector<1x512xi1>
    %106 = vector.broadcast %105 : vector<1x512xi1> to vector<8x512xi1>
    %107 = arith.select %106, %102, %104 : vector<8x512xi1>, vector<8x512xf32>
    %cst_32 = arith.constant 2.500000e-01 : f32
    %108 = vector.broadcast %cst_32 : f32 to vector<8x512xf32>
    %109 = arith.mulf %108, %107 : vector<8x512xf32>
    %c34_i32 = arith.constant 34 : i32
    %110 = tpu.dynamic_rotate %109 by %c34_i32 dim 1 : vector<8x512xf32>, i32 -> vector<8x512xf32>
    %c0_33 = arith.constant 0 : index
    %c0_34 = arith.constant 0 : index
    %c0_35 = arith.constant 0 : index
    %111 = vector.load %arg13[%c0_33, %c0_34, %c0_35] : memref<9x1x512xf32, #tpu.memory_space<vmem>>, vector<1x1x512xf32>
    %112 = vector.shape_cast %111 : vector<1x1x512xf32> to vector<1x512xf32>
    %113 = vector.broadcast %112 : vector<1x512xf32> to vector<8x512xf32>
    %114 = arith.mulf %110, %113 : vector<8x512xf32>
    %c32_i32 = arith.constant 32 : i32
    %115 = tpu.dynamic_rotate %109 by %c32_i32 dim 1 : vector<8x512xf32>, i32 -> vector<8x512xf32>
    %c1_36 = arith.constant 1 : index
    %c0_37 = arith.constant 0 : index
    %c0_38 = arith.constant 0 : index
    %116 = vector.load %arg13[%c1_36, %c0_37, %c0_38] : memref<9x1x512xf32, #tpu.memory_space<vmem>>, vector<1x1x512xf32>
    %117 = vector.shape_cast %116 : vector<1x1x512xf32> to vector<1x512xf32>
    %118 = vector.broadcast %117 : vector<1x512xf32> to vector<8x512xf32>
    %119 = arith.mulf %115, %118 : vector<8x512xf32>
    %c30_i32 = arith.constant 30 : i32
    %120 = tpu.dynamic_rotate %109 by %c30_i32 dim 1 : vector<8x512xf32>, i32 -> vector<8x512xf32>
    %c2_39 = arith.constant 2 : index
    %c0_40 = arith.constant 0 : index
    %c0_41 = arith.constant 0 : index
    %121 = vector.load %arg13[%c2_39, %c0_40, %c0_41] : memref<9x1x512xf32, #tpu.memory_space<vmem>>, vector<1x1x512xf32>
    %122 = vector.shape_cast %121 : vector<1x1x512xf32> to vector<1x512xf32>
    %123 = vector.broadcast %122 : vector<1x512xf32> to vector<8x512xf32>
    %124 = arith.mulf %120, %123 : vector<8x512xf32>
    %c2_i32 = arith.constant 2 : i32
    %125 = tpu.dynamic_rotate %109 by %c2_i32 dim 1 : vector<8x512xf32>, i32 -> vector<8x512xf32>
    %c3_42 = arith.constant 3 : index
    %c0_43 = arith.constant 0 : index
    %c0_44 = arith.constant 0 : index
    %126 = vector.load %arg13[%c3_42, %c0_43, %c0_44] : memref<9x1x512xf32, #tpu.memory_space<vmem>>, vector<1x1x512xf32>
    %127 = vector.shape_cast %126 : vector<1x1x512xf32> to vector<1x512xf32>
    %128 = vector.broadcast %127 : vector<1x512xf32> to vector<8x512xf32>
    %129 = arith.mulf %125, %128 : vector<8x512xf32>
    %c510_i32 = arith.constant 510 : i32
    %130 = tpu.dynamic_rotate %109 by %c510_i32 dim 1 : vector<8x512xf32>, i32 -> vector<8x512xf32>
    %c5_45 = arith.constant 5 : index
    %c0_46 = arith.constant 0 : index
    %c0_47 = arith.constant 0 : index
    %131 = vector.load %arg13[%c5_45, %c0_46, %c0_47] : memref<9x1x512xf32, #tpu.memory_space<vmem>>, vector<1x1x512xf32>
    %132 = vector.shape_cast %131 : vector<1x1x512xf32> to vector<1x512xf32>
    %133 = vector.broadcast %132 : vector<1x512xf32> to vector<8x512xf32>
    %134 = arith.mulf %130, %133 : vector<8x512xf32>
    %c482_i32 = arith.constant 482 : i32
    %135 = tpu.dynamic_rotate %109 by %c482_i32 dim 1 : vector<8x512xf32>, i32 -> vector<8x512xf32>
    %c6_48 = arith.constant 6 : index
    %c0_49 = arith.constant 0 : index
    %c0_50 = arith.constant 0 : index
    %136 = vector.load %arg13[%c6_48, %c0_49, %c0_50] : memref<9x1x512xf32, #tpu.memory_space<vmem>>, vector<1x1x512xf32>
    %137 = vector.shape_cast %136 : vector<1x1x512xf32> to vector<1x512xf32>
    %138 = vector.broadcast %137 : vector<1x512xf32> to vector<8x512xf32>
    %139 = arith.mulf %135, %138 : vector<8x512xf32>
    %c480_i32 = arith.constant 480 : i32
    %140 = tpu.dynamic_rotate %109 by %c480_i32 dim 1 : vector<8x512xf32>, i32 -> vector<8x512xf32>
    %c7_51 = arith.constant 7 : index
    %c0_52 = arith.constant 0 : index
    %c0_53 = arith.constant 0 : index
    %141 = vector.load %arg13[%c7_51, %c0_52, %c0_53] : memref<9x1x512xf32, #tpu.memory_space<vmem>>, vector<1x1x512xf32>
    %142 = vector.shape_cast %141 : vector<1x1x512xf32> to vector<1x512xf32>
    %143 = vector.broadcast %142 : vector<1x512xf32> to vector<8x512xf32>
    %144 = arith.mulf %140, %143 : vector<8x512xf32>
    %c478_i32 = arith.constant 478 : i32
    %145 = tpu.dynamic_rotate %109 by %c478_i32 dim 1 : vector<8x512xf32>, i32 -> vector<8x512xf32>
    %c8_54 = arith.constant 8 : index
    %c0_55 = arith.constant 0 : index
    %c0_56 = arith.constant 0 : index
    %146 = vector.load %arg13[%c8_54, %c0_55, %c0_56] : memref<9x1x512xf32, #tpu.memory_space<vmem>>, vector<1x1x512xf32>
    %147 = vector.shape_cast %146 : vector<1x1x512xf32> to vector<1x512xf32>
    %148 = vector.broadcast %147 : vector<1x512xf32> to vector<8x512xf32>
    %149 = arith.mulf %145, %148 : vector<8x512xf32>
    %150 = tpu.concatenate %114, %119, %124, %129, %109, %134, %139, %144, %149 in 0 : vector<8x512xf32>, vector<8x512xf32>, vector<8x512xf32>, vector<8x512xf32>, vector<8x512xf32>, vector<8x512xf32>, vector<8x512xf32>, vector<8x512xf32>, vector<8x512xf32> -> vector<72x512xf32>
    %151 = arith.truncf %150 : vector<72x512xf32> to vector<72x512xbf16>
    %c0_57 = arith.constant 0 : index
    %c0_58 = arith.constant 0 : index
    %152 = vector.load %arg4[%c0_57, %c0_58] : memref<16x72xbf16, #tpu.memory_space<vmem>>, vector<16x72xbf16>
    %cst_59 = arith.constant dense<0.000000e+00> : vector<16x512xf32>
    %153 = tpu.matmul %152, %151, %cst_59 {dimension_numbers = #tpu.dot_dimension_numbers<[1], [0], [0], [1], [0, 0, 1, 1], [], []>} : vector<16x72xbf16>, vector<72x512xbf16>, vector<16x512xf32> -> vector<16x512xf32>
    %c0_60 = arith.constant 0 : index
    %c0_61 = arith.constant 0 : index
    %154 = vector.load %arg5[%c0_60, %c0_61] : memref<16x1xf32, #tpu.memory_space<vmem>>, vector<16x1xf32>
    %155 = vector.broadcast %154 : vector<16x1xf32> to vector<16x512xf32>
    %156 = arith.addf %153, %155 : vector<16x512xf32>
    %cst_62 = arith.constant 0.000000e+00 : f32
    %157 = vector.broadcast %cst_62 : f32 to vector<16x512xf32>
    %158 = arith.maximumf %156, %157 : vector<16x512xf32>
    %c34_i32_63 = arith.constant 34 : i32
    %159 = tpu.dynamic_rotate %158 by %c34_i32_63 dim 1 : vector<16x512xf32>, i32 -> vector<16x512xf32>
    %c0_64 = arith.constant 0 : index
    %c0_65 = arith.constant 0 : index
    %c0_66 = arith.constant 0 : index
    %160 = vector.load %arg13[%c0_64, %c0_65, %c0_66] : memref<9x1x512xf32, #tpu.memory_space<vmem>>, vector<1x1x512xf32>
    %161 = vector.shape_cast %160 : vector<1x1x512xf32> to vector<1x512xf32>
    %162 = vector.broadcast %161 : vector<1x512xf32> to vector<16x512xf32>
    %163 = arith.mulf %159, %162 : vector<16x512xf32>
    %c32_i32_67 = arith.constant 32 : i32
    %164 = tpu.dynamic_rotate %158 by %c32_i32_67 dim 1 : vector<16x512xf32>, i32 -> vector<16x512xf32>
    %c1_68 = arith.constant 1 : index
    %c0_69 = arith.constant 0 : index
    %c0_70 = arith.constant 0 : index
    %165 = vector.load %arg13[%c1_68, %c0_69, %c0_70] : memref<9x1x512xf32, #tpu.memory_space<vmem>>, vector<1x1x512xf32>
    %166 = vector.shape_cast %165 : vector<1x1x512xf32> to vector<1x512xf32>
    %167 = vector.broadcast %166 : vector<1x512xf32> to vector<16x512xf32>
    %168 = arith.mulf %164, %167 : vector<16x512xf32>
    %c30_i32_71 = arith.constant 30 : i32
    %169 = tpu.dynamic_rotate %158 by %c30_i32_71 dim 1 : vector<16x512xf32>, i32 -> vector<16x512xf32>
    %c2_72 = arith.constant 2 : index
    %c0_73 = arith.constant 0 : index
    %c0_74 = arith.constant 0 : index
    %170 = vector.load %arg13[%c2_72, %c0_73, %c0_74] : memref<9x1x512xf32, #tpu.memory_space<vmem>>, vector<1x1x512xf32>
    %171 = vector.shape_cast %170 : vector<1x1x512xf32> to vector<1x512xf32>
    %172 = vector.broadcast %171 : vector<1x512xf32> to vector<16x512xf32>
    %173 = arith.mulf %169, %172 : vector<16x512xf32>
    %c2_i32_75 = arith.constant 2 : i32
    %174 = tpu.dynamic_rotate %158 by %c2_i32_75 dim 1 : vector<16x512xf32>, i32 -> vector<16x512xf32>
    %c3_76 = arith.constant 3 : index
    %c0_77 = arith.constant 0 : index
    %c0_78 = arith.constant 0 : index
    %175 = vector.load %arg13[%c3_76, %c0_77, %c0_78] : memref<9x1x512xf32, #tpu.memory_space<vmem>>, vector<1x1x512xf32>
    %176 = vector.shape_cast %175 : vector<1x1x512xf32> to vector<1x512xf32>
    %177 = vector.broadcast %176 : vector<1x512xf32> to vector<16x512xf32>
    %178 = arith.mulf %174, %177 : vector<16x512xf32>
    %c510_i32_79 = arith.constant 510 : i32
    %179 = tpu.dynamic_rotate %158 by %c510_i32_79 dim 1 : vector<16x512xf32>, i32 -> vector<16x512xf32>
    %c5_80 = arith.constant 5 : index
    %c0_81 = arith.constant 0 : index
    %c0_82 = arith.constant 0 : index
    %180 = vector.load %arg13[%c5_80, %c0_81, %c0_82] : memref<9x1x512xf32, #tpu.memory_space<vmem>>, vector<1x1x512xf32>
    %181 = vector.shape_cast %180 : vector<1x1x512xf32> to vector<1x512xf32>
    %182 = vector.broadcast %181 : vector<1x512xf32> to vector<16x512xf32>
    %183 = arith.mulf %179, %182 : vector<16x512xf32>
    %c482_i32_83 = arith.constant 482 : i32
    %184 = tpu.dynamic_rotate %158 by %c482_i32_83 dim 1 : vector<16x512xf32>, i32 -> vector<16x512xf32>
    %c6_84 = arith.constant 6 : index
    %c0_85 = arith.constant 0 : index
    %c0_86 = arith.constant 0 : index
    %185 = vector.load %arg13[%c6_84, %c0_85, %c0_86] : memref<9x1x512xf32, #tpu.memory_space<vmem>>, vector<1x1x512xf32>
    %186 = vector.shape_cast %185 : vector<1x1x512xf32> to vector<1x512xf32>
    %187 = vector.broadcast %186 : vector<1x512xf32> to vector<16x512xf32>
    %188 = arith.mulf %184, %187 : vector<16x512xf32>
    %c480_i32_87 = arith.constant 480 : i32
    %189 = tpu.dynamic_rotate %158 by %c480_i32_87 dim 1 : vector<16x512xf32>, i32 -> vector<16x512xf32>
    %c7_88 = arith.constant 7 : index
    %c0_89 = arith.constant 0 : index
    %c0_90 = arith.constant 0 : index
    %190 = vector.load %arg13[%c7_88, %c0_89, %c0_90] : memref<9x1x512xf32, #tpu.memory_space<vmem>>, vector<1x1x512xf32>
    %191 = vector.shape_cast %190 : vector<1x1x512xf32> to vector<1x512xf32>
    %192 = vector.broadcast %191 : vector<1x512xf32> to vector<16x512xf32>
    %193 = arith.mulf %189, %192 : vector<16x512xf32>
    %c478_i32_91 = arith.constant 478 : i32
    %194 = tpu.dynamic_rotate %158 by %c478_i32_91 dim 1 : vector<16x512xf32>, i32 -> vector<16x512xf32>
    %c8_92 = arith.constant 8 : index
    %c0_93 = arith.constant 0 : index
    %c0_94 = arith.constant 0 : index
    %195 = vector.load %arg13[%c8_92, %c0_93, %c0_94] : memref<9x1x512xf32, #tpu.memory_space<vmem>>, vector<1x1x512xf32>
    %196 = vector.shape_cast %195 : vector<1x1x512xf32> to vector<1x512xf32>
    %197 = vector.broadcast %196 : vector<1x512xf32> to vector<16x512xf32>
    %198 = arith.mulf %194, %197 : vector<16x512xf32>
    %199 = tpu.concatenate %163, %168, %173, %178, %158, %183, %188, %193, %198 in 0 : vector<16x512xf32>, vector<16x512xf32>, vector<16x512xf32>, vector<16x512xf32>, vector<16x512xf32>, vector<16x512xf32>, vector<16x512xf32>, vector<16x512xf32>, vector<16x512xf32> -> vector<144x512xf32>
    %200 = arith.truncf %199 : vector<144x512xf32> to vector<144x512xbf16>
    %c0_95 = arith.constant 0 : index
    %c0_96 = arith.constant 0 : index
    %201 = vector.load %arg6[%c0_95, %c0_96] : memref<16x144xbf16, #tpu.memory_space<vmem>>, vector<16x144xbf16>
    %cst_97 = arith.constant dense<0.000000e+00> : vector<16x512xf32>
    %202 = tpu.matmul %201, %200, %cst_97 {dimension_numbers = #tpu.dot_dimension_numbers<[1], [0], [0], [1], [0, 0, 1, 1], [], []>} : vector<16x144xbf16>, vector<144x512xbf16>, vector<16x512xf32> -> vector<16x512xf32>
    %c0_98 = arith.constant 0 : index
    %c0_99 = arith.constant 0 : index
    %203 = vector.load %arg7[%c0_98, %c0_99] : memref<16x1xf32, #tpu.memory_space<vmem>>, vector<16x1xf32>
    %204 = vector.broadcast %203 : vector<16x1xf32> to vector<16x512xf32>
    %205 = arith.addf %202, %204 : vector<16x512xf32>
    %cst_100 = arith.constant 0.000000e+00 : f32
    %206 = vector.broadcast %cst_100 : f32 to vector<16x512xf32>
    %207 = arith.maximumf %205, %206 : vector<16x512xf32>
    %c17_i32_101 = arith.constant 17 : i32
    %208 = tpu.dynamic_rotate %207 by %c17_i32_101 dim 1 : vector<16x512xf32>, i32 -> vector<16x512xf32>
    %c0_102 = arith.constant 0 : index
    %c0_103 = arith.constant 0 : index
    %c0_104 = arith.constant 0 : index
    %209 = vector.load %arg12[%c0_102, %c0_103, %c0_104] : memref<9x1x512xf32, #tpu.memory_space<vmem>>, vector<1x1x512xf32>
    %210 = vector.shape_cast %209 : vector<1x1x512xf32> to vector<1x512xf32>
    %211 = vector.broadcast %210 : vector<1x512xf32> to vector<16x512xf32>
    %212 = arith.mulf %208, %211 : vector<16x512xf32>
    %c16_i32_105 = arith.constant 16 : i32
    %213 = tpu.dynamic_rotate %207 by %c16_i32_105 dim 1 : vector<16x512xf32>, i32 -> vector<16x512xf32>
    %c1_106 = arith.constant 1 : index
    %c0_107 = arith.constant 0 : index
    %c0_108 = arith.constant 0 : index
    %214 = vector.load %arg12[%c1_106, %c0_107, %c0_108] : memref<9x1x512xf32, #tpu.memory_space<vmem>>, vector<1x1x512xf32>
    %215 = vector.shape_cast %214 : vector<1x1x512xf32> to vector<1x512xf32>
    %216 = vector.broadcast %215 : vector<1x512xf32> to vector<16x512xf32>
    %217 = arith.mulf %213, %216 : vector<16x512xf32>
    %c15_i32_109 = arith.constant 15 : i32
    %218 = tpu.dynamic_rotate %207 by %c15_i32_109 dim 1 : vector<16x512xf32>, i32 -> vector<16x512xf32>
    %c2_110 = arith.constant 2 : index
    %c0_111 = arith.constant 0 : index
    %c0_112 = arith.constant 0 : index
    %219 = vector.load %arg12[%c2_110, %c0_111, %c0_112] : memref<9x1x512xf32, #tpu.memory_space<vmem>>, vector<1x1x512xf32>
    %220 = vector.shape_cast %219 : vector<1x1x512xf32> to vector<1x512xf32>
    %221 = vector.broadcast %220 : vector<1x512xf32> to vector<16x512xf32>
    %222 = arith.mulf %218, %221 : vector<16x512xf32>
    %c1_i32_113 = arith.constant 1 : i32
    %223 = tpu.dynamic_rotate %207 by %c1_i32_113 dim 1 : vector<16x512xf32>, i32 -> vector<16x512xf32>
    %c3_114 = arith.constant 3 : index
    %c0_115 = arith.constant 0 : index
    %c0_116 = arith.constant 0 : index
    %224 = vector.load %arg12[%c3_114, %c0_115, %c0_116] : memref<9x1x512xf32, #tpu.memory_space<vmem>>, vector<1x1x512xf32>
    %225 = vector.shape_cast %224 : vector<1x1x512xf32> to vector<1x512xf32>
    %226 = vector.broadcast %225 : vector<1x512xf32> to vector<16x512xf32>
    %227 = arith.mulf %223, %226 : vector<16x512xf32>
    %c511_i32_117 = arith.constant 511 : i32
    %228 = tpu.dynamic_rotate %207 by %c511_i32_117 dim 1 : vector<16x512xf32>, i32 -> vector<16x512xf32>
    %c5_118 = arith.constant 5 : index
    %c0_119 = arith.constant 0 : index
    %c0_120 = arith.constant 0 : index
    %229 = vector.load %arg12[%c5_118, %c0_119, %c0_120] : memref<9x1x512xf32, #tpu.memory_space<vmem>>, vector<1x1x512xf32>
    %230 = vector.shape_cast %229 : vector<1x1x512xf32> to vector<1x512xf32>
    %231 = vector.broadcast %230 : vector<1x512xf32> to vector<16x512xf32>
    %232 = arith.mulf %228, %231 : vector<16x512xf32>
    %c497_i32_121 = arith.constant 497 : i32
    %233 = tpu.dynamic_rotate %207 by %c497_i32_121 dim 1 : vector<16x512xf32>, i32 -> vector<16x512xf32>
    %c6_122 = arith.constant 6 : index
    %c0_123 = arith.constant 0 : index
    %c0_124 = arith.constant 0 : index
    %234 = vector.load %arg12[%c6_122, %c0_123, %c0_124] : memref<9x1x512xf32, #tpu.memory_space<vmem>>, vector<1x1x512xf32>
    %235 = vector.shape_cast %234 : vector<1x1x512xf32> to vector<1x512xf32>
    %236 = vector.broadcast %235 : vector<1x512xf32> to vector<16x512xf32>
    %237 = arith.mulf %233, %236 : vector<16x512xf32>
    %c496_i32_125 = arith.constant 496 : i32
    %238 = tpu.dynamic_rotate %207 by %c496_i32_125 dim 1 : vector<16x512xf32>, i32 -> vector<16x512xf32>
    %c7_126 = arith.constant 7 : index
    %c0_127 = arith.constant 0 : index
    %c0_128 = arith.constant 0 : index
    %239 = vector.load %arg12[%c7_126, %c0_127, %c0_128] : memref<9x1x512xf32, #tpu.memory_space<vmem>>, vector<1x1x512xf32>
    %240 = vector.shape_cast %239 : vector<1x1x512xf32> to vector<1x512xf32>
    %241 = vector.broadcast %240 : vector<1x512xf32> to vector<16x512xf32>
    %242 = arith.mulf %238, %241 : vector<16x512xf32>
    %c495_i32_129 = arith.constant 495 : i32
    %243 = tpu.dynamic_rotate %207 by %c495_i32_129 dim 1 : vector<16x512xf32>, i32 -> vector<16x512xf32>
    %c8_130 = arith.constant 8 : index
    %c0_131 = arith.constant 0 : index
    %c0_132 = arith.constant 0 : index
    %244 = vector.load %arg12[%c8_130, %c0_131, %c0_132] : memref<9x1x512xf32, #tpu.memory_space<vmem>>, vector<1x1x512xf32>
    %245 = vector.shape_cast %244 : vector<1x1x512xf32> to vector<1x512xf32>
    %246 = vector.broadcast %245 : vector<1x512xf32> to vector<16x512xf32>
    %247 = arith.mulf %243, %246 : vector<16x512xf32>
    %248 = tpu.concatenate %212, %217, %222, %227, %207, %232, %237, %242, %247 in 0 : vector<16x512xf32>, vector<16x512xf32>, vector<16x512xf32>, vector<16x512xf32>, vector<16x512xf32>, vector<16x512xf32>, vector<16x512xf32>, vector<16x512xf32>, vector<16x512xf32> -> vector<144x512xf32>
    %249 = arith.truncf %248 : vector<144x512xf32> to vector<144x512xbf16>
    %c0_133 = arith.constant 0 : index
    %c0_134 = arith.constant 0 : index
    %250 = vector.load %arg8[%c0_133, %c0_134] : memref<8x144xbf16, #tpu.memory_space<vmem>>, vector<8x144xbf16>
    %cst_135 = arith.constant dense<0.000000e+00> : vector<8x512xf32>
    %251 = tpu.matmul %250, %249, %cst_135 {dimension_numbers = #tpu.dot_dimension_numbers<[1], [0], [0], [1], [0, 0, 1, 1], [], []>} : vector<8x144xbf16>, vector<144x512xbf16>, vector<8x512xf32> -> vector<8x512xf32>
    %c0_136 = arith.constant 0 : index
    %c0_137 = arith.constant 0 : index
    %252 = vector.load %arg9[%c0_136, %c0_137] : memref<8x1xf32, #tpu.memory_space<vmem>>, vector<8x1xf32>
    %253 = vector.broadcast %252 : vector<8x1xf32> to vector<8x512xf32>
    %254 = arith.addf %251, %253 : vector<8x512xf32>
    %cst_138 = arith.constant 0.000000e+00 : f32
    %255 = vector.broadcast %cst_138 : f32 to vector<8x512xf32>
    %256 = arith.maximumf %254, %255 : vector<8x512xf32>
    %257 = arith.addf %256, %87 : vector<8x512xf32>
    %c17_i32_139 = arith.constant 17 : i32
    %258 = tpu.dynamic_rotate %257 by %c17_i32_139 dim 1 : vector<8x512xf32>, i32 -> vector<8x512xf32>
    %c0_140 = arith.constant 0 : index
    %c0_141 = arith.constant 0 : index
    %c0_142 = arith.constant 0 : index
    %259 = vector.load %arg12[%c0_140, %c0_141, %c0_142] : memref<9x1x512xf32, #tpu.memory_space<vmem>>, vector<1x1x512xf32>
    %260 = vector.shape_cast %259 : vector<1x1x512xf32> to vector<1x512xf32>
    %261 = vector.broadcast %260 : vector<1x512xf32> to vector<8x512xf32>
    %262 = arith.mulf %258, %261 : vector<8x512xf32>
    %c16_i32_143 = arith.constant 16 : i32
    %263 = tpu.dynamic_rotate %257 by %c16_i32_143 dim 1 : vector<8x512xf32>, i32 -> vector<8x512xf32>
    %c1_144 = arith.constant 1 : index
    %c0_145 = arith.constant 0 : index
    %c0_146 = arith.constant 0 : index
    %264 = vector.load %arg12[%c1_144, %c0_145, %c0_146] : memref<9x1x512xf32, #tpu.memory_space<vmem>>, vector<1x1x512xf32>
    %265 = vector.shape_cast %264 : vector<1x1x512xf32> to vector<1x512xf32>
    %266 = vector.broadcast %265 : vector<1x512xf32> to vector<8x512xf32>
    %267 = arith.mulf %263, %266 : vector<8x512xf32>
    %c15_i32_147 = arith.constant 15 : i32
    %268 = tpu.dynamic_rotate %257 by %c15_i32_147 dim 1 : vector<8x512xf32>, i32 -> vector<8x512xf32>
    %c2_148 = arith.constant 2 : index
    %c0_149 = arith.constant 0 : index
    %c0_150 = arith.constant 0 : index
    %269 = vector.load %arg12[%c2_148, %c0_149, %c0_150] : memref<9x1x512xf32, #tpu.memory_space<vmem>>, vector<1x1x512xf32>
    %270 = vector.shape_cast %269 : vector<1x1x512xf32> to vector<1x512xf32>
    %271 = vector.broadcast %270 : vector<1x512xf32> to vector<8x512xf32>
    %272 = arith.mulf %268, %271 : vector<8x512xf32>
    %c1_i32_151 = arith.constant 1 : i32
    %273 = tpu.dynamic_rotate %257 by %c1_i32_151 dim 1 : vector<8x512xf32>, i32 -> vector<8x512xf32>
    %c3_152 = arith.constant 3 : index
    %c0_153 = arith.constant 0 : index
    %c0_154 = arith.constant 0 : index
    %274 = vector.load %arg12[%c3_152, %c0_153, %c0_154] : memref<9x1x512xf32, #tpu.memory_space<vmem>>, vector<1x1x512xf32>
    %275 = vector.shape_cast %274 : vector<1x1x512xf32> to vector<1x512xf32>
    %276 = vector.broadcast %275 : vector<1x512xf32> to vector<8x512xf32>
    %277 = arith.mulf %273, %276 : vector<8x512xf32>
    %c511_i32_155 = arith.constant 511 : i32
    %278 = tpu.dynamic_rotate %257 by %c511_i32_155 dim 1 : vector<8x512xf32>, i32 -> vector<8x512xf32>
    %c5_156 = arith.constant 5 : index
    %c0_157 = arith.constant 0 : index
    %c0_158 = arith.constant 0 : index
    %279 = vector.load %arg12[%c5_156, %c0_157, %c0_158] : memref<9x1x512xf32, #tpu.memory_space<vmem>>, vector<1x1x512xf32>
    %280 = vector.shape_cast %279 : vector<1x1x512xf32> to vector<1x512xf32>
    %281 = vector.broadcast %280 : vector<1x512xf32> to vector<8x512xf32>
    %282 = arith.mulf %278, %281 : vector<8x512xf32>
    %c497_i32_159 = arith.constant 497 : i32
    %283 = tpu.dynamic_rotate %257 by %c497_i32_159 dim 1 : vector<8x512xf32>, i32 -> vector<8x512xf32>
    %c6_160 = arith.constant 6 : index
    %c0_161 = arith.constant 0 : index
    %c0_162 = arith.constant 0 : index
    %284 = vector.load %arg12[%c6_160, %c0_161, %c0_162] : memref<9x1x512xf32, #tpu.memory_space<vmem>>, vector<1x1x512xf32>
    %285 = vector.shape_cast %284 : vector<1x1x512xf32> to vector<1x512xf32>
    %286 = vector.broadcast %285 : vector<1x512xf32> to vector<8x512xf32>
    %287 = arith.mulf %283, %286 : vector<8x512xf32>
    %c496_i32_163 = arith.constant 496 : i32
    %288 = tpu.dynamic_rotate %257 by %c496_i32_163 dim 1 : vector<8x512xf32>, i32 -> vector<8x512xf32>
    %c7_164 = arith.constant 7 : index
    %c0_165 = arith.constant 0 : index
    %c0_166 = arith.constant 0 : index
    %289 = vector.load %arg12[%c7_164, %c0_165, %c0_166] : memref<9x1x512xf32, #tpu.memory_space<vmem>>, vector<1x1x512xf32>
    %290 = vector.shape_cast %289 : vector<1x1x512xf32> to vector<1x512xf32>
    %291 = vector.broadcast %290 : vector<1x512xf32> to vector<8x512xf32>
    %292 = arith.mulf %288, %291 : vector<8x512xf32>
    %c495_i32_167 = arith.constant 495 : i32
    %293 = tpu.dynamic_rotate %257 by %c495_i32_167 dim 1 : vector<8x512xf32>, i32 -> vector<8x512xf32>
    %c8_168 = arith.constant 8 : index
    %c0_169 = arith.constant 0 : index
    %c0_170 = arith.constant 0 : index
    %294 = vector.load %arg12[%c8_168, %c0_169, %c0_170] : memref<9x1x512xf32, #tpu.memory_space<vmem>>, vector<1x1x512xf32>
    %295 = vector.shape_cast %294 : vector<1x1x512xf32> to vector<1x512xf32>
    %296 = vector.broadcast %295 : vector<1x512xf32> to vector<8x512xf32>
    %297 = arith.mulf %293, %296 : vector<8x512xf32>
    %298 = tpu.concatenate %262, %267, %272, %277, %257, %282, %287, %292, %297 in 0 : vector<8x512xf32>, vector<8x512xf32>, vector<8x512xf32>, vector<8x512xf32>, vector<8x512xf32>, vector<8x512xf32>, vector<8x512xf32>, vector<8x512xf32>, vector<8x512xf32> -> vector<72x512xf32>
    %299 = arith.truncf %298 : vector<72x512xf32> to vector<72x512xbf16>
    %c0_171 = arith.constant 0 : index
    %c0_172 = arith.constant 0 : index
    %300 = vector.load %arg10[%c0_171, %c0_172] : memref<1x72xbf16, #tpu.memory_space<vmem>>, vector<1x72xbf16>
    %cst_173 = arith.constant dense<0.000000e+00> : vector<1x512xf32>
    %301 = tpu.matmul %300, %299, %cst_173 {dimension_numbers = #tpu.dot_dimension_numbers<[1], [0], [0], [1], [0, 0, 1, 1], [], []>} : vector<1x72xbf16>, vector<72x512xbf16>, vector<1x512xf32> -> vector<1x512xf32>
    %c0_174 = arith.constant 0 : index
    %c0_175 = arith.constant 0 : index
    %302 = vector.load %arg11[%c0_174, %c0_175] : memref<1x1xf32, #tpu.memory_space<vmem>>, vector<1x1xf32>
    %303 = vector.broadcast %302 : vector<1x1xf32> to vector<1x512xf32>
    %304 = arith.addf %301, %303 : vector<1x512xf32>
    %cst_176 = arith.constant 1.000000e+00 : f32
    %305 = vector.broadcast %cst_176 : f32 to vector<1x512xf32>
    %306 = arith.subf %305, %3 : vector<1x512xf32>
    %307 = vector.broadcast %3 : vector<1x512xf32> to vector<3x512xf32>
    %308 = arith.mulf %4, %307 : vector<3x512xf32>
    %309 = arith.mulf %2, %306 : vector<1x512xf32>
    %310 = vector.broadcast %309 : vector<1x512xf32> to vector<3x512xf32>
    %311 = arith.addf %308, %310 : vector<3x512xf32>
    %312 = arith.subf %311, %1 : vector<3x512xf32>
    %313 = vector.broadcast %306 : vector<1x512xf32> to vector<3x512xf32>
    %314 = arith.mulf %312, %313 : vector<3x512xf32>
    %cst_177 = arith.constant 5.000000e-02 : f32
    %315 = vector.broadcast %cst_177 : f32 to vector<1x512xf32>
    %316 = arith.maximumf %3, %315 : vector<1x512xf32>
    %cst_178 = arith.constant 1.000000e+00 : f32
    %317 = vector.broadcast %cst_178 : f32 to vector<1x512xf32>
    %318 = arith.divf %317, %316 : vector<1x512xf32>
    %319 = vector.broadcast %2 : vector<1x512xf32> to vector<3x512xf32>
    %320 = arith.subf %1, %319 : vector<3x512xf32>
    %321 = vector.broadcast %318 : vector<1x512xf32> to vector<3x512xf32>
    %322 = arith.mulf %320, %321 : vector<3x512xf32>
    %323 = vector.broadcast %2 : vector<1x512xf32> to vector<3x512xf32>
    %324 = arith.addf %322, %323 : vector<3x512xf32>
    %325 = arith.subf %324, %4 : vector<3x512xf32>
    %cst_179 = arith.constant 1.000000e+00 : f32
    %326 = vector.broadcast %cst_179 : f32 to vector<1x512xf32>
    %327 = arith.subf %326, %318 : vector<1x512xf32>
    %328 = vector.broadcast %327 : vector<1x512xf32> to vector<3x512xf32>
    %329 = arith.mulf %325, %328 : vector<3x512xf32>
    %330 = arith.addf %314, %329 : vector<3x512xf32>
    %cst_180 = arith.constant dense<0.000000e+00> : vector<512xf32>
    %331 = vector.multi_reduction <add>, %330, %cst_180 [0] : vector<3x512xf32> to vector<512xf32>
    %332 = vector.shape_cast %331 : vector<512xf32> to vector<1x512xf32>
    %cst_181 = arith.constant 3.000000e+00 : f32
    %333 = vector.broadcast %cst_181 : f32 to vector<1x512xf32>
    %334 = arith.divf %332, %333 : vector<1x512xf32>
    %335 = arith.addf %334, %304 : vector<1x512xf32>
    %cst_182 = arith.constant 1.000000e-01 : f32
    %336 = vector.broadcast %cst_182 : f32 to vector<1x512xf32>
    %337 = arith.mulf %336, %335 : vector<1x512xf32>
    %338 = arith.subf %2, %337 : vector<1x512xf32>
    %c0_183 = arith.constant 0 : index
    %c0_184 = arith.constant 0 : index
    %339 = vector.load %arg15[%c0_183, %c0_184] : memref<1x512xf32, #tpu.memory_space<vmem>>, vector<1x512xf32>
    tpu.vector_store %arg15[%c0_183, %c0_184], %338 {strides = array<i32>} : memref<1x512xf32, #tpu.memory_space<vmem>>, vector<1x512xf32>,
    return
  }
  func.func @transform_0(%arg0: i32) -> (i32, i32) {
    %c0_i32 = arith.constant 0 : i32
    %c0_i32_0 = arith.constant 0 : i32
    %c0_i32_1 = arith.constant 0 : i32
    return %c0_i32, %c0_i32_0 : i32, i32
  }
  func.func @transform_1(%arg0: i32) -> (i32, i32) {
    %c0_i32 = arith.constant 0 : i32
    %c0_i32_0 = arith.constant 0 : i32
    %c0_i32_1 = arith.constant 0 : i32
    return %c0_i32, %c0_i32_0 : i32, i32
  }
  func.func @transform_2(%arg0: i32) -> (i32, i32) {
    %c0_i32 = arith.constant 0 : i32
    %c0_i32_0 = arith.constant 0 : i32
    %c0_i32_1 = arith.constant 0 : i32
    return %c0_i32, %c0_i32_0 : i32, i32
  }
  func.func @transform_3(%arg0: i32) -> (i32, i32) {
    %c0_i32 = arith.constant 0 : i32
    %c0_i32_0 = arith.constant 0 : i32
    %c0_i32_1 = arith.constant 0 : i32
    return %c0_i32, %c0_i32_0 : i32, i32
  }
  func.func @transform_4(%arg0: i32) -> (i32, i32) {
    %c0_i32 = arith.constant 0 : i32
    %c0_i32_0 = arith.constant 0 : i32
    %c0_i32_1 = arith.constant 0 : i32
    return %c0_i32, %c0_i32_0 : i32, i32
  }
  func.func @transform_5(%arg0: i32) -> (i32, i32) {
    %c0_i32 = arith.constant 0 : i32
    %c0_i32_0 = arith.constant 0 : i32
    %c0_i32_1 = arith.constant 0 : i32
    return %c0_i32, %c0_i32_0 : i32, i32
  }
  func.func @transform_6(%arg0: i32) -> (i32, i32) {
    %c0_i32 = arith.constant 0 : i32
    %c0_i32_0 = arith.constant 0 : i32
    %c0_i32_1 = arith.constant 0 : i32
    return %c0_i32, %c0_i32_0 : i32, i32
  }
  func.func @transform_7(%arg0: i32) -> (i32, i32) {
    %c0_i32 = arith.constant 0 : i32
    %c0_i32_0 = arith.constant 0 : i32
    %c0_i32_1 = arith.constant 0 : i32
    return %c0_i32, %c0_i32_0 : i32, i32
  }
  func.func @transform_8(%arg0: i32) -> (i32, i32) {
    %c0_i32 = arith.constant 0 : i32
    %c0_i32_0 = arith.constant 0 : i32
    %c0_i32_1 = arith.constant 0 : i32
    return %c0_i32, %c0_i32_0 : i32, i32
  }
  func.func @transform_9(%arg0: i32) -> (i32, i32) {
    %c0_i32 = arith.constant 0 : i32
    %c0_i32_0 = arith.constant 0 : i32
    %c0_i32_1 = arith.constant 0 : i32
    return %c0_i32, %c0_i32_0 : i32, i32
  }
  func.func @transform_10(%arg0: i32) -> (i32, i32) {
    %c0_i32 = arith.constant 0 : i32
    %c0_i32_0 = arith.constant 0 : i32
    %c0_i32_1 = arith.constant 0 : i32
    return %c0_i32, %c0_i32_0 : i32, i32
  }
  func.func @transform_11(%arg0: i32) -> (i32, i32, i32) {
    %c0_i32 = arith.constant 0 : i32
    %c0_i32_0 = arith.constant 0 : i32
    %c0_i32_1 = arith.constant 0 : i32
    %c0_i32_2 = arith.constant 0 : i32
    return %c0_i32, %c0_i32_0, %c0_i32_1 : i32, i32, i32
  }
  func.func @transform_12(%arg0: i32) -> (i32, i32, i32) {
    %c0_i32 = arith.constant 0 : i32
    %c0_i32_0 = arith.constant 0 : i32
    %c0_i32_1 = arith.constant 0 : i32
    %c0_i32_2 = arith.constant 0 : i32
    return %c0_i32, %c0_i32_0, %c0_i32_1 : i32, i32, i32
  }
  func.func @transform_13(%arg0: i32) -> (i32, i32) {
    %c0_i32 = arith.constant 0 : i32
    %c0_i32_0 = arith.constant 0 : i32
    %c0_i32_1 = arith.constant 0 : i32
    return %c0_i32, %c0_i32_0 : i32, i32
  }
  func.func @transform_14(%arg0: i32) -> (i32, i32) {
    %c0_i32 = arith.constant 0 : i32
    %c0_i32_0 = arith.constant 0 : i32
    %c0_i32_1 = arith.constant 0 : i32
    return %c0_i32, %c0_i32_0 : i32, i32
  }
}

</mosaic_0001>

<bundles_post_ra>
// kernel: a_net_forward.1
= control target key start
LH: loop header
LB: loop body
LE: loop exit
PB: predicated region body
PF: predicated region fallthrough
CT: control target
= control target key end

     0   :  { %v2682_v0 = vmov 4   ;;  %v4990_v4 = vmov 0   ;;  %s5034_s20 = smov 17   ;;  %v2685_v12 = vmov 1   ;;  %s2686_s23 = smov 16   ;;  %v2688_v13 = vmov 2   ;;  %s4974_s1 = inlined_call_operand.vmem [shape: bf16[8,9], index: 1, kind: input, shape index: {}]   ;;  %s4975_s0 = inlined_call_operand.vmem [shape: f32[8,512], index: 0, kind: input, shape index: {}]   ;;  %s4976_s2 = inlined_call_operand.vmem [shape: f32[8,1], index: 2, kind: input, shape index: {}]   ;;  %s4977_s11 = inlined_call_operand.vmem [shape: f32[9,1,512], index: 11, kind: input, shape index: {}]   ;;  %s4978_s13 = inlined_call_operand.vmem [shape: f32[2,512], index: 13, kind: input, shape index: {}]   ;;  %s4979_s3 = inlined_call_operand.vmem [shape: bf16[16,72], index: 3, kind: input, shape index: {}]   ;;  %s4980_s4 = inlined_call_operand.vmem [shape: f32[16,1], index: 4, kind: input, shape index: {}]   ;;  %s4981_s12 = inlined_call_operand.vmem [shape: f32[9,1,512], index: 12, kind: input, shape index: {}]   ;;  %s4982_s5 = inlined_call_operand.vmem [shape: bf16[16,144], index: 5, kind: input, shape index: {}]   ;;  %s4983_s6 = inlined_call_operand.vmem [shape: f32[16,1], index: 6, kind: input, shape index: {}]   ;;  %s4984_s7 = inlined_call_operand.vmem [shape: bf16[8,144], index: 7, kind: input, shape index: {}]   ;;  %s4985_s8 = inlined_call_operand.vmem [shape: f32[8,1], index: 8, kind: input, shape index: {}]   ;;  %s4986_s10 = inlined_call_operand.<no memory space> [shape: f32[1,1], index: 10, kind: input, shape index: {}]   ;;  %s4987_s9 = inlined_call_operand.vmem [shape: bf16[1,72], index: 9, kind: input, shape index: {}]   ;;  %s4988_s14 = inlined_call_operand.vmem [shape: f32[1,512], index: 14, kind: output, shape index: {}]  }
   0x1   :  { %2654 = vset.pattern.permute.xlu0 %v2682_v0  ;;  %v54_v1 = vld [vmem:[%s4974_s1] sm:$0xf]  ;;  %v2789_v2 = vld [vmem:[%s4975_s0 + $0x8] sm:$0xff]  ;;  %v2794_v3 = vld [vmem:[%s4975_s0 + $0x10] sm:$0xff]  ;;  %2655 = vset.pattern.permute.xlu1 %v4990_v4  ;;  %s2687_s24 = smov 15   ;;  %s2689_s25 = smov 1   ;;  %v4989_v35 = vlaneseq }
   0x2   :  { %v2797_v5 = vunpack.c.l.bf16 %v54_v1  ;;  %v2800_v6 = vrot.slane %v2789_v2, 3  ;;  %v2805_v7 = vld [vmem:[%s4975_s0] sm:$0xff]  ;;  %1182 = vmatprep.mubr.bf16.mxu0 %v4990_v4  ;;  %1225 = vmatprep.mubr.bf16.mxu1 %v4990_v4  ;;  %v2813_v8 = vrot.slane %v2794_v3, 3  ;;  %v2821_v10 = vld [vmem:[%s4975_s0 + $0x18] sm:$0xff]  ;;  %v2690_v14 = vmov 3   ;;  %s2691_s26 = smov 127  }
   0x3   :  { %v2816_v9 = vrot.slane %v2805_v7, 3  ;;  %v2828_v11 = vrot.slane %v2821_v10, 3  ;;  %v2692_v15 = vmov 5   ;;  %s2693_s27 = smov 113   ;;  %v2694_v16 = vmov 6   ;;  %s2695_s28 = smov 112  }
   0x4   :  { %5119 = vst [vmem:[#allocation3_spill] sm:$0xff] %v2800_v6  ;;  %58 = vperm.xlu0 %2654, %v2797_v5   ;;  %95 = vrot.lane.b32.xlu1 %v2800_v6, %s5034_s20  ;;  %5120 = vst [vmem:[#allocation4_spill] sm:$0xff] %v2813_v8  ;;  %v2696_v17 = vmov 7   ;;  %s5032_s29 = smov 111   ;;  %v2698_v18 = vmov 8   ;;  %v638_v19 = vld [vmem:[%s4976_s2] sm:$0xff] }
   0x5   :  { %5121 = vst [vmem:[#allocation5_spill] sm:$0xff] %v2816_v9  ;;  %5122 = vst [vmem:[#allocation6_spill] sm:$0xff] %v2828_v11  ;;  %v2933_v37 = vshrl.u32 %v4989_v35, 7  ;;  %v2940_v40 = vand.u32 127, %v4989_v35  ;;  %v108_v43 = vld [vmem:[%s4977_s11] sm:$0xf] }
   0x6   :  { %v2596_v48 = vld [vmem:[%s4977_s11 + $0x4] sm:$0xf]  ;;  %v2597_v55 = vld [vmem:[%s4977_s11 + $0x8] sm:$0xf]  ;;  %v2598_v60 = vld [vmem:[%s4977_s11 + $0xc] sm:$0xf] }
   0x7   :  { %5123 = vst [vmem:[#allocation7_spill] sm:$0xff] %v2933_v37  ;;  %v2943_v41 = vsub.s32 2, %v2933_v37  ;;  %v2951_v44 = vsub.s32 3, %v2933_v37  ;;  %v2956_v46 = vsub.s32 1, %v2933_v37  ;;  %v2959_v47 = vsub.s32 0, %v2933_v37  ;;  %s2700_s15 = smov 98  }
   0x8   :  { %97 = vrot.lane.b32.xlu1 %v2813_v8, %s5034_s20  ;;  %93 = vrot.lane.b32.xlu0 %v2816_v9, %s5034_s20  ;;  %vm103_vm0 = vcmp.lt.s32.totalorder %v2940_v40, 17  ;;  %vm170_vm1 = vcmp.lt.s32.totalorder %v2940_v40, 16  ;;  %vm238_vm2 = vcmp.lt.s32.totalorder %v2940_v40, 15  ;;  %v2599_v1 = vld [vmem:[%s4977_s11 + $0x14] sm:$0xf]  ;;  %vm306_vm3 = vcmp.lt.s32.totalorder %v2940_v40, 1 }
   0x9   :  { %2656 = vset.pattern.permute.xlu0 %v2685_v12  ;;  %5124 = vst [vmem:[#allocation8_spill] sm:$0xff] %v2951_v44  ;;  %5125 = vst [vmem:[#allocation9_spill] sm:$0xff] %v2959_v47  ;;  %v2966_v49 = vrot.slane %v108_v43, %v2943_v41  ;;  %v2970_v50 = vrot.slane %v2805_v7, %v2951_v44  ;;  %v2974_v51 = vrot.slane %v2789_v2, %v2951_v44  ;;  %s2701_s2 = smov 96   ;;  %s2702_s16 = smov 126  }
   0xa   :  { %v2978_v52 = vrot.slane %v2794_v3, %v2951_v44  ;;  %v2982_v53 = vrot.slane %v2821_v10, %v2951_v44  ;;  %v2985_v54 = vrot.slane %v108_v43, %v2959_v47  ;;  %v2993_v57 = vrot.slane %v108_v43, %v2956_v46  ;;  %v2600_v10 = vld [vmem:[%s4977_s11 + $0x18] sm:$0xf]  ;;  %s2703_s17 = smov 30   ;;  %s2704_s18 = smov 2  }
   0xb   :  { %5126 = vst [vmem:[#allocation10_spill] sm:$0xff] %v2966_v49  ;;  %5127 = vst [vmem:[#allocation11_spill] sm:$0xff] %v2970_v50  ;;  %v2996_v58 = vrot.slane %v108_v43, %v2951_v44  ;;  %v3000_v59 = vrot.slane %v2596_v48, %v2956_v46  ;;  %v3008_v62 = vrot.slane %v2596_v48, %v2959_v47  ;;  %vm374_vm4 = vcmp.lt.s32.totalorder %v2940_v40, 127  ;;  %s2705_s19 = smov 34   ;;  %s2706_s1 = smov 32  }
   0xc   :  { %135 = vperm.xlu1 %2655, %v2797_v5   ;;  %99 = vrot.lane.b32.xlu0 %v2828_v11, %s5034_s20  ;;  %5128 = vst [vmem:[#allocation12_spill] sm:$0xff] %v2974_v51  ;;  %5129 = vst [vmem:[#allocation13_spill] sm:$0xff] %v2978_v52  ;;  %v3011_v63 = vrot.slane %v2596_v48, %v2943_v41  ;;  %v3014_v0 = vrot.slane %v2596_v48, %v2951_v44  ;;  %vm442_vm5 = vcmp.lt.s32.totalorder %v2940_v40, 113 }
   0xd   :  { %5130 = vst [vmem:[#allocation14_spill] sm:$0xff] %v2982_v53  ;;  %5131 = vst [vmem:[#allocation15_spill] sm:$0xff] %v2985_v54  ;;  %v3021_v2 = vrot.slane %v2597_v55, %v2956_v46  ;;  %v3024_v3 = vrot.slane %v2597_v55, %v2943_v41  ;;  %v3030_v7 = vrot.slane %v2597_v55, %v2951_v44  ;;  %vm510_vm6 = vcmp.lt.s32.totalorder %v2940_v40, 112 }
   0xe   :  { %5132 = vst [vmem:[#allocation16_spill] sm:$0xff] %v2993_v57  ;;  %5133 = vst [vmem:[#allocation17_spill] sm:$0xff] %v2996_v58  ;;  %v3036_v12 = vrot.slane %v2598_v60, %v2956_v46  ;;  %v3060_v43 = vrot.slane %v2599_v1, %v2956_v46  ;;  %v3072_v35 = vrot.slane %v2599_v1, %v2951_v44  ;;  %vm5063_vm7 = vcmp.lt.s32.totalorder %v2940_v40, 111 }
   0xf   :  { %5134 = vst [vmem:[#allocation18_spill] sm:$0xff] %v3000_v59  ;;  %5136 = vst [vmem:[#allocation20_spill] sm:$0xff] %v3008_v62 }
  0x10   :  { %164 = vrot.lane.b32.xlu1 %v2800_v6, %s2686_s23  ;;  %162 = vrot.lane.b32.xlu0 %v2816_v9, %s2686_s23  ;;  %5137 = vst [vmem:[#allocation21_spill] sm:$0xff] %v3011_v63  ;;  %5138 = vst [vmem:[#allocation22_spill] sm:$0xff] %v3014_v0 }
  0x11   :  { %5139 = vst [vmem:[#allocation23_spill] sm:$0xff] %v3021_v2  ;;  %5140 = vst [vmem:[#allocation24_spill] sm:$0xff] %v3024_v3 }
  0x12   :  { %5142 = vst [vmem:[#allocation26_spill] sm:$0xff] %v3030_v7  ;;  %5143 = vst [vmem:[#allocation27_spill] sm:$0xff] %v3036_v12 }
  0x13   :  { %5148 = vst [vmem:[#allocation32_spill] sm:$0xff] %v3060_v43  ;;  %5150 = vst [vmem:[#allocation34_spill] sm:$0xff] %v3072_v35 }
  0x14   :  { %168 = vrot.lane.b32.xlu1 %v2828_v11, %s2686_s23  ;;  %166 = vrot.lane.b32.xlu0 %v2813_v8, %s2686_s23 }
  0x18   :  { %230 = vrot.lane.b32.xlu1 %v2816_v9, %s2687_s24  ;;  %203 = vperm.xlu0 %2656, %v2797_v5  }
  0x1c   :  { %232 = vrot.lane.b32.xlu1 %v2800_v6, %s2687_s24  ;;  %234 = vrot.lane.b32.xlu0 %v2813_v8, %s2687_s24 }
  0x1d   :  { %2657 = vset.pattern.permute.xlu0 %v2688_v13  ;;  %v3039_v13 = vrot.slane %v2598_v60, %v2943_v41 }
  0x1f   :  { %5144 = vst [vmem:[#allocation28_spill] sm:$0xff] %v3039_v13 }
  0x20   :  { %236 = vrot.lane.b32.xlu1 %v2828_v11, %s2687_s24  ;;  %271 = vperm.xlu0 %2657, %v2797_v5  }
  0x24   :  { %298 = vrot.lane.b32.xlu1 %v2816_v9, %s2689_s25  ;;  %302 = vrot.lane.b32.xlu0 %v2813_v8, %s2689_s25 }
  0x25   :  { %2658 = vset.pattern.permute.xlu0 %v2690_v14  ;;  %v3042_v14 = vrot.slane %v2598_v60, %v2959_v47 }
  0x27   :  { %5145 = vst [vmem:[#allocation29_spill] sm:$0xff] %v3042_v14 }
  0x28   :  { %300 = vrot.lane.b32.xlu1 %v2800_v6, %s2689_s25  ;;  %339 = vperm.xlu0 %2658, %v2797_v5  }
  0x2c   :  { %304 = vrot.lane.b32.xlu1 %v2828_v11, %s2689_s25  ;;  %370 = vrot.lane.b32.xlu0 %v2813_v8, %s2691_s26 }
  0x2d   :  { %2659 = vset.pattern.permute.xlu0 %v2692_v15  ;;  %v3045_v15 = vrot.slane %v2598_v60, %v2951_v44 }
  0x2f   :  { %5146 = vst [vmem:[#allocation30_spill] sm:$0xff] %v3045_v15 }
  0x30   :  { %366 = vrot.lane.b32.xlu1 %v2816_v9, %s2691_s26  ;;  %407 = vperm.xlu0 %2659, %v2797_v5  }
  0x34   :  { %368 = vrot.lane.b32.xlu1 %v2800_v6, %s2691_s26  ;;  %438 = vrot.lane.b32.xlu0 %v2813_v8, %s2693_s27 }
  0x35   :  { %2660 = vset.pattern.permute.xlu0 %v2694_v16 }
  0x38   :  { %372 = vrot.lane.b32.xlu1 %v2828_v11, %s2691_s26  ;;  %475 = vperm.xlu0 %2660, %v2797_v5  }
  0x3c   :  { %434 = vrot.lane.b32.xlu1 %v2816_v9, %s2693_s27  ;;  %506 = vrot.lane.b32.xlu0 %v2813_v8, %s2695_s28 }
  0x3d   :  { %2661 = vset.pattern.permute.xlu0 %v2696_v17  ;;  %v2601_v17 = vld [vmem:[%s4977_s11 + $0x1c] sm:$0xf] }
  0x40   :  { %436 = vrot.lane.b32.xlu1 %v2800_v6, %s2693_s27  ;;  %543 = vperm.xlu0 %2661, %v2797_v5  }
  0x44   :  { %440 = vrot.lane.b32.xlu1 %v2828_v11, %s2693_s27  ;;  %574 = vrot.lane.b32.xlu0 %v2813_v8, %s5032_s29  ;;  %v3085_v8 = vrot.slane %v2600_v10, %v2943_v41 }
  0x45   :  { %2662 = vset.pattern.permute.xlu0 %v2698_v18 }
  0x46   :  { %5153 = vst [vmem:[#allocation37_spill] sm:$0xff] %v3085_v8 }
  0x48   :  { %502 = vrot.lane.b32.xlu1 %v2816_v9, %s2695_s28  ;;  %611 = vperm.xlu0 %2662, %v2797_v5   ;;  %v3027_v5 = vrot.slane %v2597_v55, %v2959_v47  ;;  %v3065_v55 = vrot.slane %v2599_v1, %v2943_v41 }
  0x4a   :  { %5141 = vst [vmem:[#allocation25_spill] sm:$0xff] %v3027_v5  ;;  %5149 = vst [vmem:[#allocation33_spill] sm:$0xff] %v3065_v55 }
  0x4c   :  { %504 = vrot.lane.b32.xlu1 %v2800_v6, %s2695_s28  ;;  %2663 = vset.pattern.permute.xlu0 %v4990_v4  ;;  %v3075_v4 = vrot.slane %v2600_v10, %v2959_v47 }
  0x4e   :  { %5151 = vst [vmem:[#allocation35_spill] sm:$0xff] %v3075_v4 }
  0x50   :  { %508 = vrot.lane.b32.xlu1 %v2828_v11, %s2695_s28 }
  0x54   :  { %570 = vrot.lane.b32.xlu1 %v2816_v9, %s5032_s29  ;;  %v3088_v9 = vrot.slane %v2600_v10, %v2951_v44 }
  0x56   :  { %5154 = vst [vmem:[#allocation38_spill] sm:$0xff] %v3088_v9  ;;  %v2602_v9 = vld [vmem:[%s4977_s11 + $0x20] sm:$0xf] }
  0x58   :  { %572 = vrot.lane.b32.xlu1 %v2800_v6, %s5032_s29 }
  0x5c   :  { %576 = vrot.lane.b32.xlu1 %v2828_v11, %s5032_s29  ;;  %v3078_v11 = vrot.slane %v2600_v10, %v2956_v46  ;;  %v3105_v10 = vrot.slane %v2601_v17, %v2956_v46 }
  0x5e   :  { %5152 = vst [vmem:[#allocation36_spill] sm:$0xff] %v3078_v11  ;;  %5156 = vst [vmem:[#allocation40_spill] sm:$0xff] %v3105_v10 }
  0x60   :  { %641 = vperm.xlu1 %2655, %v638_v19   ;;  %v3057_v19 = vrot.slane %v2599_v1, %v2959_v47 }
  0x62   :  { %5147 = vst [vmem:[#allocation31_spill] sm:$0xff] %v3057_v19 }
  0x76   :  { %v2900_v20 = vpop.permute.xlu1 %95 }
  0x7a   :  { %v2904_v22 = vpop.permute.xlu1 %97 }
  0x7b   :  { %v105_v60 = vsel %vm103_vm0, %v2900_v20, %v2904_v22 }
  0x7f   :  { %v2902_v21 = vpop.permute.xlu0 %58 }
  0x83   :  { %v2906_v23 = vpop.permute.xlu0 %93 }
  0x84   :  { %v106_v18 = vsel %vm103_vm0, %v2906_v23, %v2900_v20  ;;  %v3091_v20 = vrot.slane %v2601_v17, %v2959_v47 }
  0x85   :  { %v131_v1 = vmul.f32 %v2993_v57, %v106_v18  ;;  %v132_v18 = vmul.f32 %v2966_v49, %v105_v60  ;;  %v3120_v57 = vrot.slane %v2601_v17, %v2943_v41 }
  0x86   :  { %5155 = vst [vmem:[#allocation39_spill] sm:$0xff] %v3091_v20 }
  0x87   :  { %v2908_v24 = vpop.permute.xlu1 %135  ;;  %v2910_v25 = vpop.permute.xlu0 %99  ;;  %5157 = vst [vmem:[#allocation41_spill] sm:$0xff] %v3120_v57  ;;  %v145_v57 = vrot.slane %v131_v1, %v2959_v47  ;;  %v149_v1 = vrot.slane %v132_v18, %v2959_v47 }
  0x88   :  { %v107_v6 = vsel %vm103_vm0, %v2910_v25, %v2906_v23  ;;  %v104_v37 = vsel %vm103_vm0, %v2904_v22, %v2910_v25 }
  0x89   :  { %v130_v8 = vmul.f32 %v2985_v54, %v107_v6 }
  0x8b   :  { %v2912_v26 = vpop.permute.xlu1 %164  ;;  %v2914_v27 = vpop.permute.xlu0 %162 }
  0x8c   :  { %v173_v60 = vsel %vm170_vm1, %v2914_v27, %v2912_v26 }
  0x8f   :  { %v2916_v28 = vpop.permute.xlu1 %168  ;;  %v2918_v29 = vpop.permute.xlu0 %166 }
  0x90   :  { %v172_v23 = vsel %vm170_vm1, %v2912_v26, %v2918_v29  ;;  %v174_v22 = vsel %vm170_vm1, %v2916_v28, %v2914_v27  ;;  %v171_v25 = vsel %vm170_vm1, %v2918_v29, %v2916_v28  ;;  %v133_v29 = vmul.f32 %v2996_v58, %v104_v37 }
  0x91   :  { %v200_v6 = vmul.f32 %v3011_v63, %v172_v23  ;;  %v3141_v26 = vrot.slane %v2601_v17, %v2951_v44  ;;  %v3144_v27 = vrot.slane %v2602_v9, %v2959_v47  ;;  %v198_v10 = vmul.f32 %v3008_v62, %v174_v22 }
  0x92   :  { %v3152_v37 = vrot.slane %v2602_v9, %v2956_v46  ;;  %v199_v23 = vmul.f32 %v3000_v59, %v173_v60  ;;  %v3159_v63 = vrot.slane %v2602_v9, %v2943_v41  ;;  %v78_v22 = vmul.f32 %v2974_v51, %v2902_v21 }
  0x93   :  { %v2920_v30 = vpop.permute.xlu1 %230  ;;  %v2922_v31 = vpop.permute.xlu0 %203  ;;  %5158 = vst [vmem:[#allocation42_spill] sm:$0xff] %v3141_v26  ;;  %5159 = vst [vmem:[#allocation43_spill] sm:$0xff] %v3144_v27  ;;  %v153_v60 = vrot.slane %v133_v29, %v2959_v47  ;;  %v209_v29 = vrot.slane %v198_v10, %v2959_v47 }
  0x94   :  { %5160 = vst [vmem:[#allocation44_spill] sm:$0xff] %v3152_v37  ;;  %5161 = vst [vmem:[#allocation45_spill] sm:$0xff] %v3159_v63 }
  0x97   :  { %v2924_v32 = vpop.permute.xlu1 %232  ;;  %v2928_v34 = vpop.permute.xlu0 %234 }
  0x98   :  { %v241_v49 = vsel %vm238_vm2, %v2920_v30, %v2924_v32  ;;  %v240_v28 = vsel %vm238_vm2, %v2924_v32, %v2928_v34  ;;  %v201_v32 = vmul.f32 %v3014_v0, %v171_v25  ;;  %v79_v25 = vmul.f32 %v2978_v52, %v2902_v21 }
  0x99   :  { %v267_v58 = vmul.f32 %v3021_v2, %v241_v49  ;;  %v268_v17 = vmul.f32 %v3024_v3, %v240_v28  ;;  %v141_v0 = vrot.slane %v130_v8, %v2959_v47  ;;  %v217_v49 = vrot.slane %v200_v6, %v2959_v47 }
  0x9a   :  { %v155_v52 = vmul.f32 %v145_v57, %v2908_v24  ;;  %v156_v8 = vmul.f32 %v149_v1, %v2908_v24  ;;  %v221_v6 = vrot.slane %v201_v32, %v2959_v47  ;;  %v80_v57 = vmul.f32 %v2982_v53, %v2902_v21 }
  0x9b   :  { %v2926_v33 = vpop.permute.xlu1 %236  ;;  %v2935_v38 = vpop.permute.xlu0 %271  ;;  %v281_v59 = vrot.slane %v267_v58, %v2959_v47  ;;  %v285_v3 = vrot.slane %v268_v17, %v2959_v47  ;;  %v157_v58 = vmul.f32 %v153_v60, %v2908_v24 }
  0x9c   :  { %v239_v28 = vsel %vm238_vm2, %v2928_v34, %v2926_v33  ;;  %v242_v18 = vsel %vm238_vm2, %v2926_v33, %v2920_v30  ;;  %v213_v34 = vrot.slane %v199_v23, %v2959_v47  ;;  %v3188_v30 = vrot.slane %v2602_v9, %v2951_v44 }
  0x9d   :  { %v77_v33 = vmul.f32 %v2970_v50, %v2902_v21  ;;  %v266_v10 = vmul.f32 %v3027_v5, %v242_v18  ;;  %v269_v32 = vmul.f32 %v3030_v7, %v239_v28  ;;  %v154_v23 = vmul.f32 %v141_v0, %v2908_v24 }
  0x9e   :  { %5162 = vst [vmem:[#allocation46_spill] sm:$0xff] %v3188_v30  ;;  %v223_v17 = vmul.f32 %v213_v34, %v2922_v31  ;;  %v224_v9 = vmul.f32 %v217_v49, %v2922_v31  ;;  %v159_v1 = vadd.f32 %v155_v52, %v78_v22  ;;  %v160_v2 = vadd.f32 %v156_v8, %v79_v25 }
  0x9f   :  { %v2930_v36 = vpop.permute.xlu1 %298  ;;  %v2945_v42 = vpop.permute.xlu0 %302  ;;  %v222_v50 = vmul.f32 %v209_v29, %v2922_v31  ;;  %v225_v21 = vmul.f32 %v221_v6, %v2922_v31  ;;  %v291_v18 = vmul.f32 %v281_v59, %v2935_v38  ;;  %v292_v28 = vmul.f32 %v285_v3, %v2935_v38 }
  0xa0   :  { %v277_v22 = vrot.slane %v266_v10, %v2959_v47  ;;  %v289_v31 = vrot.slane %v269_v32, %v2959_v47  ;;  %v158_v25 = vadd.f32 %v154_v23, %v77_v33  ;;  %v161_v60 = vadd.f32 %v157_v58, %v80_v57 }
  0xa1   :  { %v227_v49 = vadd.f32 %v223_v17, %v159_v1 }
  0xa2   :  { %v290_v57 = vmul.f32 %v277_v22, %v2935_v38  ;;  %v293_v10 = vmul.f32 %v289_v31, %v2935_v38 }
  0xa3   :  { %v2937_v39 = vpop.permute.xlu1 %300  ;;  %v3005_v61 = vpop.permute.xlu0 %339  ;;  %v295_v32 = vadd.f32 %v291_v18, %v227_v49 }
  0xa4   :  { %5135 = vst [vmem:[#allocation19_spill] sm:$0xff] %v3005_v61  ;;  %v309_v24 = vsel %vm306_vm3, %v2930_v36, %v2937_v39  ;;  %v308_v52 = vsel %vm306_vm3, %v2937_v39, %v2945_v42  ;;  %v228_v39 = vadd.f32 %v224_v9, %v160_v2 }
  0xa5   :  { %v335_v8 = vmul.f32 %v3036_v12, %v309_v24  ;;  %v336_v29 = vmul.f32 %v3039_v13, %v308_v52 }
  0xa6   :  { %v296_v23 = vadd.f32 %v292_v28, %v228_v39 }
  0xa7   :  { %v2953_v45 = vpop.permute.xlu1 %304  ;;  %v3062_v48 = vpop.permute.xlu0 %370  ;;  %v349_v1 = vrot.slane %v335_v8, %v2959_v47  ;;  %v5163_v8 = vld [vmem:[#allocation39_spill] sm:$0xff] }
  0xa8   :  { %v307_v59 = vsel %vm306_vm3, %v2945_v42, %v2953_v45  ;;  %v310_v3 = vsel %vm306_vm3, %v2953_v45, %v2930_v36  ;;  %v226_v36 = vadd.f32 %v222_v50, %v158_v25  ;;  %v229_v45 = vadd.f32 %v225_v21, %v161_v60 }
  0xa9   :  { %v334_v33 = vmul.f32 %v3042_v14, %v310_v3  ;;  %v337_v2 = vmul.f32 %v3045_v15, %v307_v59  ;;  %v353_v21 = vrot.slane %v336_v29, %v2959_v47 }
  0xaa   :  { %v294_v31 = vadd.f32 %v290_v57, %v226_v36  ;;  %v297_v59 = vadd.f32 %v293_v10, %v229_v45 }
  0xab   :  { %v2990_v56 = vpop.permute.xlu1 %366  ;;  %v3138_v54 = vpop.permute.xlu0 %407  ;;  %v345_v24 = vrot.slane %v334_v33, %v2959_v47  ;;  %v5165_v45 = vld [vmem:[#allocation19_spill] sm:$0xff] }
  0xac   :  { %v360_v57 = vmul.f32 %v353_v21, %v5165_v45  ;;  %v5167_v21 = vld [vmem:[#allocation38_spill] sm:$0xff] }
  0xad   :  { %v358_v33 = vmul.f32 %v345_v24, %v5165_v45 }
  0xaf   :  { %v3047_v16 = vpop.permute.xlu1 %368  ;;  %v3177_v51 = vpop.permute.xlu0 %438 }
  0xb0   :  { %v377_v6 = vsel %vm374_vm4, %v2990_v56, %v3047_v16  ;;  %v376_v42 = vsel %vm374_vm4, %v3047_v16, %v3062_v48 }
  0xb1   :  { %v402_v58 = vmul.f32 %v3057_v19, %v377_v6  ;;  %v403_v17 = vmul.f32 %v3060_v43, %v376_v42  ;;  %v5164_v6 = vld [vmem:[#allocation40_spill] sm:$0xff] }
  0xb3   :  { %v3102_v61 = vpop.permute.xlu1 %372  ;;  %v3213_v0 = vpop.permute.xlu0 %475 }
  0xb4   :  { %v375_v38 = vsel %vm374_vm4, %v3062_v48, %v3102_v61  ;;  %v378_v18 = vsel %vm374_vm4, %v3102_v61, %v2990_v56  ;;  %v413_v56 = vrot.slane %v402_v58, %v2959_v47  ;;  %v417_v61 = vrot.slane %v403_v17, %v2959_v47 }
  0xb5   :  { %v404_v25 = vmul.f32 %v3065_v55, %v375_v38  ;;  %v405_v60 = vmul.f32 %v3072_v35, %v378_v18 }
  0xb6   :  { %v427_v24 = vmul.f32 %v417_v61, %v3138_v54 }
  0xb7   :  { %v3149_v20 = vpop.permute.xlu1 %434  ;;  %v507_v9 = vpop.permute.xlu0 %506 }
  0xbb   :  { %v437_v62 = vpop.permute.xlu1 %436  ;;  %v544_v58 = vpop.permute.xlu0 %543 }
  0xbc   :  { %v444_v16 = vsel %vm442_vm5, %v437_v62, %v3177_v51  ;;  %v445_v50 = vsel %vm442_vm5, %v3149_v20, %v437_v62  ;;  %v357_v62 = vrot.slane %v337_v2, %v2959_v47  ;;  %v359_v2 = vmul.f32 %v349_v1, %v5165_v45  ;;  %v5166_v1 = vld [vmem:[#allocation37_spill] sm:$0xff] }
  0xbd   :  { %v470_v48 = vmul.f32 %v3075_v4, %v445_v50  ;;  %v471_v3 = vmul.f32 %v3078_v11, %v444_v16  ;;  %v421_v16 = vrot.slane %v404_v25, %v2959_v47  ;;  %v425_v50 = vrot.slane %v405_v60, %v2959_v47 }
  0xbe   :  { %v361_v10 = vmul.f32 %v357_v62, %v5165_v45  ;;  %v362_v60 = vadd.f32 %v358_v33, %v294_v31 }
  0xbf   :  { %v441_v53 = vpop.permute.xlu1 %440  ;;  %v485_v17 = vrot.slane %v471_v3, %v2959_v47  ;;  %v429_v61 = vmul.f32 %v425_v50, %v3138_v54 }
  0xc0   :  { %v443_v49 = vsel %vm442_vm5, %v3177_v51, %v441_v53  ;;  %v446_v39 = vsel %vm442_vm5, %v441_v53, %v3149_v20  ;;  %v481_v51 = vrot.slane %v470_v48, %v2959_v47  ;;  %v364_v48 = vadd.f32 %v360_v57, %v296_v23 }
  0xc1   :  { %v472_v38 = vmul.f32 %v5166_v1, %v443_v49  ;;  %v473_v18 = vmul.f32 %v5167_v21, %v446_v39  ;;  %v495_v39 = vmul.f32 %v485_v17, %v3213_v0 }
  0xc2   :  { %v494_v49 = vmul.f32 %v481_v51, %v3213_v0 }
  0xc3   :  { %v503_v34 = vpop.permute.xlu1 %502 }
  0xc7   :  { %v505_v28 = vpop.permute.xlu1 %504 }
  0xc8   :  { %v512_v52 = vsel %vm510_vm6, %v505_v28, %v507_v9  ;;  %v513_v22 = vsel %vm510_vm6, %v503_v34, %v505_v28  ;;  %v426_v28 = vmul.f32 %v413_v56, %v3138_v54  ;;  %v428_v56 = vmul.f32 %v421_v16, %v3138_v54 }
  0xc9   :  { %v538_v29 = vmul.f32 %v5163_v8, %v513_v22  ;;  %v539_v42 = vmul.f32 %v5164_v6, %v512_v52  ;;  %v363_v22 = vadd.f32 %v359_v2, %v295_v32  ;;  %v575_v32 = vpop.permute.xlu0 %574 }
  0xca   :  { %v430_v23 = vadd.f32 %v426_v28, %v362_v60  ;;  %v432_v16 = vadd.f32 %v428_v56, %v364_v48 }
  0xcb   :  { %v509_v36 = vpop.permute.xlu1 %508  ;;  %v549_v62 = vrot.slane %v538_v29, %v2959_v47  ;;  %v553_v52 = vrot.slane %v539_v42, %v2959_v47  ;;  %v489_v29 = vrot.slane %v472_v38, %v2959_v47  ;;  %v493_v42 = vrot.slane %v473_v18, %v2959_v47 }
  0xcc   :  { %v511_v53 = vsel %vm510_vm6, %v507_v9, %v509_v36  ;;  %v514_v20 = vsel %vm510_vm6, %v509_v36, %v503_v34  ;;  %v5168_v34 = vld [vmem:[#allocation41_spill] sm:$0xff]  ;;  %v365_v36 = vadd.f32 %v361_v10, %v297_v59  ;;  %v431_v45 = vadd.f32 %v427_v24, %v363_v22 }
  0xcd   :  { %v540_v3 = vmul.f32 %v5168_v34, %v511_v53  ;;  %v541_v25 = vmul.f32 %v3141_v26, %v514_v20  ;;  %v562_v2 = vmul.f32 %v549_v62, %v544_v58  ;;  %v563_v57 = vmul.f32 %v553_v52, %v544_v58  ;;  %v612_v28 = vpop.permute.xlu0 %611 }
  0xce   :  { %v498_v10 = vadd.f32 %v494_v49, %v430_v23  ;;  %v499_v51 = vadd.f32 %v495_v39, %v431_v45  ;;  %v433_v50 = vadd.f32 %v429_v61, %v365_v36  ;;  %v496_v38 = vmul.f32 %v489_v29, %v3213_v0 }
  0xcf   :  { %v571_v9 = vpop.permute.xlu1 %570  ;;  %v557_v31 = vrot.slane %v540_v3, %v2959_v47  ;;  %v561_v59 = vrot.slane %v541_v25, %v2959_v47  ;;  %v497_v18 = vmul.f32 %v493_v42, %v3213_v0 }
  0xd0   :  { %v566_v24 = vadd.f32 %v562_v2, %v498_v10  ;;  %v567_v62 = vadd.f32 %v563_v57, %v499_v51  ;;  %v500_v61 = vadd.f32 %v496_v38, %v432_v16  ;;  %v652_v38 = vld [vmem:[%s4978_s13] ss:$2 sm:$0xf] }
  0xd1   :  { %v564_v25 = vmul.f32 %v557_v31, %v544_v58  ;;  %v565_v60 = vmul.f32 %v561_v59, %v544_v58  ;;  %v501_v29 = vadd.f32 %v497_v18, %v433_v50  ;;  %vm655_vm8 = vcmp.ne.f32.partialorder %v652_v38, 0.0 }
  0xd3   :  { %v573_v53 = vpop.permute.xlu1 %572  ;;  %v568_v57 = vadd.f32 %v564_v25, %v500_v61 }
  0xd4   :  { %v580_v33 = vsel %vm5063_vm7, %v573_v53, %v575_v32  ;;  %v581_v54 = vsel %vm5063_vm7, %v571_v9, %v573_v53 }
  0xd5   :  { %v606_v17 = vmul.f32 %v3144_v27, %v581_v54  ;;  %v607_v20 = vmul.f32 %v3152_v37, %v580_v33 }
  0xd7   :  { %v617_v52 = vrot.slane %v606_v17, %v2959_v47  ;;  %v621_v22 = vrot.slane %v607_v20, %v2959_v47  ;;  %v577_v3 = vpop.permute.xlu1 %576 }
  0xd8   :  { %v579_v49 = vsel %vm5063_vm7, %v575_v32, %v577_v3  ;;  %v582_v48 = vsel %vm5063_vm7, %v577_v3, %v571_v9  ;;  %v569_v32 = vadd.f32 %v565_v60, %v501_v29  ;;  %vm5064_vm7 = vcmask 588800  }
  0xd9   :  { %v608_v36 = vmul.f32 %v3159_v63, %v579_v49  ;;  %v609_v0 = vmul.f32 %v3188_v30, %v582_v48  ;;  %v630_v39 = vmul.f32 %v617_v52, %v612_v28  ;;  %v631_v56 = vmul.f32 %v621_v22, %v612_v28 }
  0xdb   :  { %v625_v42 = vrot.slane %v608_v36, %v2959_v47  ;;  %v629_v23 = vrot.slane %v609_v0, %v2959_v47  ;;  %v642_v45 = vpop.permute.xlu1 %641  ;;  %v634_v58 = vadd.f32 %v630_v39, %v566_v24  ;;  %v635_v2 = vadd.f32 %v631_v56, %v567_v62 }
  0xdc   :  { %v5173_v24 = vmov 0  }
  0xdd   :  { %v632_v53 = vmul.f32 %v625_v42, %v612_v28  ;;  %v633_v31 = vmul.f32 %v629_v23, %v612_v28  ;;  %v644_v9 = vadd.f32 %v642_v45, %v634_v58  ;;  %v645_v59 = vadd.f32 %v642_v45, %v635_v2 }
  0xde   :  { %v688_v62 = vsel %vm655_vm8, 1, %v5173_v24 }
  0xdf   :  { %v636_v33 = vadd.f32 %v632_v53, %v568_v57  ;;  %v637_v54 = vadd.f32 %v633_v31, %v569_v32  ;;  %v3324_v10 = vmax.f32 %v644_v9, 0.0  ;;  %v3326_v51 = vmax.f32 %v645_v59, 0.0 }
  0xe0   :  { %v696_v3 = vrot.slane %v688_v62, %v2956_v46  ;;  %v692_v48 = vrot.slane %v688_v62, %v2959_v47  ;;  %v704_v0 = vrot.slane %v688_v62, %v2951_v44  ;;  %v700_v58 = vrot.slane %v688_v62, %v2943_v41 }
  0xe1   :  { %5169 = vst [vmem:[#allocation19_spill] sm:$0xff] %v3324_v10  ;;  %5170 = vst [vmem:[#allocation47_spill] sm:$0xff] %v3326_v51  ;;  %v646_v17 = vadd.f32 %v642_v45, %v636_v33  ;;  %v647_v20 = vadd.f32 %v642_v45, %v637_v54  ;;  %658 = vrot.lane.b32.xlu0 %v3326_v51, %s2691_s26  ;;  %656 = vrot.lane.b32.xlu1 %v3324_v10, %s2691_s26 }
  0xe2   :  { %vm706_vm9 = vcmp.eq.s32.totalorder %v696_v3, 1  ;;  %vm705_vm10 = vcmp.eq.s32.totalorder %v692_v48, 1  ;;  %vm708_vm11 = vcmp.eq.s32.totalorder %v704_v0, 1  ;;  %vm707_vm12 = vcmp.eq.s32.totalorder %v700_v58, 1 }
  0xe3   :  { %v3332_v16 = vmax.f32 %v646_v17, 0.0  ;;  %v3334_v50 = vmax.f32 %v647_v20, 0.0 }
  0xe5   :  { %5171 = vst [vmem:[#allocation48_spill] sm:$0xff] %v3332_v16  ;;  %5172 = vst [vmem:[#allocation49_spill] sm:$0xff] %v3334_v50  ;;  %662 = vrot.lane.b32.xlu0 %v3334_v50, %s2691_s26  ;;  %660 = vrot.lane.b32.xlu1 %v3332_v16, %s2691_s26 }
  0xe9   :  { %674 = vrot.lane.b32.xlu0 %v3326_v51, %s2689_s25  ;;  %672 = vrot.lane.b32.xlu1 %v3324_v10, %s2689_s25 }
  0xed   :  { %678 = vrot.lane.b32.xlu0 %v3334_v50, %s2689_s25  ;;  %676 = vrot.lane.b32.xlu1 %v3332_v16, %s2689_s25 }
 0x153   :  { %v659_v18 = vpop.permute.xlu0 %658  ;;  %v657_v28 = vpop.permute.xlu1 %656 }
 0x154   :  { %v666_v61 = vsel %vm374_vm4, %v657_v28, %v659_v18 }
 0x155   :  { %v668_v53 = vadd.f32 %v666_v61, %v3324_v10 }
 0x157   :  { %v663_v52 = vpop.permute.xlu0 %662  ;;  %v661_v22 = vpop.permute.xlu1 %660 }
 0x158   :  { %v665_v25 = vsel %vm374_vm4, %v659_v18, %v661_v22  ;;  %v667_v29 = vsel %vm374_vm4, %v663_v52, %v657_v28  ;;  %v664_v33 = vsel %vm374_vm4, %v661_v22, %v663_v52  ;;  %v2603_v28 = vld [vmem:[%s4978_s13 + $0x1] ss:$2 sm:$0xf]  ;;  %s2699_s13 = smov 94  }
 0x159   :  { %v669_v39 = vadd.f32 %v665_v25, %v3326_v51  ;;  %v671_v31 = vadd.f32 %v667_v29, %v3334_v50  ;;  %v670_v38 = vadd.f32 %v664_v33, %v3332_v16  ;;  %vm713_vm13 = vcmp.ne.f32.partialorder %v2603_v28, 0.0 }
 0x15a   :  { %v746_v3 = vsel %vm713_vm13, 1, %v5173_v24  ;;  %vm982_vm13 = vcmp.lt.s32.totalorder %v2940_v40, 98 }
 0x15b   :  { %v675_v60 = vpop.permute.xlu0 %674  ;;  %v673_v49 = vpop.permute.xlu1 %672  ;;  %v754_v48 = vrot.slane %v746_v3, %v2956_v46  ;;  %v758_v61 = vrot.slane %v746_v3, %v2943_v41  ;;  %v762_v29 = vrot.slane %v746_v3, %v2951_v44 }
 0x15c   :  { %v682_v36 = vsel %vm306_vm3, %v673_v49, %v675_v60 }
 0x15d   :  { %v685_v56 = vadd.f32 %v682_v36, %v3326_v51  ;;  %vm764_vm15 = vcmp.eq.s32.totalorder %v754_v48, 1  ;;  %vm3408_vm8 = vcmp.eq.s32.totalorder %v758_v61, 1 }
 0x15f   :  { %v679_v42 = vpop.permute.xlu0 %678  ;;  %v677_v23 = vpop.permute.xlu1 %676  ;;  %v710_v45 = vsel %vm706_vm9, %v669_v39, %v685_v56  ;;  %vm3412_vm9 = vcmp.eq.s32.totalorder %v762_v29, 1 }
 0x160   :  { %v683_v2 = vsel %vm306_vm3, %v679_v42, %v673_v49  ;;  %v680_v57 = vsel %vm306_vm3, %v677_v23, %v679_v42  ;;  %v681_v32 = vsel %vm306_vm3, %v675_v60, %v677_v23  ;;  %716 = vrot.lane.b32.xlu0 %v710_v45, %s2695_s28  ;;  %v750_v49 = vrot.slane %v746_v3, %v2959_v47 }
 0x161   :  { %v684_v9 = vadd.f32 %v683_v2, %v3324_v10  ;;  %v687_v59 = vadd.f32 %v680_v57, %v3334_v50  ;;  %v686_v54 = vadd.f32 %v681_v32, %v3332_v16 }
 0x162   :  { %vm763_vm14 = vcmp.eq.s32.totalorder %v750_v49, 1 }
 0x163   :  { %v709_v17 = vsel %vm705_vm10, %v668_v53, %v684_v9  ;;  %v712_v20 = vsel %vm708_vm11, %v671_v31, %v687_v59  ;;  %v711_v18 = vsel %vm707_vm12, %v670_v38, %v686_v54  ;;  %vm1062_vm10 = vcmp.lt.s32.totalorder %v2940_v40, 94 }
 0x164   :  { %714 = vrot.lane.b32.xlu1 %v709_v17, %s2695_s28  ;;  %720 = vrot.lane.b32.xlu0 %v712_v20, %s2695_s28  ;;  %vm5053_vm11 = vcmask 1043456   ;;  %vm1022_vm12 = vcmp.lt.s32.totalorder %v2940_v40, 96 }
 0x168   :  { %718 = vrot.lane.b32.xlu1 %v711_v18, %s2695_s28  ;;  %732 = vrot.lane.b32.xlu0 %v710_v45, %s2686_s23 }
 0x16c   :  { %730 = vrot.lane.b32.xlu1 %v709_v17, %s2686_s23  ;;  %736 = vrot.lane.b32.xlu0 %v712_v20, %s2686_s23 }
 0x170   :  { %734 = vrot.lane.b32.xlu1 %v711_v18, %s2686_s23 }
 0x1d2   :  { %v717_v62 = vpop.permute.xlu0 %716 }
 0x1d6   :  { %v721_v52 = vpop.permute.xlu0 %720  ;;  %v715_v22 = vpop.permute.xlu1 %714 }
 0x1d7   :  { %v724_v36 = vsel %vm510_vm6, %v715_v22, %v717_v62  ;;  %v725_v53 = vsel %vm510_vm6, %v721_v52, %v715_v22 }
 0x1d8   :  { %v726_v58 = vadd.f32 %v724_v36, %v709_v17 }
 0x1da   :  { %v733_v25 = vpop.permute.xlu0 %732  ;;  %v719_v60 = vpop.permute.xlu1 %718 }
 0x1db   :  { %v723_v0 = vsel %vm510_vm6, %v717_v62, %v719_v60  ;;  %v722_v31 = vsel %vm510_vm6, %v719_v60, %v721_v52  ;;  %v729_v52 = vadd.f32 %v725_v53, %v712_v20 }
 0x1dc   :  { %v727_v2 = vadd.f32 %v723_v0, %v710_v45  ;;  %v728_v22 = vadd.f32 %v722_v31, %v711_v18  ;;  %v2610_v0 = vld [vmem:[%s4981_s12 + $0x20] sm:$0xf] }
 0x1de   :  { %v737_v39 = vpop.permute.xlu0 %736  ;;  %v731_v56 = vpop.permute.xlu1 %730 }
 0x1df   :  { %v740_v42 = vsel %vm170_vm1, %v731_v56, %v733_v25  ;;  %v741_v23 = vsel %vm170_vm1, %v737_v39, %v731_v56 }
 0x1e0   :  { %v742_v57 = vadd.f32 %v741_v23, %v709_v17  ;;  %v743_v32 = vadd.f32 %v740_v42, %v710_v45  ;;  %v3512_v42 = vrot.slane %v2610_v0, %v2956_v46  ;;  %v3515_v23 = vrot.slane %v2610_v0, %v2951_v44 }
 0x1e2   :  { %v767_v9 = vsel %vm763_vm14, %v726_v58, %v742_v57  ;;  %v768_v59 = vsel %vm764_vm15, %v727_v2, %v743_v32  ;;  %v735_v38 = vpop.permute.xlu1 %734  ;;  %5179 = vst [vmem:[#allocation51_spill] sm:$0xff] %v3512_v42  ;;  %5180 = vst [vmem:[#allocation52_spill] sm:$0xff] %v3515_v23  ;;  %v3519_v2 = vrot.slane %v2610_v0, %v2943_v41  ;;  %vm942_vm14 = vcmp.lt.s32.totalorder %v2940_v40, 126 }
 0x1e3   :  { %v3416_v28 = vmul.f32 0.25, %v767_v9  ;;  %v3418_v45 = vmul.f32 0.25, %v768_v59  ;;  %v738_v17 = vsel %vm170_vm1, %v735_v38, %v737_v39  ;;  %v739_v62 = vsel %vm170_vm1, %v733_v25, %v735_v38 }
 0x1e4   :  { %v744_v3 = vadd.f32 %v739_v62, %v711_v18  ;;  %v745_v60 = vadd.f32 %v738_v17, %v712_v20  ;;  %v1116_v20 = vld [vmem:[%s4980_s4] sm:$0xff]  ;;  %v1117_v18 = vld [vmem:[%s4980_s4 + $0x8] sm:$0xff]  ;;  %v3507_v39 = vrot.slane %v2610_v0, %v2959_v47  ;;  %5181 = vst [vmem:[#allocation53_spill] sm:$0xff] %v3519_v2  ;;  %v2608_v0 = vld [vmem:[%s4981_s12 + $0x18] sm:$0xf]  ;;  %vm862_vm15 = vcmp.lt.s32.totalorder %v2940_v40, 30 }
 0x1e5   :  { %1054 = vrot.lane.b32.xlu1 %v3416_v28, %s2699_s13  ;;  %1056 = vrot.lane.b32.xlu0 %v3418_v45, %s2699_s13 }
 0x1e6   :  { %v769_v49 = vsel %vm3408_vm8, %v728_v22, %v744_v3  ;;  %v770_v48 = vsel %vm3412_vm9, %v729_v52, %v745_v60  ;;  %5178 = vst [vmem:[#allocation50_spill] sm:$0xff] %v3507_v39  ;;  %vm902_vm8 = vcmp.lt.s32.totalorder %v2940_v40, 2  ;;  %vm783_vm9 = vcmp.lt.s32.totalorder %v2940_v40, 34 }
 0x1e7   :  { %v3432_v36 = vmul.f32 0.25, %v769_v49  ;;  %v3434_v25 = vmul.f32 0.25, %v770_v48 }
 0x1e9   :  { %1058 = vrot.lane.b32.xlu1 %v3432_v36, %s2699_s13  ;;  %1060 = vrot.lane.b32.xlu0 %v3434_v25, %s2699_s13 }
 0x1ed   :  { %974 = vrot.lane.b32.xlu1 %v3416_v28, %s2700_s15  ;;  %976 = vrot.lane.b32.xlu0 %v3418_v45, %s2700_s15 }
 0x1f1   :  { %978 = vrot.lane.b32.xlu1 %v3432_v36, %s2700_s15  ;;  %980 = vrot.lane.b32.xlu0 %v3434_v25, %s2700_s15 }
 0x1f5   :  { %1014 = vrot.lane.b32.xlu1 %v3416_v28, %s2701_s2  ;;  %1016 = vrot.lane.b32.xlu0 %v3418_v45, %s2701_s2 }
 0x1f9   :  { %1018 = vrot.lane.b32.xlu1 %v3432_v36, %s2701_s2  ;;  %1020 = vrot.lane.b32.xlu0 %v3434_v25, %s2701_s2 }
 0x1fd   :  { %934 = vrot.lane.b32.xlu1 %v3416_v28, %s2702_s16  ;;  %936 = vrot.lane.b32.xlu0 %v3418_v45, %s2702_s16 }
 0x201   :  { %938 = vrot.lane.b32.xlu1 %v3432_v36, %s2702_s16  ;;  %940 = vrot.lane.b32.xlu0 %v3434_v25, %s2702_s16 }
 0x205   :  { %854 = vrot.lane.b32.xlu1 %v3416_v28, %s2703_s17  ;;  %856 = vrot.lane.b32.xlu0 %v3418_v45, %s2703_s17 }
 0x209   :  { %858 = vrot.lane.b32.xlu1 %v3432_v36, %s2703_s17  ;;  %860 = vrot.lane.b32.xlu0 %v3434_v25, %s2703_s17 }
 0x20d   :  { %894 = vrot.lane.b32.xlu1 %v3416_v28, %s2704_s18  ;;  %896 = vrot.lane.b32.xlu0 %v3418_v45, %s2704_s18 }
 0x211   :  { %898 = vrot.lane.b32.xlu1 %v3432_v36, %s2704_s18  ;;  %900 = vrot.lane.b32.xlu0 %v3434_v25, %s2704_s18 }
 0x215   :  { %775 = vrot.lane.b32.xlu1 %v3416_v28, %s2705_s19  ;;  %777 = vrot.lane.b32.xlu0 %v3418_v45, %s2705_s19 }
 0x219   :  { %779 = vrot.lane.b32.xlu1 %v3432_v36, %s2705_s19  ;;  %781 = vrot.lane.b32.xlu0 %v3434_v25, %s2705_s19 }
 0x21d   :  { %814 = vrot.lane.b32.xlu1 %v3416_v28, %s2706_s1  ;;  %816 = vrot.lane.b32.xlu0 %v3418_v45, %s2706_s1 }
 0x221   :  { %818 = vrot.lane.b32.xlu1 %v3432_v36, %s2706_s1  ;;  %820 = vrot.lane.b32.xlu0 %v3434_v25, %s2706_s1 }
 0x225   :  { %1120 = vperm.xlu1 %2655, %v1116_v20   ;;  %1125 = vperm.xlu0 %2663, %v1117_v18   ;;  %v2609_v18 = vld [vmem:[%s4981_s12 + $0x1c] sm:$0xf] }
 0x257   :  { %v1057_v56 = vpop.permute.xlu0 %1056  ;;  %v1055_v61 = vpop.permute.xlu1 %1054 }
 0x258   :  { %v1065_v29 = vsel %vm1062_vm10, %v1055_v61, %v1057_v56 }
 0x259   :  { %v1090_v58 = vmul.f32 %v3507_v39, %v1065_v29 }
 0x25b   :  { %v1061_v57 = vpop.permute.xlu0 %1060  ;;  %v1059_v32 = vpop.permute.xlu1 %1058  ;;  %v1110_v54 = vpack.c.bf16 %v1090_v58, %v1090_v58 }
 0x25c   :  { %v1063_v53 = vsel %vm1062_vm10, %v1059_v32, %v1061_v57  ;;  %v1064_v31 = vsel %vm1062_vm10, %v1057_v56, %v1059_v32  ;;  %v1066_v9 = vsel %vm1062_vm10, %v1061_v57, %v1055_v61  ;;  %v3543_v56 = vrot.slane %v2608_v0, %v2951_v44 }
 0x25d   :  { %v1091_v59 = vmul.f32 %v3512_v42, %v1064_v31  ;;  %v1093_v33 = vmul.f32 %v3515_v23, %v1066_v9  ;;  %v1092_v38 = vmul.f32 %v3519_v2, %v1063_v53  ;;  %v1139_v60 = vsel %vm5053_vm11, %v1110_v54, 0 }
 0x25e   :  { %v3546_v61 = vrot.slane %v2608_v0, %v2956_v46  ;;  %v3551_v32 = vrot.slane %v2608_v0, %v2943_v41  ;;  %v3556_v31 = vrot.slane %v2609_v18, %v2959_v47  ;;  %v3567_v54 = vrot.slane %v2609_v18, %v2943_v41 }
 0x25f   :  { %v977_v17 = vpop.permute.xlu0 %976  ;;  %v975_v62 = vpop.permute.xlu1 %974  ;;  %v1111_v52 = vpack.c.bf16 %v1091_v59, %v1091_v59  ;;  %v1113_v22 = vpack.c.bf16 %v1093_v33, %v1093_v33  ;;  %v1112_v3 = vpack.c.bf16 %v1092_v38, %v1092_v38  ;;  %v3561_v59 = vrot.slane %v2609_v18, %v2951_v44 }
 0x260   :  { %v3564_v33 = vrot.slane %v2609_v18, %v2956_v46  ;;  %v3570_v38 = vrot.slane %v2608_v0, %v2959_v47 }
 0x261   :  { %2612 = vmatprep.subr.msk.bf16.mxu0 %vm5053_vm11, %v1111_v52  ;;  %2614 = vmatprep.subr.msk.bf16.mxu1 %vm5053_vm11, %v1113_v22  ;;  %v1145_v49 = vsel %vm5053_vm11, %v1112_v3, 0  ;;  %v985_v22 = vsel %vm982_vm13, %v975_v62, %v977_v17  ;;  %vm822_vm11 = vcmp.lt.s32.totalorder %v2940_v40, 32 }
 0x262   :  { %1157 = vmatpush1.bf16.msra.mxu0 %v1139_v60  ;;  %1200 = vmatpush1.bf16.msra.mxu1 %v1145_v49 }
 0x263   :  { %v981_v48 = vpop.permute.xlu0 %980  ;;  %v979_v20 = vpop.permute.xlu1 %978 }
 0x264   :  { %v986_v57 = vsel %vm982_vm13, %v981_v48, %v975_v62  ;;  %v984_v53 = vsel %vm982_vm13, %v977_v17, %v979_v20  ;;  %v983_v52 = vsel %vm982_vm13, %v979_v20, %v981_v48 }
 0x265   :  { %v1013_v3 = vmul.f32 %v3543_v56, %v986_v57  ;;  %v1011_v60 = vmul.f32 %v3546_v61, %v984_v53  ;;  %v1012_v20 = vmul.f32 %v3551_v32, %v983_v52  ;;  %v2607_v53 = vld [vmem:[%s4981_s12 + $0x14] sm:$0xf] }
 0x266   :  { %v3595_v52 = vrot.slane %v2607_v53, %v2959_v47  ;;  %v3606_v10 = vrot.slane %v2607_v53, %v2943_v41 }
 0x267   :  { %v1017_v29 = vpop.permute.xlu0 %1016  ;;  %v1015_v58 = vpop.permute.xlu1 %1014 }
 0x268   :  { %v1025_v9 = vsel %vm1022_vm12, %v1015_v58, %v1017_v29 }
 0x269   :  { %v1050_v16 = vmul.f32 %v3556_v31, %v1025_v9 }
 0x26b   :  { %v1021_v49 = vpop.permute.xlu0 %1020  ;;  %v1019_v50 = vpop.permute.xlu1 %1018 }
 0x26c   :  { %v1026_v18 = vsel %vm1022_vm12, %v1021_v49, %v1015_v58  ;;  %v1023_v0 = vsel %vm1022_vm12, %v1019_v50, %v1021_v49  ;;  %v1024_v48 = vsel %vm1022_vm12, %v1017_v29, %v1019_v50  ;;  %v1010_v58 = vmul.f32 %v3570_v38, %v985_v22 }
 0x26d   :  { %v1053_v17 = vmul.f32 %v3561_v59, %v1026_v18  ;;  %v1051_v62 = vmul.f32 %v3564_v33, %v1024_v48  ;;  %v1052_v57 = vmul.f32 %v3567_v54, %v1023_v0  ;;  %v3598_v48 = vrot.slane %v2607_v53, %v2951_v44 }
 0x26e   :  { %v1106_v18 = vpack.c.bf16 %v1050_v16, %v1010_v58  ;;  %v3603_v22 = vrot.slane %v2607_v53, %v2956_v46 }
 0x26f   :  { %v937_v9 = vpop.permute.xlu0 %936  ;;  %v935_v49 = vpop.permute.xlu1 %934  ;;  %v1107_v51 = vpack.c.bf16 %v1051_v62, %v1011_v60  ;;  %v1109_v50 = vpack.c.bf16 %v1053_v17, %v1013_v3  ;;  %v1108_v29 = vpack.c.bf16 %v1052_v57, %v1012_v20 }
 0x270   :  { %v945_v0 = vsel %vm942_vm14, %v935_v49, %v937_v9 }
 0x271   :  { %1158 = vmatprep.subr.bf16.mxu0 %v1107_v51  ;;  %1201 = vmatprep.subr.bf16.mxu1 %v1109_v50  ;;  %v970_v16 = vmul.f32 %v3595_v52, %v945_v0 }
 0x272   :  { %1159 = vmatpush1.bf16.msra.mxu0 %v1106_v18  ;;  %1202 = vmatpush1.bf16.msra.mxu1 %v1108_v29 }
 0x273   :  { %v941_v3 = vpop.permute.xlu0 %940  ;;  %v939_v60 = vpop.permute.xlu1 %938  ;;  %v1102_v0 = vpack.c.bf16 %v970_v16, %v3416_v28 }
 0x274   :  { %v946_v20 = vsel %vm942_vm14, %v941_v3, %v935_v49  ;;  %v943_v17 = vsel %vm942_vm14, %v939_v60, %v941_v3  ;;  %v944_v51 = vsel %vm942_vm14, %v937_v9, %v939_v60  ;;  %v2605_v9 = vld [vmem:[%s4981_s12 + $0x8] sm:$0xf]  ;;  %v2606_v3 = vld [vmem:[%s4981_s12 + $0xc] sm:$0xf] }
 0x275   :  { %v973_v62 = vmul.f32 %v3598_v48, %v946_v20  ;;  %v971_v57 = vmul.f32 %v3603_v22, %v944_v51  ;;  %v972_v53 = vmul.f32 %v3606_v10, %v943_v17  ;;  %v3634_v28 = vrot.slane %v2606_v3, %v2956_v46 }
 0x276   :  { %v3639_v16 = vrot.slane %v2605_v9, %v2959_v47  ;;  %v3642_v20 = vrot.slane %v2605_v9, %v2943_v41  ;;  %v3645_v17 = vrot.slane %v2605_v9, %v2951_v44  ;;  %v3662_v24 = vrot.slane %v2606_v3, %v2951_v44 }
 0x277   :  { %v857_v58 = vpop.permute.xlu0 %856  ;;  %v855_v50 = vpop.permute.xlu1 %854  ;;  %v1103_v29 = vpack.c.bf16 %v971_v57, %v3418_v45  ;;  %v1105_v18 = vpack.c.bf16 %v973_v62, %v3434_v25  ;;  %v1104_v49 = vpack.c.bf16 %v972_v53, %v3432_v36  ;;  %v3630_v36 = vrot.slane %v2605_v9, %v2956_v46 }
 0x278   :  { %v865_v60 = vsel %vm862_vm15, %v855_v50, %v857_v58  ;;  %5182 = vst [vmem:[#allocation54_spill] sm:$0xff] %v3642_v20 }
 0x279   :  { %1160 = vmatprep.subr.bf16.mxu0 %v1103_v29  ;;  %1203 = vmatprep.subr.bf16.mxu1 %v1105_v18  ;;  %v3652_v29 = vrot.slane %v2606_v3, %v2959_v47  ;;  %v3655_v18 = vrot.slane %v2606_v3, %v2943_v41 }
 0x27a   :  { %1161 = vmatpush1.bf16.msra.mxu0 %v1102_v0  ;;  %1204 = vmatpush1.bf16.msra.mxu1 %v1104_v49  ;;  %v891_v49 = vmul.f32 %v3630_v36, %v865_v60 }
 0x27b   :  { %v861_v45 = vpop.permute.xlu0 %860  ;;  %v859_v25 = vpop.permute.xlu1 %858 }
 0x27c   :  { %v866_v57 = vsel %vm862_vm15, %v861_v45, %v855_v50  ;;  %v864_v0 = vsel %vm862_vm15, %v857_v58, %v859_v25  ;;  %v863_v50 = vsel %vm862_vm15, %v859_v25, %v861_v45 }
 0x27d   :  { %v890_v30 = vmul.f32 %v3639_v16, %v866_v57  ;;  %v892_v7 = vmul.f32 %v3642_v20, %v864_v0 }
 0x27f   :  { %v897_v51 = vpop.permute.xlu0 %896  ;;  %v895_v62 = vpop.permute.xlu1 %894 }
 0x280   :  { %v905_v53 = vsel %vm902_vm8, %v895_v62, %v897_v51 }
 0x281   :  { %v931_v9 = vmul.f32 %v3634_v28, %v905_v53  ;;  %v893_v53 = vmul.f32 %v3645_v17, %v863_v50 }
 0x283   :  { %v901_v63 = vpop.permute.xlu0 %900  ;;  %v899_v37 = vpop.permute.xlu1 %898  ;;  %v1099_v27 = vpack.c.bf16 %v931_v9, %v891_v49 }
 0x284   :  { %v906_v60 = vsel %vm902_vm8, %v901_v63, %v895_v62  ;;  %v903_v58 = vsel %vm902_vm8, %v899_v37, %v901_v63  ;;  %v904_v3 = vsel %vm902_vm8, %v897_v51, %v899_v37  ;;  %v788_v63 = vld [vmem:[%s4981_s12] sm:$0xf]  ;;  %v2604_v37 = vld [vmem:[%s4981_s12 + $0x4] sm:$0xf] }
 0x285   :  { %v930_v45 = vmul.f32 %v3652_v29, %v906_v60  ;;  %v932_v25 = vmul.f32 %v3655_v18, %v904_v3  ;;  %v933_v57 = vmul.f32 %v3662_v24, %v903_v58  ;;  %1162 = vmatprep.subr.bf16.mxu0 %v1099_v27  ;;  %v3686_v50 = vrot.slane %v788_v63, %v2956_v46 }
 0x286   :  { %v3698_v60 = vrot.slane %v788_v63, %v2943_v41  ;;  %v3701_v58 = vrot.slane %v788_v63, %v2951_v44  ;;  %v3718_v15 = vrot.slane %v2604_v37, %v2951_v44 }
 0x287   :  { %v778_v49 = vpop.permute.xlu0 %777  ;;  %v776_v0 = vpop.permute.xlu1 %775  ;;  %v1098_v9 = vpack.c.bf16 %v930_v45, %v890_v30  ;;  %v1101_v5 = vpack.c.bf16 %v933_v57, %v893_v53  ;;  %v1100_v62 = vpack.c.bf16 %v932_v25, %v892_v7  ;;  %5183 = vst [vmem:[#allocation55_spill] sm:$0xff] %v3686_v50  ;;  %v3695_v30 = vrot.slane %v788_v63, %v2959_v47 }
 0x288   :  { %v786_v7 = vsel %vm783_vm9, %v776_v0, %v778_v49  ;;  %5186 = vst [vmem:[#allocation58_spill] sm:$0xff] %v3698_v60  ;;  %5187 = vst [vmem:[#allocation59_spill] sm:$0xff] %v3701_v58  ;;  %v3708_v25 = vrot.slane %v2604_v37, %v2959_v47  ;;  %v3711_v57 = vrot.slane %v2604_v37, %v2943_v41 }
 0x289   :  { %1163 = vmatpush1.bf16.msra.mxu0 %v1098_v9  ;;  %1205 = vmatprep.subr.bf16.mxu1 %v1101_v5  ;;  %v3690_v5 = vrot.slane %v2604_v37, %v2956_v46  ;;  %5185 = vst [vmem:[#allocation57_spill] sm:$0xff] %v3695_v30  ;;  %v811_v9 = vmul.f32 %v3686_v50, %v786_v7  ;;  %5190 = vst [vmem:[#allocation62_spill] sm:$0xff] %v3718_v15 }
 0x28a   :  { %1206 = vmatpush1.bf16.msra.mxu1 %v1100_v62  ;;  %5188 = vst [vmem:[#allocation60_spill] sm:$0xff] %v3708_v25  ;;  %5189 = vst [vmem:[#allocation61_spill] sm:$0xff] %v3711_v57 }
 0x28b   :  { %v782_v51 = vpop.permute.xlu0 %781  ;;  %v780_v27 = vpop.permute.xlu1 %779  ;;  %5184 = vst [vmem:[#allocation56_spill] sm:$0xff] %v3690_v5 }
 0x28c   :  { %v787_v45 = vsel %vm783_vm9, %v782_v51, %v776_v0  ;;  %v785_v62 = vsel %vm783_vm9, %v778_v49, %v780_v27  ;;  %v784_v0 = vsel %vm783_vm9, %v780_v27, %v782_v51 }
 0x28d   :  { %v810_v14 = vmul.f32 %v3695_v30, %v787_v45  ;;  %v812_v41 = vmul.f32 %v3698_v60, %v785_v62 }
 0x28f   :  { %v817_v3 = vpop.permute.xlu0 %816  ;;  %v815_v53 = vpop.permute.xlu1 %814 }
 0x290   :  { %v825_v46 = vsel %vm822_vm11, %v815_v53, %v817_v3 }
 0x291   :  { %v851_v63 = vmul.f32 %v3690_v5, %v825_v46  ;;  %v813_v46 = vmul.f32 %v3701_v58, %v784_v0 }
 0x293   :  { %v821_v47 = vpop.permute.xlu0 %820  ;;  %v819_v13 = vpop.permute.xlu1 %818  ;;  %v1095_v12 = vpack.c.bf16 %v851_v63, %v811_v9 }
 0x294   :  { %v826_v7 = vsel %vm822_vm11, %v821_v47, %v815_v53  ;;  %v823_v49 = vsel %vm822_vm11, %v819_v13, %v821_v47  ;;  %v824_v37 = vsel %vm822_vm11, %v817_v3, %v819_v13  ;;  %v2664_v53 = vld [vmem:[%s4979_s3] sm:$0xff]  }
 0x295   :  { %v850_v51 = vmul.f32 %v3708_v25, %v826_v7  ;;  %v852_v27 = vmul.f32 %v3711_v57, %v824_v37  ;;  %v853_v45 = vmul.f32 %v3718_v15, %v823_v49  ;;  %1164 = vmatprep.subr.bf16.mxu0 %v1095_v12 }
 0x297   :  { %v1094_v9 = vpack.c.bf16 %v850_v51, %v810_v14  ;;  %v1097_v62 = vpack.c.bf16 %v853_v45, %v813_v46  ;;  %v1096_v63 = vpack.c.bf16 %v852_v27, %v812_v41 }
 0x299   :  { %1165 = vmatpush1.bf16.msra.mxu0 %v1094_v9  ;;  %1207 = vmatprep.subr.bf16.mxu1 %v1097_v62 }
 0x29a   :  { %1208 = vmatpush1.bf16.msra.mxu1 %v1096_v63 }
 0x29c   :  { %2613 = vmatmul.mubr.msk.bf16.vlgmr.msra.gmra.mxu0 %vm5064_vm7, %v2664_v53 }
 0x29d   :  { %2615 = vmatmul.mubr.msk.bf16.vlgmr.msra.gmra.mxu1 %vm5064_vm7, %v2664_v53  ;;  %vm1559_vm7 = vcmask 130048  }
 0x2a0   :  { %v1121_v47 = vpop.permute.xlu1 %1120  ;;  %v1126_v7 = vpop.permute.xlu0 %1125 }
 0x35c   :  { %v1184_v13 = vpop.f32.mrf.mxu0 }
 0x35d   :  { %v1185_v3 = vadd.f32 %v1184_v13, %v1121_v47  ;;  %v1227_v0 = vpop.f32.mrf.mxu1 }
 0x35e   :  { %v1228_v12 = vadd.f32 %v1227_v0, %v1121_v47  ;;  %v1186_v14 = vpop.f32.mrf.mxu0 }
 0x35f   :  { %v3739_v41 = vmax.f32 %v1185_v3, 0.0  ;;  %v1229_v49 = vpop.f32.mrf.mxu1  ;;  %v1187_v13 = vadd.f32 %v1186_v14, %v1121_v47 }
 0x360   :  { %v3741_v37 = vmax.f32 %v1228_v12, 0.0  ;;  %v1188_v46 = vpop.f32.mrf.mxu0  ;;  %v1230_v0 = vadd.f32 %v1229_v49, %v1121_v47 }
 0x361   :  { %v1189_v51 = vadd.f32 %v1188_v46, %v1126_v7  ;;  %v1231_v27 = vpop.f32.mrf.mxu1  ;;  %1436 = vrot.lane.b32.xlu1 %v3739_v41, %s2701_s2  ;;  %v3811_v3 = vmax.f32 %v1187_v13, 0.0 }
 0x362   :  { %v1232_v45 = vadd.f32 %v1231_v27, %v1126_v7  ;;  %1444 = vrot.lane.b32.xlu0 %v3741_v37, %s2701_s2  ;;  %v1190_v12 = vpop.f32.mrf.mxu0 }
 0x363   :  { %v3747_v9 = vmax.f32 %v1189_v51, 0.0  ;;  %v1191_v46 = vadd.f32 %v1190_v12, %v1126_v7  ;;  %v3817_v51 = vmax.f32 %v1230_v0, 0.0  ;;  %v1233_v14 = vpop.f32.mrf.mxu1  ;;  %v2665_v0 = vld [vmem:[%s4982_s5 + $0x4] ss:$8 sps:$4 sm:$0xff]  }
 0x364   :  { %v3749_v62 = vmax.f32 %v1232_v45, 0.0  ;;  %v1234_v47 = vadd.f32 %v1233_v14, %v1126_v7  ;;  %2618 = vmatprep.mubr.msk.bf16.mxu0 %vm1559_vm7, %v2665_v0  ;;  %2619 = vmatprep.mubr.msk.bf16.mxu1 %vm1559_vm7, %v2665_v0  ;;  %v1538_v14 = vld [vmem:[%s4983_s6] sm:$0xff]  ;;  %v1539_v0 = vld [vmem:[%s4983_s6 + $0x8] sm:$0xff] }
 0x365   :  { %1438 = vrot.lane.b32.xlu1 %v3747_v9, %s2701_s2  ;;  %v3823_v27 = vmax.f32 %v1191_v46, 0.0 }
 0x366   :  { %1404 = vrot.lane.b32.xlu0 %v3739_v41, %s2700_s15  ;;  %v3829_v49 = vmax.f32 %v1234_v47, 0.0 }
 0x369   :  { %1446 = vrot.lane.b32.xlu1 %v3749_v62, %s2701_s2 }
 0x36a   :  { %1412 = vrot.lane.b32.xlu0 %v3741_v37, %s2700_s15 }
 0x36d   :  { %1406 = vrot.lane.b32.xlu1 %v3747_v9, %s2700_s15 }
 0x36e   :  { %1372 = vrot.lane.b32.xlu0 %v3739_v41, %s2702_s16 }
 0x371   :  { %1414 = vrot.lane.b32.xlu1 %v3749_v62, %s2700_s15 }
 0x372   :  { %1380 = vrot.lane.b32.xlu0 %v3741_v37, %s2702_s16 }
 0x375   :  { %1374 = vrot.lane.b32.xlu1 %v3747_v9, %s2702_s16 }
 0x376   :  { %1340 = vrot.lane.b32.xlu0 %v3739_v41, %s2704_s18 }
 0x379   :  { %1382 = vrot.lane.b32.xlu1 %v3749_v62, %s2702_s16 }
 0x37a   :  { %1348 = vrot.lane.b32.xlu0 %v3741_v37, %s2704_s18 }
 0x37d   :  { %1342 = vrot.lane.b32.xlu1 %v3747_v9, %s2704_s18 }
 0x37e   :  { %1308 = vrot.lane.b32.xlu0 %v3739_v41, %s2703_s17 }
 0x381   :  { %1350 = vrot.lane.b32.xlu1 %v3749_v62, %s2704_s18 }
 0x382   :  { %1316 = vrot.lane.b32.xlu0 %v3741_v37, %s2703_s17 }
 0x385   :  { %1310 = vrot.lane.b32.xlu1 %v3747_v9, %s2703_s17 }
 0x386   :  { %1276 = vrot.lane.b32.xlu0 %v3739_v41, %s2706_s1 }
 0x389   :  { %1318 = vrot.lane.b32.xlu1 %v3749_v62, %s2703_s17 }
 0x38a   :  { %1284 = vrot.lane.b32.xlu0 %v3741_v37, %s2706_s1 }
 0x38d   :  { %1278 = vrot.lane.b32.xlu1 %v3747_v9, %s2706_s1 }
 0x38e   :  { %1244 = vrot.lane.b32.xlu0 %v3739_v41, %s2705_s19 }
 0x391   :  { %1286 = vrot.lane.b32.xlu1 %v3749_v62, %s2706_s1 }
 0x392   :  { %1252 = vrot.lane.b32.xlu0 %v3741_v37, %s2705_s19 }
 0x395   :  { %1246 = vrot.lane.b32.xlu1 %v3747_v9, %s2705_s19 }
 0x396   :  { %1468 = vrot.lane.b32.xlu0 %v3739_v41, %s2699_s13 }
 0x399   :  { %1254 = vrot.lane.b32.xlu1 %v3749_v62, %s2705_s19 }
 0x39a   :  { %1476 = vrot.lane.b32.xlu0 %v3741_v37, %s2699_s13 }
 0x39d   :  { %1470 = vrot.lane.b32.xlu1 %v3747_v9, %s2699_s13 }
 0x39e   :  { %1440 = vrot.lane.b32.xlu0 %v3811_v3, %s2701_s2 }
 0x3a1   :  { %1478 = vrot.lane.b32.xlu1 %v3749_v62, %s2699_s13 }
 0x3a2   :  { %1448 = vrot.lane.b32.xlu0 %v3817_v51, %s2701_s2 }
 0x3a5   :  { %1442 = vrot.lane.b32.xlu1 %v3823_v27, %s2701_s2 }
 0x3a6   :  { %1408 = vrot.lane.b32.xlu0 %v3811_v3, %s2700_s15 }
 0x3a9   :  { %1450 = vrot.lane.b32.xlu1 %v3829_v49, %s2701_s2 }
 0x3aa   :  { %1416 = vrot.lane.b32.xlu0 %v3817_v51, %s2700_s15 }
 0x3ad   :  { %1410 = vrot.lane.b32.xlu1 %v3823_v27, %s2700_s15 }
 0x3ae   :  { %1376 = vrot.lane.b32.xlu0 %v3811_v3, %s2702_s16 }
 0x3b1   :  { %1418 = vrot.lane.b32.xlu1 %v3829_v49, %s2700_s15 }
 0x3b2   :  { %1384 = vrot.lane.b32.xlu0 %v3817_v51, %s2702_s16 }
 0x3b5   :  { %1378 = vrot.lane.b32.xlu1 %v3823_v27, %s2702_s16 }
 0x3b6   :  { %1344 = vrot.lane.b32.xlu0 %v3811_v3, %s2704_s18 }
 0x3b9   :  { %1386 = vrot.lane.b32.xlu1 %v3829_v49, %s2702_s16 }
 0x3ba   :  { %1352 = vrot.lane.b32.xlu0 %v3817_v51, %s2704_s18 }
 0x3bd   :  { %1346 = vrot.lane.b32.xlu1 %v3823_v27, %s2704_s18 }
 0x3be   :  { %1312 = vrot.lane.b32.xlu0 %v3811_v3, %s2703_s17 }
 0x3c1   :  { %1354 = vrot.lane.b32.xlu1 %v3829_v49, %s2704_s18 }
 0x3c2   :  { %1320 = vrot.lane.b32.xlu0 %v3817_v51, %s2703_s17 }
 0x3c5   :  { %1314 = vrot.lane.b32.xlu1 %v3823_v27, %s2703_s17 }
 0x3c6   :  { %1280 = vrot.lane.b32.xlu0 %v3811_v3, %s2706_s1 }
 0x3c9   :  { %1322 = vrot.lane.b32.xlu1 %v3829_v49, %s2703_s17 }
 0x3ca   :  { %1288 = vrot.lane.b32.xlu0 %v3817_v51, %s2706_s1 }
 0x3cd   :  { %1282 = vrot.lane.b32.xlu1 %v3823_v27, %s2706_s1 }
 0x3ce   :  { %1248 = vrot.lane.b32.xlu0 %v3811_v3, %s2705_s19 }
 0x3d1   :  { %1290 = vrot.lane.b32.xlu1 %v3829_v49, %s2706_s1 }
 0x3d2   :  { %1256 = vrot.lane.b32.xlu0 %v3817_v51, %s2705_s19 }
 0x3d3   :  { %v1437_v7 = vpop.permute.xlu1 %1436 }
 0x3d4   :  { %v1445_v45 = vpop.permute.xlu0 %1444 }
 0x3d5   :  { %1250 = vrot.lane.b32.xlu1 %v3823_v27, %s2705_s19 }
 0x3d6   :  { %1472 = vrot.lane.b32.xlu0 %v3811_v3, %s2699_s13 }
 0x3d7   :  { %v1439_v13 = vpop.permute.xlu1 %1438 }
 0x3d8   :  { %v3882_v12 = vpop.permute.xlu0 %1404 }
 0x3d9   :  { %1258 = vrot.lane.b32.xlu1 %v3829_v49, %s2705_s19  ;;  %s5231_s19 = smov 111  }
 0x3da   :  { %1480 = vrot.lane.b32.xlu0 %v3817_v51, %s2699_s13 }
 0x3db   :  { %v1447_v46 = vpop.permute.xlu1 %1446 }
 0x3dc   :  { %v3893_v47 = vpop.permute.xlu0 %1412 }
 0x3dd   :  { %1474 = vrot.lane.b32.xlu1 %v3823_v27, %s2699_s13 }
 0x3de   :  { %1542 = vperm.xlu0 %2663, %v1538_v14  }
 0x3df   :  { %v3897_v53 = vpop.permute.xlu1 %1406 }
 0x3e0   :  { %v3899_v63 = vpop.permute.xlu0 %1372 }
 0x3e1   :  { %1482 = vrot.lane.b32.xlu1 %v3829_v49, %s2699_s13 }
 0x3e3   :  { %v3906_v44 = vpop.permute.xlu1 %1414 }
 0x3e4   :  { %v3908_v35 = vpop.permute.xlu0 %1380 }
 0x3e5   :  { %1547 = vperm.xlu1 %2655, %v1539_v0  }
 0x3e7   :  { %v3910_v55 = vpop.permute.xlu1 %1374 }
 0x3e8   :  { %v3912_v43 = vpop.permute.xlu0 %1340 }
 0x3eb   :  { %v3914_v14 = vpop.permute.xlu1 %1382 }
 0x3ec   :  { %v3916_v19 = vpop.permute.xlu0 %1348 }
 0x3ef   :  { %v3918_v21 = vpop.permute.xlu1 %1342 }
 0x3f0   :  { %v3920_v1 = vpop.permute.xlu0 %1308 }
 0x3f3   :  { %v3922_v11 = vpop.permute.xlu1 %1350 }
 0x3f4   :  { %v3924_v4 = vpop.permute.xlu0 %1316 }
 0x3f7   :  { %v3926_v26 = vpop.permute.xlu1 %1310 }
 0x3f8   :  { %v3928_v34 = vpop.permute.xlu0 %1276 }
 0x3f9   :  { %5191 = vst [vmem:[#allocation63_spill] sm:$0xff] %v3928_v34 }
 0x3fb   :  { %v3930_v0 = vpop.permute.xlu1 %1318 }
 0x3fc   :  { %v3932_v6 = vpop.permute.xlu0 %1284 }
 0x3fd   :  { %5192 = vst [vmem:[#allocation64_spill] sm:$0xff] %v3932_v6 }
 0x3ff   :  { %v3934_v8 = vpop.permute.xlu1 %1278 }
 0x400   :  { %5193 = vst [vmem:[#allocation65_spill] sm:$0xff] %v3934_v8  ;;  %v3936_v23 = vpop.permute.xlu0 %1244 }
 0x401   :  { %5194 = vst [vmem:[#allocation66_spill] sm:$0xff] %v3936_v23 }
 0x403   :  { %v3938_v2 = vpop.permute.xlu1 %1286 }
 0x404   :  { %5195 = vst [vmem:[#allocation67_spill] sm:$0xff] %v3938_v2  ;;  %v3940_v42 = vpop.permute.xlu0 %1252 }
 0x405   :  { %5196 = vst [vmem:[#allocation68_spill] sm:$0xff] %v3940_v42 }
 0x407   :  { %v3942_v39 = vpop.permute.xlu1 %1246 }
 0x408   :  { %5197 = vst [vmem:[#allocation69_spill] sm:$0xff] %v3942_v39  ;;  %v3944_v58 = vpop.permute.xlu0 %1468 }
 0x409   :  { %5198 = vst [vmem:[#allocation70_spill] sm:$0xff] %v3944_v58 }
 0x40b   :  { %v3946_v60 = vpop.permute.xlu1 %1254 }
 0x40c   :  { %5199 = vst [vmem:[#allocation71_spill] sm:$0xff] %v3946_v60  ;;  %v3948_v30 = vpop.permute.xlu0 %1476 }
 0x40d   :  { %5200 = vst [vmem:[#allocation72_spill] sm:$0xff] %v3948_v30 }
 0x40f   :  { %v3950_v50 = vpop.permute.xlu1 %1470 }
 0x410   :  { %5201 = vst [vmem:[#allocation73_spill] sm:$0xff] %v3950_v50  ;;  %v1441_v57 = vpop.permute.xlu0 %1440 }
 0x411   :  { %v1454_v23 = vsel %vm1022_vm12, %v1441_v57, %v1445_v45  ;;  %v1456_v42 = vsel %vm1022_vm12, %v1437_v7, %v1441_v57 }
 0x412   :  { %v1460_v50 = vmul.f32 %v1456_v42, %v3556_v31  ;;  %v1461_v39 = vmul.f32 %v1454_v23, %v3564_v33 }
 0x413   :  { %v3952_v15 = vpop.permute.xlu1 %1478 }
 0x414   :  { %5202 = vst [vmem:[#allocation74_spill] sm:$0xff] %v3952_v15  ;;  %v1449_v25 = vpop.permute.xlu0 %1448 }
 0x415   :  { %v1452_v8 = vsel %vm1022_vm12, %v1445_v45, %v1449_v25  ;;  %v1458_v57 = vsel %vm1022_vm12, %v1449_v25, %v1437_v7 }
 0x417   :  { %v1443_v2 = vpop.permute.xlu1 %1442 }
 0x418   :  { %v1455_v58 = vsel %vm1022_vm12, %v1443_v2, %v1447_v46  ;;  %v1457_v60 = vsel %vm1022_vm12, %v1439_v13, %v1443_v2  ;;  %v1409_v30 = vpop.permute.xlu0 %1408 }
 0x419   :  { %v1464_v15 = vmul.f32 %v1457_v60, %v3556_v31  ;;  %v1465_v6 = vmul.f32 %v1455_v58, %v3564_v33  ;;  %v1462_v31 = vmul.f32 %v1452_v8, %v3567_v54  ;;  %v1463_v33 = vmul.f32 %v1458_v57, %v3561_v59 }
 0x41b   :  { %v1528_v5 = vpack.c.bf16 %v1464_v15, %v1460_v50  ;;  %v1451_v34 = vpop.permute.xlu1 %1450  ;;  %v1529_v20 = vpack.c.bf16 %v1465_v6, %v1461_v39  ;;  %v1422_v15 = vsel %vm982_vm13, %v1409_v30, %v3893_v47  ;;  %v1424_v6 = vsel %vm982_vm13, %v3882_v12, %v1409_v30 }
 0x41c   :  { %v1453_v2 = vsel %vm1022_vm12, %v1447_v46, %v1451_v34  ;;  %v1459_v42 = vsel %vm1022_vm12, %v1451_v34, %v1439_v13  ;;  %v1417_v23 = vpop.permute.xlu0 %1416  ;;  %v1429_v25 = vmul.f32 %v1422_v15, %v3546_v61 }
 0x41d   :  { %v1466_v60 = vmul.f32 %v1453_v2, %v3567_v54  ;;  %v1467_v58 = vmul.f32 %v1459_v42, %v3561_v59  ;;  %1563 = vmatprep.subr.bf16.mxu0 %v1529_v20  ;;  %v1428_v20 = vmul.f32 %v1424_v6, %v3570_v38  ;;  %v1420_v30 = vsel %vm982_vm13, %v3893_v47, %v1417_v23 }
 0x41e   :  { %1564 = vmatpush1.bf16.msra.mxu0 %v1528_v5  ;;  %v1426_v45 = vsel %vm982_vm13, %v1417_v23, %v3882_v12  ;;  %v1430_v42 = vmul.f32 %v1420_v30, %v3551_v32 }
 0x41f   :  { %v1530_v34 = vpack.c.bf16 %v1466_v60, %v1462_v31  ;;  %v1411_v39 = vpop.permute.xlu1 %1410  ;;  %v1531_v50 = vpack.c.bf16 %v1467_v58, %v1463_v33  ;;  %v1431_v47 = vmul.f32 %v1426_v45, %v3543_v56 }
 0x420   :  { %v1423_v8 = vsel %vm982_vm13, %v1411_v39, %v3906_v44  ;;  %v1425_v59 = vsel %vm982_vm13, %v3897_v53, %v1411_v39  ;;  %v1377_v54 = vpop.permute.xlu0 %1376 }
 0x421   :  { %v1432_v7 = vmul.f32 %v1425_v59, %v3570_v38  ;;  %v1433_v5 = vmul.f32 %v1423_v8, %v3546_v61  ;;  %1606 = vmatprep.subr.bf16.mxu1 %v1531_v50  ;;  %v1390_v23 = vsel %vm942_vm14, %v1377_v54, %v3908_v35 }
 0x422   :  { %1607 = vmatpush1.bf16.msra.mxu1 %v1530_v34  ;;  %v1397_v6 = vmul.f32 %v1390_v23, %v3603_v22 }
 0x423   :  { %v1524_v13 = vpack.c.bf16 %v1432_v7, %v1428_v20  ;;  %v1419_v46 = vpop.permute.xlu1 %1418  ;;  %v1525_v57 = vpack.c.bf16 %v1433_v5, %v1429_v25 }
 0x424   :  { %v1421_v2 = vsel %vm982_vm13, %v3906_v44, %v1419_v46  ;;  %v1427_v61 = vsel %vm982_vm13, %v1419_v46, %v3897_v53  ;;  %v1385_v38 = vpop.permute.xlu0 %1384  ;;  %v1392_v44 = vsel %vm942_vm14, %v3899_v63, %v1377_v54 }
 0x425   :  { %v1434_v31 = vmul.f32 %v1421_v2, %v3551_v32  ;;  %v1435_v12 = vmul.f32 %v1427_v61, %v3543_v56  ;;  %1565 = vmatprep.subr.bf16.mxu0 %v1525_v57  ;;  %v1396_v15 = vmul.f32 %v1392_v44, %v3595_v52  ;;  %v1388_v50 = vsel %vm942_vm14, %v3908_v35, %v1385_v38 }
 0x426   :  { %1566 = vmatpush1.bf16.msra.mxu0 %v1524_v13  ;;  %v1394_v8 = vsel %vm942_vm14, %v1385_v38, %v3899_v63  ;;  %v1517_v35 = vpack.c.bf16 %v3823_v27, %v3811_v3  ;;  %v1398_v7 = vmul.f32 %v1388_v50, %v3606_v10  ;;  %v5204_v44 = vpack.c.bf16 %v3749_v62, %v3741_v37 }
 0x427   :  { %v1526_v53 = vpack.c.bf16 %v1434_v31, %v1430_v42  ;;  %v1379_v33 = vpop.permute.xlu1 %1378  ;;  %v1527_v60 = vpack.c.bf16 %v1435_v12, %v1431_v47  ;;  %v1399_v63 = vmul.f32 %v1394_v8, %v3598_v48  ;;  %v5205_v8 = vld [vmem:[#allocation54_spill] sm:$0xff] }
 0x428   :  { %v1391_v58 = vsel %vm942_vm14, %v1379_v33, %v3914_v14  ;;  %v1393_v56 = vsel %vm942_vm14, %v3910_v55, %v1379_v33  ;;  %v1345_v32 = vpop.permute.xlu0 %1344 }
 0x429   :  { %v1400_v34 = vmul.f32 %v1393_v56, %v3595_v52  ;;  %v1401_v39 = vmul.f32 %v1391_v58, %v3603_v22  ;;  %1608 = vmatprep.subr.bf16.mxu1 %v1527_v60 }
 0x42a   :  { %1609 = vmatpush1.bf16.msra.mxu1 %v1526_v53 }
 0x42b   :  { %v1520_v59 = vpack.c.bf16 %v1400_v34, %v1396_v15  ;;  %v1387_v54 = vpop.permute.xlu1 %1386  ;;  %v1521_v20 = vpack.c.bf16 %v1401_v39, %v1397_v6 }
 0x42c   :  { %v1389_v25 = vsel %vm942_vm14, %v3914_v14, %v1387_v54  ;;  %v1395_v52 = vsel %vm942_vm14, %v1387_v54, %v3910_v55  ;;  %v1353_v22 = vpop.permute.xlu0 %1352  ;;  %v1360_v14 = vsel %vm902_vm8, %v3912_v43, %v1345_v32  ;;  %v5206_v54 = vld [vmem:[#allocation63_spill] sm:$0xff] }
 0x42d   :  { %v1402_v5 = vmul.f32 %v1389_v25, %v3606_v10  ;;  %v1403_v30 = vmul.f32 %v1395_v52, %v3598_v48  ;;  %1567 = vmatprep.subr.bf16.mxu0 %v1521_v20  ;;  %v1519_v10 = vpack.c.bf16 %v3829_v49, %v3817_v51  ;;  %v1365_v48 = vmul.f32 %v1360_v14, %v3634_v28 }
 0x42e   :  { %1568 = vmatpush1.bf16.msra.mxu0 %v1520_v59  ;;  %v1356_v46 = vsel %vm902_vm8, %v3916_v19, %v1353_v22  ;;  %v1362_v57 = vsel %vm902_vm8, %v1353_v22, %v3912_v43  ;;  %v5203_v51 = vpack.c.bf16 %v3747_v9, %v3739_v41  ;;  %v1358_v49 = vsel %vm902_vm8, %v1345_v32, %v3916_v19 }
 0x42f   :  { %v1522_v45 = vpack.c.bf16 %v1402_v5, %v1398_v7  ;;  %1569 = vmatprep.subr.bf16.mxu0 %v1517_v35  ;;  %v1347_v55 = vpop.permute.xlu1 %1346  ;;  %v1523_v13 = vpack.c.bf16 %v1403_v30, %v1399_v63  ;;  %v1364_v43 = vmul.f32 %v1362_v57, %v3652_v29  ;;  %v5207_v7 = vld [vmem:[#allocation56_spill] sm:$0xff] }
 0x430   :  { %v1361_v3 = vsel %vm902_vm8, %v3918_v21, %v1347_v55  ;;  %v1313_v27 = vpop.permute.xlu0 %1312  ;;  %v1359_v61 = vsel %vm902_vm8, %v1347_v55, %v3922_v11 }
 0x431   :  { %v1369_v2 = vmul.f32 %v1361_v3, %v3634_v28  ;;  %1610 = vmatprep.subr.bf16.mxu1 %v1523_v13  ;;  %v1367_v28 = vmul.f32 %v1356_v46, %v3662_v24  ;;  %v1370_v31 = vmul.f32 %v1359_v61, %v3655_v18  ;;  %v1328_v19 = vsel %vm862_vm15, %v3920_v1, %v1313_v27  ;;  %v5210_v13 = vld [vmem:[#allocation67_spill] sm:$0xff]  ;;  %v5211_v46 = vld [vmem:[#allocation60_spill] sm:$0xff] }
 0x432   :  { %1570 = vmatpush1.bf16.msra.mxu0 %v5203_v51  ;;  %1611 = vmatpush1.bf16.msra.mxu1 %v1522_v45  ;;  %v1333_v60 = vmul.f32 %v1328_v19, %v3630_v36  ;;  %v1326_v32 = vsel %vm862_vm15, %v1313_v27, %v3924_v4  ;;  %v5209_v45 = vld [vmem:[#allocation64_spill] sm:$0xff] }
 0x433   :  { %1612 = vmatprep.subr.bf16.mxu1 %v1519_v10  ;;  %v1355_v38 = vpop.permute.xlu1 %1354  ;;  %v1513_v42 = vpack.c.bf16 %v1369_v2, %v1365_v48  ;;  %v1334_v52 = vmul.f32 %v1326_v32, %v5205_v8  ;;  %v5212_v2 = vld [vmem:[#allocation62_spill] sm:$0xff] }
 0x434   :  { %v1357_v47 = vsel %vm902_vm8, %v3922_v11, %v1355_v38  ;;  %v1363_v41 = vsel %vm902_vm8, %v1355_v38, %v3918_v21  ;;  %v1321_v9 = vpop.permute.xlu0 %1320  ;;  %v1366_v11 = vmul.f32 %v1358_v49, %v3655_v18 }
 0x435   :  { %v1368_v12 = vmul.f32 %v1363_v41, %v3652_v29  ;;  %v1371_v23 = vmul.f32 %v1357_v47, %v3662_v24  ;;  %1571 = vmatprep.subr.bf16.mxu0 %v1513_v42  ;;  %v1324_v24 = vsel %vm862_vm15, %v3924_v4, %v1321_v9  ;;  %v1330_v37 = vsel %vm862_vm15, %v1321_v9, %v3920_v1  ;;  %v5213_v42 = vld [vmem:[#allocation61_spill] sm:$0xff] }
 0x436   :  { %1613 = vmatpush1.bf16.msra.mxu1 %v5204_v44  ;;  %v1514_v29 = vpack.c.bf16 %v1370_v31, %v1366_v11  ;;  %v1332_v34 = vmul.f32 %v1330_v37, %v3639_v16  ;;  %v1335_v39 = vmul.f32 %v1324_v24, %v3645_v17  ;;  %v5215_v44 = vld [vmem:[#allocation55_spill] sm:$0xff]  ;;  %v5218_v37 = vld [vmem:[#allocation68_spill] sm:$0xff] }
 0x437   :  { %v1512_v53 = vpack.c.bf16 %v1368_v12, %v1364_v43  ;;  %v1315_v21 = vpop.permute.xlu1 %1314  ;;  %v1515_v33 = vpack.c.bf16 %v1371_v23, %v1367_v28  ;;  %v5214_v28 = vld [vmem:[#allocation66_spill] sm:$0xff] }
 0x438   :  { %v1329_v58 = vsel %vm862_vm15, %v3926_v26, %v1315_v21  ;;  %v1281_v56 = vpop.permute.xlu0 %1280  ;;  %v1327_v62 = vsel %vm862_vm15, %v1315_v21, %v3930_v0 }
 0x439   :  { %v1337_v18 = vmul.f32 %v1329_v58, %v3630_v36  ;;  %1572 = vmatpush1.bf16.msra.mxu0 %v1512_v53  ;;  %1614 = vmatprep.subr.bf16.mxu1 %v1515_v33  ;;  %v1338_v59 = vmul.f32 %v1327_v62, %v5205_v8  ;;  %v1296_v4 = vsel %vm822_vm11, %v5206_v54, %v1281_v56  ;;  %v5216_v53 = vld [vmem:[#allocation69_spill] sm:$0xff]  ;;  %v5217_v58 = vld [vmem:[#allocation71_spill] sm:$0xff] }
 0x43a   :  { %1615 = vmatpush1.bf16.msra.mxu1 %v1514_v29  ;;  %v1301_v63 = vmul.f32 %v1296_v4, %v5207_v7  ;;  %v1294_v27 = vsel %vm822_vm11, %v1281_v56, %v5209_v45  ;;  %v5221_v8 = vld [vmem:[#allocation59_spill] sm:$0xff] }
 0x43b   :  { %v1323_v15 = vpop.permute.xlu1 %1322  ;;  %v1509_v6 = vpack.c.bf16 %v1337_v18, %v1333_v60  ;;  %v1510_v14 = vpack.c.bf16 %v1338_v59, %v1334_v52  ;;  %v1302_v31 = vmul.f32 %v1294_v27, %v5213_v42 }
 0x43c   :  { %v1325_v1 = vsel %vm862_vm15, %v3930_v0, %v1323_v15  ;;  %v1331_v36 = vsel %vm862_vm15, %v1323_v15, %v3926_v26  ;;  %v1289_v50 = vpop.permute.xlu0 %1288  ;;  %v5208_v26 = vld [vmem:[#allocation65_spill] sm:$0xff] }
 0x43d   :  { %v1336_v20 = vmul.f32 %v1331_v36, %v3639_v16  ;;  %v1339_v25 = vmul.f32 %v1325_v1, %v3645_v17  ;;  %1573 = vmatprep.subr.bf16.mxu0 %v1509_v6  ;;  %v1292_v16 = vsel %vm822_vm11, %v5209_v45, %v1289_v50  ;;  %v1298_v17 = vsel %vm822_vm11, %v1289_v50, %v5206_v54  ;;  %v5219_v6 = vld [vmem:[#allocation57_spill] sm:$0xff]  ;;  %v5222_v54 = vld [vmem:[#allocation70_spill] sm:$0xff] }
 0x43e   :  { %v1300_v57 = vmul.f32 %v1298_v17, %v5211_v46  ;;  %v1303_v61 = vmul.f32 %v1292_v16, %v5212_v2  ;;  %v5225_v45 = vld [vmem:[#allocation74_spill] sm:$0xff]  ;;  %v5226_v17 = vld [vmem:[#allocation73_spill] sm:$0xff] }
 0x43f   :  { %v1508_v22 = vpack.c.bf16 %v1336_v20, %v1332_v34  ;;  %v1283_v0 = vpop.permute.xlu1 %1282  ;;  %v1511_v35 = vpack.c.bf16 %v1339_v25, %v1335_v39  ;;  %v5220_v39 = vld [vmem:[#allocation58_spill] sm:$0xff] }
 0x440   :  { %v1297_v5 = vsel %vm822_vm11, %v5208_v26, %v1283_v0  ;;  %v1249_v30 = vpop.permute.xlu0 %1248  ;;  %v1295_v3 = vsel %vm822_vm11, %v1283_v0, %v5210_v13 }
 0x441   :  { %v1305_v55 = vmul.f32 %v1297_v5, %v5207_v7  ;;  %1574 = vmatpush1.bf16.msra.mxu0 %v1508_v22  ;;  %1616 = vmatprep.subr.bf16.mxu1 %v1511_v35  ;;  %v1306_v43 = vmul.f32 %v1295_v3, %v5213_v42  ;;  %v1264_v47 = vsel %vm783_vm9, %v5214_v28, %v1249_v30  ;;  %v5223_v22 = vld [vmem:[#allocation72_spill] sm:$0xff] }
 0x442   :  { %1617 = vmatpush1.bf16.msra.mxu1 %v1510_v14  ;;  %v1269_v11 = vmul.f32 %v1264_v47, %v5215_v44  ;;  %v1262_v62 = vsel %vm783_vm9, %v1249_v30, %v5218_v37  ;;  %v5224_v30 = vld [vmem:[#allocation50_spill] sm:$0xff] }
 0x443   :  { %v1291_v10 = vpop.permute.xlu1 %1290  ;;  %v1505_v48 = vpack.c.bf16 %v1305_v55, %v1301_v63  ;;  %v1506_v33 = vpack.c.bf16 %v1306_v43, %v1302_v31  ;;  %v1270_v52 = vmul.f32 %v1262_v62, %v5220_v39  ;;  %v5229_v43 = vld [vmem:[#allocation52_spill] sm:$0xff] }
 0x444   :  { %v1293_v51 = vsel %vm822_vm11, %v5210_v13, %v1291_v10  ;;  %v1299_v49 = vsel %vm822_vm11, %v1291_v10, %v5208_v26  ;;  %v1257_v38 = vpop.permute.xlu0 %1256  ;;  %v5227_v13 = vld [vmem:[#allocation51_spill] sm:$0xff] }
 0x445   :  { %v1304_v41 = vmul.f32 %v1299_v49, %v5211_v46  ;;  %v1307_v9 = vmul.f32 %v1293_v51, %v5212_v2  ;;  %1575 = vmatprep.subr.bf16.mxu0 %v1505_v48  ;;  %v1266_v60 = vsel %vm783_vm9, %v1257_v38, %v5214_v28  ;;  %v1260_v18 = vsel %vm783_vm9, %v5218_v37, %v1257_v38  ;;  %v5228_v38 = vld [vmem:[#allocation53_spill] sm:$0xff] }
 0x446   :  { %v1268_v34 = vmul.f32 %v1266_v60, %v5219_v6  ;;  %v1271_v59 = vmul.f32 %v1260_v18, %v5221_v8 }
 0x447   :  { %v1504_v19 = vpack.c.bf16 %v1304_v41, %v1300_v57  ;;  %v1251_v12 = vpop.permute.xlu1 %1250  ;;  %v1507_v23 = vpack.c.bf16 %v1307_v9, %v1303_v61  ;;  %v2667_v9 = vld [vmem:[%s4982_s5] ss:$8 sps:$4 sm:$0xff]   ;;  %s5230_s5 = smov 17  }
 0x448   :  { %v1265_v21 = vsel %vm783_vm9, %v5216_v53, %v1251_v12  ;;  %v1263_v56 = vsel %vm783_vm9, %v1251_v12, %v5217_v58  ;;  %v1473_v24 = vpop.permute.xlu0 %1472 }
 0x449   :  { %v1273_v29 = vmul.f32 %v1265_v21, %v5215_v44  ;;  %1576 = vmatpush1.bf16.msra.mxu0 %v1504_v19  ;;  %1618 = vmatprep.subr.bf16.mxu1 %v1507_v23  ;;  %v1274_v1 = vmul.f32 %v1263_v56, %v5220_v39  ;;  %v1488_v4 = vsel %vm1062_vm10, %v5222_v54, %v1473_v24 }
 0x44a   :  { %1619 = vmatpush1.bf16.msra.mxu1 %v1506_v33  ;;  %v1486_v0 = vsel %vm1062_vm10, %v1473_v24, %v5223_v22  ;;  %v1492_v14 = vmul.f32 %v1488_v4, %v5224_v30 }
 0x44b   :  { %v1259_v32 = vpop.permute.xlu1 %1258  ;;  %v1501_v15 = vpack.c.bf16 %v1273_v29, %v1269_v11  ;;  %v1502_v5 = vpack.c.bf16 %v1274_v1, %v1270_v52  ;;  %v1493_v3 = vmul.f32 %v1486_v0, %v5227_v13  ;;  %v4356_v52 = vld [vmem:[%s4984_s7] sm:$0xff] }
 0x44c   :  { %v1261_v36 = vsel %vm783_vm9, %v5217_v58, %v1259_v32  ;;  %v1267_v50 = vsel %vm783_vm9, %v1259_v32, %v5216_v53  ;;  %v1481_v7 = vpop.permute.xlu0 %1480 }
 0x44d   :  { %v1272_v20 = vmul.f32 %v1267_v50, %v5219_v6  ;;  %v1275_v25 = vmul.f32 %v1261_v36, %v5221_v8  ;;  %1577 = vmatprep.subr.bf16.mxu0 %v1501_v15  ;;  %v1484_v48 = vsel %vm1062_vm10, %v5223_v22, %v1481_v7  ;;  %v1490_v46 = vsel %vm1062_vm10, %v1481_v7, %v5222_v54 }
 0x44e   :  { %v1494_v42 = vmul.f32 %v1484_v48, %v5228_v38  ;;  %v1495_v28 = vmul.f32 %v1490_v46, %v5229_v43 }
 0x44f   :  { %v1500_v35 = vpack.c.bf16 %v1272_v20, %v1268_v34  ;;  %v1475_v63 = vpop.permute.xlu1 %1474  ;;  %v1503_v26 = vpack.c.bf16 %v1275_v25, %v1271_v59 }
 0x450   :  { %v1487_v16 = vsel %vm1062_vm10, %v1475_v63, %v5225_v45  ;;  %v1489_v55 = vsel %vm1062_vm10, %v5226_v17, %v1475_v63 }
 0x451   :  { %v1496_v27 = vmul.f32 %v1489_v55, %v5224_v30  ;;  %v1497_v10 = vmul.f32 %v1487_v16, %v5227_v13  ;;  %1578 = vmatpush1.bf16.msra.mxu0 %v1500_v35  ;;  %1620 = vmatprep.subr.bf16.mxu1 %v1503_v26  ;;  %v2621_v35 = vcombine.high %v4356_v52, %v4356_v52  ;;  %v1950_v26 = vld [vmem:[%s4985_s8] sm:$0xff] }
 0x452   :  { %1621 = vmatpush1.bf16.msra.mxu1 %v1502_v5 }
 0x453   :  { %v1532_v57 = vpack.c.bf16 %v1496_v27, %v1492_v14  ;;  %v1483_v2 = vpop.permute.xlu1 %1482  ;;  %v1533_v61 = vpack.c.bf16 %v1497_v10, %v1493_v3 }
 0x454   :  { %v1485_v51 = vsel %vm1062_vm10, %v5225_v45, %v1483_v2  ;;  %v1491_v49 = vsel %vm1062_vm10, %v1483_v2, %v5226_v17 }
 0x455   :  { %v1498_v47 = vmul.f32 %v1485_v51, %v5228_v38  ;;  %v1499_v41 = vmul.f32 %v1491_v49, %v5229_v43  ;;  %1593 = vmatprep.subr.bf16.mxu0 %v1533_v61 }
 0x456   :  { %1594 = vmatpush2.bf16.msra.mxu0 %v1532_v57 }
 0x457   :  { %v1534_v31 = vpack.c.bf16 %v1498_v47, %v1494_v42  ;;  %v1535_v19 = vpack.c.bf16 %v1499_v41, %v1495_v28 }
 0x459   :  { %1596 = vmatmul.mubr.bf16.vlgmr.msra.gmra.mxu0 %v2667_v9  ;;  %1636 = vmatprep.subr.bf16.mxu1 %v1535_v19  ;;  %v1543_v12 = vpop.permute.xlu0 %1542 }
 0x45a   :  { %1637 = vmatpush2.bf16.msra.mxu1 %v1534_v31  ;;  %2622 = vmatprep.mubr.msk.bf16.mxu0 %vm1559_vm7, %v2621_v35 }
 0x45d   :  { %1639 = vmatmul.mubr.bf16.vlgmr.msra.gmra.mxu1 %v2667_v9 }
 0x45e   :  { %2623 = vmatprep.mubr.msk.bf16.mxu1 %vm1559_vm7, %v2621_v35  ;;  %vm5260_vm7 = vcmp.lt.s32.totalorder %v2940_v40, 111  ;;  %v2203_v40 = vld [vmem:[%s4987_s9] sm:$0x1] }
 0x45f   :  { %vm5261_vm10 = vmmov %vm5260_vm7 }
 0x460   :  { %v1548_v53 = vpop.permute.xlu1 %1547  ;;  %vm5262_vm11 = vmmov %vm5260_vm7 }
 0x461   :  { %vm5263_vm12 = vmmov %vm5260_vm7 }
 0x462   :  { %vm5266_vm13 = vmmov %vm5260_vm7 }
 0x463   :  { %vm5267_vm14 = vmmov %vm5260_vm7 }
 0x464   :  { %vm5268_vm15 = vmmov %vm5260_vm7 }
 0x465   :  { %vm5269_vm8 = vmmov %vm5260_vm7 }
 0x466   :  { %vm5277_vm9 = vmmov %vm5260_vm7 }
 0x519   :  { %v1597_v23 = vpop.f32.mrf.mxu0 }
 0x51a   :  { %v1598_v44 = vadd.f32 %v1597_v23, %v1543_v12 }
 0x51b   :  { %v1599_v11 = vpop.f32.mrf.mxu0 }
 0x51c   :  { %v4215_v21 = vmax.f32 %v1598_v44, 0.0  ;;  %v1600_v34 = vadd.f32 %v1599_v11, %v1543_v12 }
 0x51d   :  { %v1601_v33 = vpop.f32.mrf.mxu0  ;;  %v1640_v60 = vpop.f32.mrf.mxu1 }
 0x51e   :  { %v1602_v58 = vadd.f32 %v1601_v33, %v1548_v53  ;;  %v1641_v56 = vadd.f32 %v1640_v60, %v1543_v12  ;;  %1849 = vrot.lane.b32.xlu0 %v4215_v21, %s2695_s28  ;;  %v4289_v1 = vmax.f32 %v1600_v34, 0.0 }
 0x51f   :  { %v1642_v29 = vpop.f32.mrf.mxu1  ;;  %v1603_v39 = vpop.f32.mrf.mxu0 }
 0x520   :  { %v4219_v24 = vmax.f32 %v1602_v58, 0.0  ;;  %v4221_v37 = vmax.f32 %v1641_v56, 0.0  ;;  %v1604_v36 = vadd.f32 %v1603_v39, %v1548_v53  ;;  %v1643_v50 = vadd.f32 %v1642_v29, %v1543_v12  ;;  %v5232_v58 = vld [vmem:[#allocation39_spill] sm:$0xff]  ;;  %v5233_v29 = vld [vmem:[#allocation40_spill] sm:$0xff] }
 0x521   :  { %v1644_v18 = vpop.f32.mrf.mxu1 }
 0x522   :  { %v1645_v62 = vadd.f32 %v1644_v18, %v1548_v53  ;;  %1851 = vrot.lane.b32.xlu1 %v4219_v24, %s2695_s28  ;;  %1857 = vrot.lane.b32.xlu0 %v4221_v37, %s2695_s28  ;;  %v1929_v32 = vpack.c.bf16 %v4219_v24, %v4215_v21  ;;  %v4295_v59 = vmax.f32 %v1604_v36, 0.0  ;;  %v4297_v54 = vmax.f32 %v1643_v50, 0.0 }
 0x523   :  { %v1646_v8 = vpop.f32.mrf.mxu1 }
 0x524   :  { %v4229_v15 = vmax.f32 %v1645_v62, 0.0  ;;  %v1647_v4 = vadd.f32 %v1646_v8, %v1548_v53 }
 0x526   :  { %1859 = vrot.lane.b32.xlu1 %v4229_v15, %s2695_s28  ;;  %1817 = vrot.lane.b32.xlu0 %v4215_v21, %s2693_s27  ;;  %v1931_v6 = vpack.c.bf16 %v4229_v15, %v4221_v37  ;;  %v4303_v20 = vmax.f32 %v1647_v4, 0.0 }
 0x52a   :  { %1819 = vrot.lane.b32.xlu1 %v4219_v24, %s2693_s27  ;;  %1825 = vrot.lane.b32.xlu0 %v4221_v37, %s2693_s27 }
 0x52e   :  { %1827 = vrot.lane.b32.xlu1 %v4229_v15, %s2693_s27  ;;  %1785 = vrot.lane.b32.xlu0 %v4215_v21, %s2691_s26 }
 0x532   :  { %1787 = vrot.lane.b32.xlu1 %v4219_v24, %s2691_s26  ;;  %1793 = vrot.lane.b32.xlu0 %v4221_v37, %s2691_s26 }
 0x536   :  { %1795 = vrot.lane.b32.xlu1 %v4229_v15, %s2691_s26  ;;  %1753 = vrot.lane.b32.xlu0 %v4215_v21, %s2689_s25 }
 0x53a   :  { %1755 = vrot.lane.b32.xlu1 %v4219_v24, %s2689_s25  ;;  %1761 = vrot.lane.b32.xlu0 %v4221_v37, %s2689_s25 }
 0x53e   :  { %1763 = vrot.lane.b32.xlu1 %v4229_v15, %s2689_s25  ;;  %1721 = vrot.lane.b32.xlu0 %v4215_v21, %s2687_s24 }
 0x542   :  { %1723 = vrot.lane.b32.xlu1 %v4219_v24, %s2687_s24  ;;  %1729 = vrot.lane.b32.xlu0 %v4221_v37, %s2687_s24 }
 0x546   :  { %1731 = vrot.lane.b32.xlu1 %v4229_v15, %s2687_s24  ;;  %1689 = vrot.lane.b32.xlu0 %v4215_v21, %s2686_s23 }
 0x54a   :  { %1691 = vrot.lane.b32.xlu1 %v4219_v24, %s2686_s23  ;;  %1697 = vrot.lane.b32.xlu0 %v4221_v37, %s2686_s23 }
 0x54e   :  { %1699 = vrot.lane.b32.xlu1 %v4229_v15, %s2686_s23  ;;  %1657 = vrot.lane.b32.xlu0 %v4215_v21, %s5230_s5 }
 0x552   :  { %1659 = vrot.lane.b32.xlu1 %v4219_v24, %s5230_s5  ;;  %1665 = vrot.lane.b32.xlu0 %v4221_v37, %s5230_s5 }
 0x556   :  { %1667 = vrot.lane.b32.xlu1 %v4229_v15, %s5230_s5  ;;  %1881 = vrot.lane.b32.xlu0 %v4215_v21, %s5231_s19 }
 0x55a   :  { %1883 = vrot.lane.b32.xlu1 %v4219_v24, %s5231_s19  ;;  %1889 = vrot.lane.b32.xlu0 %v4221_v37, %s5231_s19 }
 0x55e   :  { %1891 = vrot.lane.b32.xlu1 %v4229_v15, %s5231_s19  ;;  %1853 = vrot.lane.b32.xlu0 %v4289_v1, %s2695_s28 }
 0x562   :  { %1855 = vrot.lane.b32.xlu1 %v4295_v59, %s2695_s28  ;;  %1861 = vrot.lane.b32.xlu0 %v4297_v54, %s2695_s28 }
 0x566   :  { %1863 = vrot.lane.b32.xlu1 %v4303_v20, %s2695_s28  ;;  %1821 = vrot.lane.b32.xlu0 %v4289_v1, %s2693_s27 }
 0x56a   :  { %1823 = vrot.lane.b32.xlu1 %v4295_v59, %s2693_s27  ;;  %1829 = vrot.lane.b32.xlu0 %v4297_v54, %s2693_s27 }
 0x56e   :  { %1831 = vrot.lane.b32.xlu1 %v4303_v20, %s2693_s27  ;;  %1789 = vrot.lane.b32.xlu0 %v4289_v1, %s2691_s26 }
 0x572   :  { %1791 = vrot.lane.b32.xlu1 %v4295_v59, %s2691_s26  ;;  %1797 = vrot.lane.b32.xlu0 %v4297_v54, %s2691_s26 }
 0x576   :  { %1799 = vrot.lane.b32.xlu1 %v4303_v20, %s2691_s26  ;;  %1757 = vrot.lane.b32.xlu0 %v4289_v1, %s2689_s25 }
 0x57a   :  { %1759 = vrot.lane.b32.xlu1 %v4295_v59, %s2689_s25  ;;  %1765 = vrot.lane.b32.xlu0 %v4297_v54, %s2689_s25 }
 0x57e   :  { %1767 = vrot.lane.b32.xlu1 %v4303_v20, %s2689_s25  ;;  %1725 = vrot.lane.b32.xlu0 %v4289_v1, %s2687_s24 }
 0x582   :  { %1727 = vrot.lane.b32.xlu1 %v4295_v59, %s2687_s24  ;;  %1733 = vrot.lane.b32.xlu0 %v4297_v54, %s2687_s24 }
 0x586   :  { %1735 = vrot.lane.b32.xlu1 %v4303_v20, %s2687_s24  ;;  %1693 = vrot.lane.b32.xlu0 %v4289_v1, %s2686_s23 }
 0x58a   :  { %1695 = vrot.lane.b32.xlu1 %v4295_v59, %s2686_s23  ;;  %1701 = vrot.lane.b32.xlu0 %v4297_v54, %s2686_s23 }
 0x58e   :  { %1703 = vrot.lane.b32.xlu1 %v4303_v20, %s2686_s23  ;;  %1661 = vrot.lane.b32.xlu0 %v4289_v1, %s5230_s5 }
 0x590   :  { %v1850_v25 = vpop.permute.xlu0 %1849 }
 0x592   :  { %1663 = vrot.lane.b32.xlu1 %v4295_v59, %s5230_s5  ;;  %1669 = vrot.lane.b32.xlu0 %v4297_v54, %s5230_s5 }
 0x594   :  { %v1852_v22 = vpop.permute.xlu1 %1851  ;;  %v1858_v0 = vpop.permute.xlu0 %1857 }
 0x596   :  { %1671 = vrot.lane.b32.xlu1 %v4303_v20, %s5230_s5  ;;  %1885 = vrot.lane.b32.xlu0 %v4289_v1, %s5231_s19 }
 0x598   :  { %v1860_v7 = vpop.permute.xlu1 %1859  ;;  %v4366_v63 = vpop.permute.xlu0 %1817 }
 0x59a   :  { %1887 = vrot.lane.b32.xlu1 %v4295_v59, %s5231_s19  ;;  %1893 = vrot.lane.b32.xlu0 %v4297_v54, %s5231_s19 }
 0x59c   :  { %v4375_v5 = vpop.permute.xlu1 %1819  ;;  %v4377_v30 = vpop.permute.xlu0 %1825 }
 0x59e   :  { %1895 = vrot.lane.b32.xlu1 %v4303_v20, %s5231_s19  ;;  %1953 = vperm.xlu0 %2663, %v1950_v26  }
 0x5a0   :  { %v4381_v14 = vpop.permute.xlu1 %1827  ;;  %v4383_v45 = vpop.permute.xlu0 %1785 }
 0x5a4   :  { %v4385_v16 = vpop.permute.xlu1 %1787  ;;  %v4387_v17 = vpop.permute.xlu0 %1793 }
 0x5a8   :  { %v4389_v55 = vpop.permute.xlu1 %1795  ;;  %v4391_v13 = vpop.permute.xlu0 %1753 }
 0x5ac   :  { %v4393_v3 = vpop.permute.xlu1 %1755  ;;  %v4395_v27 = vpop.permute.xlu0 %1761 }
 0x5b0   :  { %v4397_v10 = vpop.permute.xlu1 %1763  ;;  %v4399_v48 = vpop.permute.xlu0 %1721 }
 0x5b4   :  { %v4401_v46 = vpop.permute.xlu1 %1723  ;;  %v4403_v57 = vpop.permute.xlu0 %1729 }
 0x5b8   :  { %v4405_v2 = vpop.permute.xlu1 %1731  ;;  %v4407_v61 = vpop.permute.xlu0 %1689 }
 0x5bc   :  { %v4409_v51 = vpop.permute.xlu1 %1691  ;;  %v4411_v49 = vpop.permute.xlu0 %1697 }
 0x5c0   :  { %v4413_v38 = vpop.permute.xlu1 %1699  ;;  %v4415_v42 = vpop.permute.xlu0 %1657 }
 0x5c4   :  { %v4417_v43 = vpop.permute.xlu1 %1659  ;;  %v4419_v28 = vpop.permute.xlu0 %1665 }
 0x5c8   :  { %v4421_v47 = vpop.permute.xlu1 %1667  ;;  %v4423_v41 = vpop.permute.xlu0 %1881 }
 0x5cc   :  { %v4425_v9 = vpop.permute.xlu1 %1883  ;;  %v4427_v31 = vpop.permute.xlu0 %1889 }
 0x5d0   :  { %v4429_v19 = vpop.permute.xlu1 %1891  ;;  %v1854_v12 = vpop.permute.xlu0 %1853 }
 0x5d1   :  { %v1867_v23 = vsel %vm510_vm6, %v1854_v12, %v1858_v0  ;;  %v1869_v44 = vsel %vm510_vm6, %v1850_v25, %v1854_v12 }
 0x5d2   :  { %v1873_v56 = vmul.f32 %v1869_v44, %v5232_v58  ;;  %v1874_v18 = vmul.f32 %v1867_v23, %v5233_v29  ;;  %v5234_v23 = vld [vmem:[#allocation41_spill] sm:$0xff] }
 0x5d4   :  { %v1856_v11 = vpop.permute.xlu1 %1855  ;;  %v1862_v53 = vpop.permute.xlu0 %1861 }
 0x5d5   :  { %v1868_v33 = vsel %vm510_vm6, %v1856_v11, %v1860_v7  ;;  %v1870_v60 = vsel %vm510_vm6, %v1852_v22, %v1856_v11  ;;  %v1865_v39 = vsel %vm510_vm6, %v1858_v0, %v1862_v53  ;;  %v1871_v36 = vsel %vm510_vm6, %v1862_v53, %v1850_v25  ;;  %v5235_v11 = vld [vmem:[#allocation42_spill] sm:$0xff] }
 0x5d6   :  { %v1877_v62 = vmul.f32 %v1870_v60, %v5232_v58  ;;  %v1878_v34 = vmul.f32 %v1868_v33, %v5233_v29  ;;  %v1875_v44 = vmul.f32 %v1865_v39, %v5234_v23  ;;  %v1876_v33 = vmul.f32 %v1871_v36, %v5235_v11  ;;  %v5236_v39 = vld [vmem:[#allocation35_spill] sm:$0xff] }
 0x5d8   :  { %v1941_v50 = vpack.c.bf16 %v1877_v62, %v1873_v56  ;;  %v1864_v8 = vpop.permute.xlu1 %1863  ;;  %v1822_v4 = vpop.permute.xlu0 %1821  ;;  %v1942_v35 = vpack.c.bf16 %v1878_v34, %v1874_v18 }
 0x5d9   :  { %v1866_v26 = vsel %vm510_vm6, %v1860_v7, %v1864_v8  ;;  %v1872_v12 = vsel %vm510_vm6, %v1864_v8, %v1852_v22  ;;  %v1835_v25 = vsel %vm442_vm5, %v1822_v4, %v4377_v30  ;;  %v1837_v7 = vsel %vm442_vm5, %v4366_v63, %v1822_v4  ;;  %v5237_v8 = vld [vmem:[#allocation36_spill] sm:$0xff] }
 0x5da   :  { %v1879_v60 = vmul.f32 %v1866_v26, %v5234_v23  ;;  %v1880_v0 = vmul.f32 %v1872_v12, %v5235_v11  ;;  %1965 = vmatprep.subr.bf16.mxu0 %v1942_v35  ;;  %v1841_v36 = vmul.f32 %v1837_v7, %v5236_v39  ;;  %v1842_v35 = vmul.f32 %v1835_v25, %v5237_v8 }
 0x5db   :  { %1966 = vmatpush1.bf16.msra.mxu0 %v1941_v50 }
 0x5dc   :  { %v1943_v53 = vpack.c.bf16 %v1879_v60, %v1875_v44  ;;  %v1824_v22 = vpop.permute.xlu1 %1823  ;;  %v1830_v56 = vpop.permute.xlu0 %1829  ;;  %v1944_v18 = vpack.c.bf16 %v1880_v0, %v1876_v33 }
 0x5dd   :  { %v1836_v62 = vsel %vm442_vm5, %v1824_v22, %v4381_v14  ;;  %v1838_v34 = vsel %vm442_vm5, %v4375_v5, %v1824_v22  ;;  %v1833_v4 = vsel %vm442_vm5, %v4377_v30, %v1830_v56  ;;  %v1839_v12 = vsel %vm442_vm5, %v1830_v56, %v4366_v63  ;;  %v5238_v22 = vld [vmem:[#allocation37_spill] sm:$0xff]  ;;  %v5239_v30 = vld [vmem:[#allocation38_spill] sm:$0xff] }
 0x5de   :  { %v1845_v26 = vmul.f32 %v1838_v34, %v5236_v39  ;;  %v1846_v50 = vmul.f32 %v1836_v62, %v5237_v8  ;;  %2006 = vmatprep.subr.bf16.mxu1 %v1944_v18  ;;  %v1843_v18 = vmul.f32 %v1833_v4, %v5238_v22  ;;  %v1844_v62 = vmul.f32 %v1839_v12, %v5239_v30  ;;  %v5240_v4 = vld [vmem:[#allocation31_spill] sm:$0xff] }
 0x5df   :  { %2007 = vmatpush1.bf16.msra.mxu1 %v1943_v53 }
 0x5e0   :  { %v1937_v44 = vpack.c.bf16 %v1845_v26, %v1841_v36  ;;  %v1832_v33 = vpop.permute.xlu1 %1831  ;;  %v1790_v60 = vpop.permute.xlu0 %1789  ;;  %v1938_v0 = vpack.c.bf16 %v1846_v50, %v1842_v35 }
 0x5e1   :  { %v1834_v25 = vsel %vm442_vm5, %v4381_v14, %v1832_v33  ;;  %v1840_v7 = vsel %vm442_vm5, %v1832_v33, %v4375_v5  ;;  %v1803_v53 = vsel %vm374_vm4, %v1790_v60, %v4387_v17  ;;  %v1805_v14 = vsel %vm374_vm4, %v4383_v45, %v1790_v60  ;;  %v5241_v33 = vld [vmem:[#allocation32_spill] sm:$0xff] }
 0x5e2   :  { %v1847_v34 = vmul.f32 %v1834_v25, %v5238_v22  ;;  %v1848_v63 = vmul.f32 %v1840_v7, %v5239_v30  ;;  %1967 = vmatprep.subr.bf16.mxu0 %v1938_v0  ;;  %v1809_v12 = vmul.f32 %v1805_v14, %v5240_v4  ;;  %v1810_v0 = vmul.f32 %v1803_v53, %v5241_v33 }
 0x5e3   :  { %1968 = vmatpush1.bf16.msra.mxu0 %v1937_v44 }
 0x5e4   :  { %v1939_v56 = vpack.c.bf16 %v1847_v34, %v1843_v18  ;;  %v1792_v5 = vpop.permute.xlu1 %1791  ;;  %v1798_v36 = vpop.permute.xlu0 %1797  ;;  %v1940_v35 = vpack.c.bf16 %v1848_v63, %v1844_v62 }
 0x5e5   :  { %v1804_v26 = vsel %vm374_vm4, %v1792_v5, %v4389_v55  ;;  %v1806_v50 = vsel %vm374_vm4, %v4385_v16, %v1792_v5  ;;  %v1801_v60 = vsel %vm374_vm4, %v4387_v17, %v1798_v36  ;;  %v1807_v7 = vsel %vm374_vm4, %v1798_v36, %v4383_v45  ;;  %v5242_v5 = vld [vmem:[#allocation33_spill] sm:$0xff] }
 0x5e6   :  { %v1813_v25 = vmul.f32 %v1806_v50, %v5240_v4  ;;  %v1814_v44 = vmul.f32 %v1804_v26, %v5241_v33  ;;  %2008 = vmatprep.subr.bf16.mxu1 %v1940_v35  ;;  %v1930_v17 = vpack.c.bf16 %v4295_v59, %v4289_v1  ;;  %v1811_v35 = vmul.f32 %v1801_v60, %v5242_v5  ;;  %v5243_v26 = vld [vmem:[#allocation34_spill] sm:$0xff]  ;;  %v5244_v60 = vld [vmem:[#allocation27_spill] sm:$0xff] }
 0x5e7   :  { %2009 = vmatpush1.bf16.msra.mxu1 %v1939_v56  ;;  %v1812_v45 = vmul.f32 %v1807_v7, %v5243_v26 }
 0x5e8   :  { %v1933_v18 = vpack.c.bf16 %v1813_v25, %v1809_v12  ;;  %v1800_v62 = vpop.permute.xlu1 %1799  ;;  %v1758_v34 = vpop.permute.xlu0 %1757  ;;  %v1934_v63 = vpack.c.bf16 %v1814_v44, %v1810_v0  ;;  %v1932_v44 = vpack.c.bf16 %v4303_v20, %v4297_v54 }
 0x5e9   :  { %v1802_v53 = vsel %vm374_vm4, %v4389_v55, %v1800_v62  ;;  %v1808_v14 = vsel %vm374_vm4, %v1800_v62, %v4385_v16  ;;  %v1771_v55 = vsel %vm306_vm3, %v1758_v34, %v4395_v27  ;;  %v1773_v16 = vsel %vm306_vm3, %v4391_v13, %v1758_v34  ;;  %v5245_v62 = vld [vmem:[#allocation28_spill] sm:$0xff] }
 0x5ea   :  { %v1815_v56 = vmul.f32 %v1802_v53, %v5242_v5  ;;  %v1816_v36 = vmul.f32 %v1808_v14, %v5243_v26  ;;  %1969 = vmatprep.subr.bf16.mxu0 %v1934_v63  ;;  %v1778_v7 = vmul.f32 %v1773_v16, %v5244_v60 }
 0x5eb   :  { %1970 = vmatpush1.bf16.msra.mxu0 %v1933_v18  ;;  %v1779_v18 = vmul.f32 %v1771_v55, %v5245_v62 }
 0x5ec   :  { %v1935_v50 = vpack.c.bf16 %v1815_v56, %v1811_v35  ;;  %v1760_v1 = vpop.permute.xlu1 %1759  ;;  %1971 = vmatprep.subr.bf16.mxu0 %v1930_v17  ;;  %v1766_v59 = vpop.permute.xlu0 %1765  ;;  %v1936_v12 = vpack.c.bf16 %v1816_v36, %v1812_v45  ;;  %v5246_v56 = vld [vmem:[#allocation29_spill] sm:$0xff]  ;;  %v5247_v36 = vld [vmem:[#allocation30_spill] sm:$0xff] }
 0x5ed   :  { %v1772_v0 = vsel %vm306_vm3, %v1760_v1, %v4397_v10  ;;  %v1774_v25 = vsel %vm306_vm3, %v4393_v3, %v1760_v1  ;;  %v1769_v53 = vsel %vm306_vm3, %v4395_v27, %v1766_v59  ;;  %v1775_v14 = vsel %vm306_vm3, %v1766_v59, %v4391_v13 }
 0x5ee   :  { %v1782_v34 = vmul.f32 %v1774_v25, %v5244_v60  ;;  %v1783_v63 = vmul.f32 %v1772_v0, %v5245_v62  ;;  %2010 = vmatprep.subr.bf16.mxu1 %v1936_v12  ;;  %v1777_v13 = vmul.f32 %v1775_v14, %v5246_v56  ;;  %v1780_v55 = vmul.f32 %v1769_v53, %v5247_v36  ;;  %v5248_v0 = vld [vmem:[#allocation23_spill] sm:$0xff] }
 0x5ef   :  { %1972 = vmatpush1.bf16.msra.mxu0 %v1929_v32  ;;  %2011 = vmatpush1.bf16.msra.mxu1 %v1935_v50 }
 0x5f0   :  { %v1927_v54 = vpack.c.bf16 %v1783_v63, %v1779_v18  ;;  %v1768_v20 = vpop.permute.xlu1 %1767  ;;  %2012 = vmatprep.subr.bf16.mxu1 %v1932_v44  ;;  %v1726_v17 = vpop.permute.xlu0 %1725  ;;  %v1926_v35 = vpack.c.bf16 %v1782_v34, %v1778_v7  ;;  %v5249_v44 = vld [vmem:[#allocation24_spill] sm:$0xff] }
 0x5f1   :  { %v1770_v45 = vsel %vm306_vm3, %v4397_v10, %v1768_v20  ;;  %v1776_v27 = vsel %vm306_vm3, %v1768_v20, %v4393_v3  ;;  %v1739_v32 = vsel %vm238_vm2, %v1726_v17, %v4403_v57  ;;  %v1741_v10 = vsel %vm238_vm2, %v4399_v48, %v1726_v17 }
 0x5f2   :  { %v1781_v21 = vmul.f32 %v1776_v27, %v5246_v56  ;;  %v1784_v24 = vmul.f32 %v1770_v45, %v5247_v36  ;;  %1973 = vmatprep.subr.bf16.mxu0 %v1926_v35  ;;  %v1746_v25 = vmul.f32 %v1741_v10, %v5248_v0  ;;  %v1747_v7 = vmul.f32 %v1739_v32, %v5249_v44  ;;  %v5250_v35 = vld [vmem:[#allocation25_spill] sm:$0xff]  ;;  %v5251_v45 = vld [vmem:[#allocation26_spill] sm:$0xff] }
 0x5f3   :  { %2013 = vmatpush1.bf16.msra.mxu1 %v1931_v6 }
 0x5f4   :  { %v1925_v3 = vpack.c.bf16 %v1781_v21, %v1777_v13  ;;  %v1728_v16 = vpop.permute.xlu1 %1727  ;;  %v1734_v50 = vpop.permute.xlu0 %1733  ;;  %v1928_v1 = vpack.c.bf16 %v1784_v24, %v1780_v55 }
 0x5f5   :  { %v1740_v59 = vsel %vm238_vm2, %v1728_v16, %v4405_v2  ;;  %v1742_v12 = vsel %vm238_vm2, %v4401_v46, %v1728_v16  ;;  %v1737_v15 = vsel %vm238_vm2, %v4403_v57, %v1734_v50  ;;  %v1743_v6 = vsel %vm238_vm2, %v1734_v50, %v4399_v48  ;;  %v5253_v50 = vld [vmem:[#allocation21_spill] sm:$0xff] }
 0x5f6   :  { %v1750_v18 = vmul.f32 %v1742_v12, %v5248_v0  ;;  %v1751_v37 = vmul.f32 %v1740_v59, %v5249_v44  ;;  %1974 = vmatpush1.bf16.msra.mxu0 %v1925_v3  ;;  %2014 = vmatprep.subr.bf16.mxu1 %v1928_v1  ;;  %v1745_v57 = vmul.f32 %v1743_v6, %v5250_v35  ;;  %v5252_v3 = vld [vmem:[#allocation18_spill] sm:$0xff] }
 0x5f7   :  { %2015 = vmatpush1.bf16.msra.mxu1 %v1927_v54  ;;  %v1748_v27 = vmul.f32 %v1737_v15, %v5251_v45 }
 0x5f8   :  { %v1923_v34 = vpack.c.bf16 %v1751_v37, %v1747_v7  ;;  %v1736_v63 = vpop.permute.xlu1 %1735  ;;  %v1694_v53 = vpop.permute.xlu0 %1693  ;;  %v1922_v14 = vpack.c.bf16 %v1750_v18, %v1746_v25 }
 0x5f9   :  { %v1738_v20 = vsel %vm238_vm2, %v4405_v2, %v1736_v63  ;;  %v1744_v17 = vsel %vm238_vm2, %v1736_v63, %v4401_v46  ;;  %v1707_v54 = vsel %vm170_vm1, %v1694_v53, %v4411_v49  ;;  %v1709_v2 = vsel %vm170_vm1, %v4407_v61, %v1694_v53 }
 0x5fa   :  { %v1749_v48 = vmul.f32 %v1744_v17, %v5250_v35  ;;  %v1752_v13 = vmul.f32 %v1738_v20, %v5251_v45  ;;  %1975 = vmatprep.subr.bf16.mxu0 %v1922_v14  ;;  %v1714_v16 = vmul.f32 %v1709_v2, %v5252_v3  ;;  %v1715_v1 = vmul.f32 %v1707_v54, %v5253_v50  ;;  %v5254_v14 = vld [vmem:[#allocation20_spill] sm:$0xff]  ;;  %v5255_v20 = vld [vmem:[#allocation22_spill] sm:$0xff] }
 0x5fc   :  { %v1921_v55 = vpack.c.bf16 %v1749_v48, %v1745_v57  ;;  %v1696_v21 = vpop.permute.xlu1 %1695  ;;  %v1702_v46 = vpop.permute.xlu0 %1701  ;;  %v1924_v24 = vpack.c.bf16 %v1752_v13, %v1748_v27 }
 0x5fd   :  { %v1708_v32 = vsel %vm170_vm1, %v1696_v21, %v4413_v38  ;;  %v1710_v10 = vsel %vm170_vm1, %v4409_v51, %v1696_v21  ;;  %v1705_v25 = vsel %vm170_vm1, %v4411_v49, %v1702_v46  ;;  %v1711_v7 = vsel %vm170_vm1, %v1702_v46, %v4407_v61  ;;  %v5257_v46 = vld [vmem:[#allocation10_spill] sm:$0xff] }
 0x5fe   :  { %v1718_v59 = vmul.f32 %v1710_v10, %v5252_v3  ;;  %v1719_v12 = vmul.f32 %v1708_v32, %v5253_v50  ;;  %1976 = vmatpush1.bf16.msra.mxu0 %v1921_v55  ;;  %2016 = vmatprep.subr.bf16.mxu1 %v1924_v24  ;;  %v1713_v49 = vmul.f32 %v1711_v7, %v5254_v14  ;;  %v5256_v55 = vld [vmem:[#allocation16_spill] sm:$0xff] }
 0x5ff   :  { %2017 = vmatpush1.bf16.msra.mxu1 %v1923_v34  ;;  %v1716_v17 = vmul.f32 %v1705_v25, %v5255_v20 }
 0x600   :  { %v1919_v18 = vpack.c.bf16 %v1719_v12, %v1715_v1  ;;  %v1704_v37 = vpop.permute.xlu1 %1703  ;;  %v1662_v15 = vpop.permute.xlu0 %1661  ;;  %v1918_v6 = vpack.c.bf16 %v1718_v59, %v1714_v16 }
 0x601   :  { %v1706_v63 = vsel %vm170_vm1, %v4413_v38, %v1704_v37  ;;  %v1712_v53 = vsel %vm170_vm1, %v1704_v37, %v4409_v51  ;;  %v1675_v34 = vsel %vm103_vm0, %v1662_v15, %v4419_v28  ;;  %v1677_v38 = vsel %vm103_vm0, %v4415_v42, %v1662_v15 }
 0x602   :  { %v1717_v61 = vmul.f32 %v1712_v53, %v5254_v14  ;;  %v1720_v57 = vmul.f32 %v1706_v63, %v5255_v20  ;;  %1977 = vmatprep.subr.bf16.mxu0 %v1918_v6  ;;  %v1682_v21 = vmul.f32 %v1677_v38, %v5256_v55  ;;  %v1683_v24 = vmul.f32 %v1675_v34, %v5257_v46  ;;  %v5258_v6 = vld [vmem:[#allocation15_spill] sm:$0xff]  ;;  %v5259_v63 = vld [vmem:[#allocation17_spill] sm:$0xff] }
 0x604   :  { %v1917_v27 = vpack.c.bf16 %v1717_v61, %v1713_v49  ;;  %v1664_v48 = vpop.permute.xlu1 %1663  ;;  %v1670_v51 = vpop.permute.xlu0 %1669  ;;  %v1920_v13 = vpack.c.bf16 %v1720_v57, %v1716_v17 }
 0x605   :  { %v1676_v54 = vsel %vm103_vm0, %v1664_v48, %v4421_v47  ;;  %v1678_v2 = vsel %vm103_vm0, %v4417_v43, %v1664_v48  ;;  %v1673_v16 = vsel %vm103_vm0, %v4419_v28, %v1670_v51  ;;  %v1679_v1 = vsel %vm103_vm0, %v1670_v51, %v4415_v42  ;;  %v5265_v51 = vld [vmem:[#allocation44_spill] sm:$0xff] }
 0x606   :  { %v1686_v32 = vmul.f32 %v1678_v2, %v5256_v55  ;;  %v1687_v10 = vmul.f32 %v1676_v54, %v5257_v46  ;;  %1978 = vmatpush1.bf16.msra.mxu0 %v1917_v27  ;;  %2018 = vmatprep.subr.bf16.mxu1 %v1920_v13  ;;  %v1681_v28 = vmul.f32 %v1679_v1, %v5258_v6  ;;  %v5264_v27 = vld [vmem:[#allocation43_spill] sm:$0xff] }
 0x607   :  { %2019 = vmatpush1.bf16.msra.mxu1 %v1919_v18  ;;  %v1684_v53 = vmul.f32 %v1673_v16, %v5259_v63 }
 0x608   :  { %v1915_v59 = vpack.c.bf16 %v1687_v10, %v1683_v24  ;;  %v1672_v12 = vpop.permute.xlu1 %1671  ;;  %v1886_v25 = vpop.permute.xlu0 %1885  ;;  %v1914_v7 = vpack.c.bf16 %v1686_v32, %v1682_v21 }
 0x609   :  { %v1674_v37 = vsel %vm103_vm0, %v4421_v47, %v1672_v12  ;;  %v1680_v15 = vsel %vm103_vm0, %v1672_v12, %v4417_v43  ;;  %v1899_v18 = vsel %vm5260_vm7, %v1886_v25, %v4427_v31  ;;  %v1901_v47 = vsel %vm5261_vm10, %v4423_v41, %v1886_v25  ;;  %v5270_v25 = vld [vmem:[#allocation45_spill] sm:$0xff]  ;;  %vm5278_vm10 = vmmov %vm5260_vm7 }
 0x60a   :  { %v1685_v42 = vmul.f32 %v1680_v15, %v5258_v6  ;;  %v1688_v49 = vmul.f32 %v1674_v37, %v5259_v63  ;;  %1979 = vmatprep.subr.bf16.mxu0 %v1914_v7  ;;  %v1905_v48 = vmul.f32 %v1901_v47, %v5264_v27  ;;  %v1906_v13 = vmul.f32 %v1899_v18, %v5265_v51  ;;  %v5271_v37 = vld [vmem:[#allocation46_spill] sm:$0xff] }
 0x60c   :  { %v1913_v17 = vpack.c.bf16 %v1685_v42, %v1681_v28  ;;  %v1888_v61 = vpop.permute.xlu1 %1887  ;;  %v1894_v43 = vpop.permute.xlu0 %1893  ;;  %v1916_v57 = vpack.c.bf16 %v1688_v49, %v1684_v53 }
 0x60d   :  { %v1900_v34 = vsel %vm5262_vm11, %v1888_v61, %v4429_v19  ;;  %v1902_v38 = vsel %vm5263_vm12, %v4425_v9, %v1888_v61  ;;  %v1897_v21 = vsel %vm5266_vm13, %v4427_v31, %v1894_v43  ;;  %v1903_v24 = vsel %vm5267_vm14, %v1894_v43, %v4423_v41  ;;  %vm5279_vm11 = vmmov %vm5260_vm7 }
 0x60e   :  { %v1909_v54 = vmul.f32 %v1902_v38, %v5264_v27  ;;  %v1910_v2 = vmul.f32 %v1900_v34, %v5265_v51  ;;  %1980 = vmatpush1.bf16.msra.mxu0 %v1913_v17  ;;  %2020 = vmatprep.subr.bf16.mxu1 %v1916_v57  ;;  %v2620_v31 = vcombine.low %v4356_v52, %v4356_v52  ;;  %v19_v52 = vstv %s4986_s10  ;;  %v5273_v57 = vld [vmem:[#allocation19_spill] sm:$0xff] }
 0x60f   :  { %2021 = vmatpush1.bf16.msra.mxu1 %v1915_v59  ;;  %v1907_v7 = vmul.f32 %v1897_v21, %v5270_v25  ;;  %v1908_v41 = vmul.f32 %v1903_v24, %v5271_v37  ;;  %20 = vst [vmem:[#allocation2] sm:$0x1] %v19_v52  ;;  %vm5280_vm12 = vcmask 1043456  }
 0x610   :  { %v1945_v32 = vpack.c.bf16 %v1909_v54, %v1905_v48  ;;  %v1896_v10 = vpop.permute.xlu1 %1895  ;;  %v1946_v16 = vpack.c.bf16 %v1910_v2, %v1906_v13  ;;  %v5274_v2 = vld [vmem:[#allocation47_spill] sm:$0xff]  ;;  %vm5281_vm13 = vmmov %vm5280_vm12 }
 0x611   :  { %v1898_v1 = vsel %vm5268_vm15, %v4429_v19, %v1896_v10  ;;  %v1904_v12 = vsel %vm5269_vm8, %v1896_v10, %v4425_v9  ;;  %v5272_v19 = vmov 0   ;;  %vm5282_vm14 = vmmov %vm5280_vm12 }
 0x612   :  { %v1911_v15 = vmul.f32 %v1898_v1, %v5270_v25  ;;  %v1912_v59 = vmul.f32 %v1904_v12, %v5271_v37  ;;  %1995 = vmatprep.subr.bf16.mxu0 %v1946_v16  ;;  %v5275_v16 = vld [vmem:[#allocation48_spill] sm:$0xff]  ;;  %vm5283_vm15 = vmmov %vm5280_vm12 }
 0x613   :  { %1996 = vmatpush2.bf16.msra.mxu0 %v1945_v32 }
 0x614   :  { %v1947_v28 = vpack.c.bf16 %v1911_v15, %v1907_v7  ;;  %v1948_v53 = vpack.c.bf16 %v1912_v59, %v1908_v41  ;;  %v5276_v7 = vld [vmem:[#allocation49_spill] sm:$0xff] }
 0x616   :  { %1998 = vmatmul.mubr.bf16.vlgmr.msra.gmra.mxu0 %v2620_v31  ;;  %2036 = vmatprep.subr.bf16.mxu1 %v1948_v53  ;;  %v2204_v15 = vld [vmem:[#allocation2] sm:$0x1] }
 0x617   :  { %2037 = vmatpush2.bf16.msra.mxu1 %v1947_v28  ;;  %2261 = vmatprep.mubr.bf16.mxu0 %v5272_v19 }
 0x619   :  { %v1954_v9 = vpop.permute.xlu0 %1953 }
 0x61a   :  { %2039 = vmatmul.mubr.bf16.vlgmr.msra.gmra.mxu1 %v2620_v31 }
 0x61b   :  { %2302 = vmatprep.mubr.bf16.mxu1 %v5272_v19 }
 0x6d6   :  { %v1999_v42 = vpop.f32.mrf.mxu0 }
 0x6d7   :  { %v2000_v49 = vadd.f32 %v1999_v42, %v1954_v9 }
 0x6d8   :  { %v2001_v18 = vpop.f32.mrf.mxu0 }
 0x6d9   :  { %v2047_v47 = vmax.f32 %v2000_v49, 0.0  ;;  %v2002_v17 = vadd.f32 %v2001_v18, %v1954_v9 }
 0x6da   :  { %v2003_v61 = vpop.f32.mrf.mxu0  ;;  %v2040_v43 = vpop.f32.mrf.mxu1 }
 0x6db   :  { %v4697_v34 = vadd.f32 %v2047_v47, %v5273_v57  ;;  %v2048_v38 = vmax.f32 %v2002_v17, 0.0  ;;  %v2041_v48 = vadd.f32 %v2040_v43, %v1954_v9 }
 0x6dc   :  { %v2004_v13 = vpop.f32.mrf.mxu0  ;;  %v2042_v54 = vpop.f32.mrf.mxu1 }
 0x6dd   :  { %v4700_v21 = vadd.f32 %v2048_v38, %v5274_v2  ;;  %v2049_v24 = vmax.f32 %v2041_v48, 0.0  ;;  %v2043_v32 = vadd.f32 %v2042_v54, %v1954_v9  ;;  %2167 = vrot.lane.b32.xlu1 %v4697_v34, %s5231_s19 }
 0x6de   :  { %v2044_v10 = vpop.f32.mrf.mxu1 }
 0x6df   :  { %v4705_v1 = vadd.f32 %v2049_v24, %v5275_v16  ;;  %v2050_v12 = vmax.f32 %v2043_v32, 0.0  ;;  %2169 = vrot.lane.b32.xlu0 %v4700_v21, %s5231_s19 }
 0x6e0   :  { %v2045_v31 = vpop.f32.mrf.mxu1 }
 0x6e1   :  { %v4710_v41 = vadd.f32 %v2050_v12, %v5276_v7  ;;  %2171 = vrot.lane.b32.xlu1 %v4705_v1, %s5231_s19 }
 0x6e3   :  { %2173 = vrot.lane.b32.xlu0 %v4710_v41, %s5231_s19 }
 0x6e5   :  { %2135 = vrot.lane.b32.xlu1 %v4697_v34, %s2693_s27 }
 0x6e7   :  { %2137 = vrot.lane.b32.xlu0 %v4700_v21, %s2693_s27 }
 0x6e9   :  { %2139 = vrot.lane.b32.xlu1 %v4705_v1, %s2693_s27 }
 0x6eb   :  { %2141 = vrot.lane.b32.xlu0 %v4710_v41, %s2693_s27 }
 0x6ed   :  { %2151 = vrot.lane.b32.xlu1 %v4697_v34, %s2695_s28 }
 0x6ef   :  { %2153 = vrot.lane.b32.xlu0 %v4700_v21, %s2695_s28 }
 0x6f1   :  { %2155 = vrot.lane.b32.xlu1 %v4705_v1, %s2695_s28 }
 0x6f3   :  { %2157 = vrot.lane.b32.xlu0 %v4710_v41, %s2695_s28 }
 0x6f5   :  { %2119 = vrot.lane.b32.xlu1 %v4697_v34, %s2691_s26 }
 0x6f7   :  { %2121 = vrot.lane.b32.xlu0 %v4700_v21, %s2691_s26 }
 0x6f9   :  { %2123 = vrot.lane.b32.xlu1 %v4705_v1, %s2691_s26 }
 0x6fb   :  { %2125 = vrot.lane.b32.xlu0 %v4710_v41, %s2691_s26 }
 0x6fd   :  { %2087 = vrot.lane.b32.xlu1 %v4697_v34, %s2687_s24 }
 0x6ff   :  { %2089 = vrot.lane.b32.xlu0 %v4700_v21, %s2687_s24 }
 0x701   :  { %2091 = vrot.lane.b32.xlu1 %v4705_v1, %s2687_s24 }
 0x703   :  { %2093 = vrot.lane.b32.xlu0 %v4710_v41, %s2687_s24 }
 0x705   :  { %2103 = vrot.lane.b32.xlu1 %v4697_v34, %s2689_s25 }
 0x707   :  { %2105 = vrot.lane.b32.xlu0 %v4700_v21, %s2689_s25 }
 0x709   :  { %2107 = vrot.lane.b32.xlu1 %v4705_v1, %s2689_s25 }
 0x70b   :  { %2109 = vrot.lane.b32.xlu0 %v4710_v41, %s2689_s25 }
 0x70d   :  { %2055 = vrot.lane.b32.xlu1 %v4697_v34, %s5230_s5 }
 0x70f   :  { %2057 = vrot.lane.b32.xlu0 %v4700_v21, %s5230_s5 }
 0x711   :  { %2059 = vrot.lane.b32.xlu1 %v4705_v1, %s5230_s5 }
 0x713   :  { %2061 = vrot.lane.b32.xlu0 %v4710_v41, %s5230_s5 }
 0x715   :  { %2071 = vrot.lane.b32.xlu1 %v4697_v34, %s2686_s23 }
 0x717   :  { %2073 = vrot.lane.b32.xlu0 %v4700_v21, %s2686_s23 }
 0x719   :  { %2075 = vrot.lane.b32.xlu1 %v4705_v1, %s2686_s23 }
 0x71b   :  { %2077 = vrot.lane.b32.xlu0 %v4710_v41, %s2686_s23 }
 0x71d   :  { %2207 = vperm.xlu1 %2655, %v2204_v15  }
 0x74f   :  { %v2168_v59 = vpop.permute.xlu1 %2167 }
 0x751   :  { %v2170_v28 = vpop.permute.xlu0 %2169 }
 0x752   :  { %v2177_v53 = vsel %vm5277_vm9, %v2168_v59, %v2170_v28 }
 0x753   :  { %v2179_v19 = vmul.f32 %v2177_v53, %v5264_v27  ;;  %v2172_v52 = vpop.permute.xlu1 %2171 }
 0x754   :  { %v2176_v9 = vsel %vm5260_vm7, %v2170_v28, %v2172_v52 }
 0x755   :  { %v2199_v42 = vpack.c.bf16 %v2179_v19, %v2179_v19  ;;  %v2180_v49 = vmul.f32 %v2176_v9, %v5265_v51  ;;  %v2174_v18 = vpop.permute.xlu0 %2173 }
 0x756   :  { %v2175_v47 = vsel %vm5278_vm10, %v2172_v52, %v2174_v18  ;;  %v2178_v17 = vsel %vm5279_vm11, %v2174_v18, %v2168_v59 }
 0x757   :  { %v2200_v61 = vpack.c.bf16 %v2180_v49, %v2180_v49  ;;  %v2181_v43 = vmul.f32 %v2175_v47, %v5270_v25  ;;  %v2182_v57 = vmul.f32 %v2178_v17, %v5271_v37  ;;  %v2136_v27 = vpop.permute.xlu1 %2135  ;;  %v2218_v51 = vsel %vm5281_vm13, %v2199_v42, 0 }
 0x759   :  { %v2201_v38 = vpack.c.bf16 %v2181_v43, %v2181_v43  ;;  %v2202_v48 = vpack.c.bf16 %v2182_v57, %v2182_v57  ;;  %v2138_v13 = vpop.permute.xlu0 %2137  ;;  %2624 = vmatprep.subr.msk.bf16.mxu0 %vm5280_vm12, %v2200_v61 }
 0x75a   :  { %2236 = vmatpush1.bf16.msra.mxu0 %v2218_v51  ;;  %v2145_v16 = vsel %vm442_vm5, %v2136_v27, %v2138_v13 }
 0x75b   :  { %2626 = vmatprep.subr.msk.bf16.mxu1 %vm5282_vm14, %v2202_v48  ;;  %v2140_v54 = vpop.permute.xlu1 %2139  ;;  %v2224_v2 = vsel %vm5283_vm15, %v2201_v38, 0  ;;  %v2147_v52 = vmul.f32 %v2145_v16, %v5236_v39 }
 0x75c   :  { %2277 = vmatpush1.bf16.msra.mxu1 %v2224_v2  ;;  %v2144_v37 = vsel %vm442_vm5, %v2138_v13, %v2140_v54 }
 0x75d   :  { %v2142_v24 = vpop.permute.xlu0 %2141  ;;  %v2148_v28 = vmul.f32 %v2144_v37, %v5237_v8 }
 0x75e   :  { %v2143_v12 = vsel %vm442_vm5, %v2140_v54, %v2142_v24  ;;  %v2146_v7 = vsel %vm442_vm5, %v2142_v24, %v2136_v27 }
 0x75f   :  { %v2152_v32 = vpop.permute.xlu1 %2151  ;;  %v2149_v9 = vmul.f32 %v2143_v12, %v5238_v22 }
 0x761   :  { %v2154_v25 = vpop.permute.xlu0 %2153 }
 0x762   :  { %v2161_v10 = vsel %vm510_vm6, %v2152_v32, %v2154_v25 }
 0x763   :  { %v2156_v31 = vpop.permute.xlu1 %2155  ;;  %v2163_v15 = vmul.f32 %v2161_v10, %v5232_v58  ;;  %v2150_v58 = vmul.f32 %v2146_v7, %v5239_v30 }
 0x764   :  { %v2160_v59 = vsel %vm510_vm6, %v2154_v25, %v2156_v31 }
 0x765   :  { %v2164_v53 = vmul.f32 %v2160_v59, %v5233_v29  ;;  %v2158_v19 = vpop.permute.xlu0 %2157  ;;  %v2195_v29 = vpack.c.bf16 %v2163_v15, %v2147_v52 }
 0x766   :  { %v2159_v42 = vsel %vm510_vm6, %v2156_v31, %v2158_v19  ;;  %v2162_v49 = vsel %vm510_vm6, %v2158_v19, %v2152_v32 }
 0x767   :  { %v2165_v18 = vmul.f32 %v2159_v42, %v5234_v23  ;;  %v2166_v47 = vmul.f32 %v2162_v49, %v5235_v11  ;;  %v2120_v8 = vpop.permute.xlu1 %2119  ;;  %v2196_v17 = vpack.c.bf16 %v2164_v53, %v2148_v28 }
 0x769   :  { %v2197_v61 = vpack.c.bf16 %v2165_v18, %v2149_v9  ;;  %v2122_v43 = vpop.permute.xlu0 %2121  ;;  %2237 = vmatprep.subr.bf16.mxu0 %v2196_v17  ;;  %v2198_v39 = vpack.c.bf16 %v2166_v47, %v2150_v58 }
 0x76a   :  { %v2129_v22 = vsel %vm374_vm4, %v2120_v8, %v2122_v43  ;;  %2238 = vmatpush1.bf16.msra.mxu0 %v2195_v29 }
 0x76b   :  { %2278 = vmatprep.subr.bf16.mxu1 %v2198_v39  ;;  %v2124_v57 = vpop.permute.xlu1 %2123  ;;  %v2131_v27 = vmul.f32 %v2129_v22, %v5240_v4 }
 0x76c   :  { %v2128_v23 = vsel %vm374_vm4, %v2122_v43, %v2124_v57  ;;  %2279 = vmatpush1.bf16.msra.mxu1 %v2197_v61 }
 0x76d   :  { %v2132_v11 = vmul.f32 %v2128_v23, %v5241_v33  ;;  %v2126_v30 = vpop.permute.xlu0 %2125  ;;  %v2191_v2 = vpack.c.bf16 %v2131_v27, %v4697_v34 }
 0x76e   :  { %v2127_v38 = vsel %vm374_vm4, %v2124_v57, %v2126_v30  ;;  %v2130_v48 = vsel %vm374_vm4, %v2126_v30, %v2120_v8 }
 0x76f   :  { %v2133_v13 = vmul.f32 %v2127_v38, %v5242_v5  ;;  %v2134_v51 = vmul.f32 %v2130_v48, %v5243_v26  ;;  %v2088_v54 = vpop.permute.xlu1 %2087  ;;  %v2192_v4 = vpack.c.bf16 %v2132_v11, %v4700_v21 }
 0x771   :  { %v2193_v24 = vpack.c.bf16 %v2133_v13, %v4705_v1  ;;  %v2090_v32 = vpop.permute.xlu0 %2089  ;;  %2239 = vmatprep.subr.bf16.mxu0 %v2192_v4  ;;  %v2194_v33 = vpack.c.bf16 %v2134_v51, %v4710_v41 }
 0x772   :  { %2240 = vmatpush1.bf16.msra.mxu0 %v2191_v2  ;;  %v2097_v5 = vsel %vm238_vm2, %v2088_v54, %v2090_v32 }
 0x773   :  { %2280 = vmatprep.subr.bf16.mxu1 %v2194_v33  ;;  %v2092_v25 = vpop.permute.xlu1 %2091  ;;  %v2100_v34 = vmul.f32 %v2097_v5, %v5248_v0 }
 0x774   :  { %2281 = vmatpush1.bf16.msra.mxu1 %v2193_v24  ;;  %v2096_v7 = vsel %vm238_vm2, %v2090_v32, %v2092_v25  ;;  %v4902_v24 = vld [vmem:[%s4975_s0 + $0x18] sm:$0xff] }
 0x775   :  { %v2094_v37 = vpop.permute.xlu0 %2093  ;;  %v2101_v49 = vmul.f32 %v2096_v7, %v5249_v44  ;;  %v2398_v32 = vmax.f32 %v4902_v24, 0.05 }
 0x776   :  { %v2095_v41 = vsel %vm238_vm2, %v2092_v25, %v2094_v37  ;;  %v2098_v12 = vsel %vm238_vm2, %v2094_v37, %v2088_v54  ;;  %v5286_v37 = vld [vmem:[#allocation7_spill] sm:$0xff]  ;;  %vm2499_vm2 = vcmask 1042432  }
 0x777   :  { %v2104_v10 = vpop.permute.xlu1 %2103  ;;  %v2099_v53 = vmul.f32 %v2098_v12, %v5250_v35  ;;  %v2102_v19 = vmul.f32 %v2095_v41, %v5251_v45 }
 0x779   :  { %v2106_v26 = vpop.permute.xlu0 %2105 }
 0x77a   :  { %v2113_v21 = vsel %vm306_vm3, %v2104_v10, %v2106_v26 }
 0x77b   :  { %v2116_v1 = vmul.f32 %v2113_v21, %v5244_v60  ;;  %v2108_v16 = vpop.permute.xlu1 %2107 }
 0x77c   :  { %v2112_v31 = vsel %vm306_vm3, %v2106_v26, %v2108_v16 }
 0x77d   :  { %v2110_v15 = vpop.permute.xlu0 %2109  ;;  %v2188_v59 = vpack.c.bf16 %v2116_v1, %v2100_v34  ;;  %v2117_v28 = vmul.f32 %v2112_v31, %v5245_v62  ;;  %v5287_v34 = vld [vmem:[#allocation11_spill] sm:$0xff]  ;;  %v5289_v31 = vld [vmem:[#allocation13_spill] sm:$0xff] }
 0x77e   :  { %v2111_v60 = vsel %vm306_vm3, %v2108_v16, %v2110_v15  ;;  %v2114_v0 = vsel %vm306_vm3, %v2110_v15, %v2104_v10  ;;  %v4906_v10 = vsub.s32 4, %v5286_v37  ;;  %v5288_v16 = vld [vmem:[#allocation12_spill] sm:$0xff] }
 0x77f   :  { %v2115_v52 = vmul.f32 %v2114_v0, %v5246_v56  ;;  %v2118_v9 = vmul.f32 %v2111_v60, %v5247_v36  ;;  %2241 = vmatprep.subr.bf16.mxu0 %v2188_v59  ;;  %v2056_v42 = vpop.permute.xlu1 %2055  ;;  %v2189_v47 = vpack.c.bf16 %v2117_v28, %v2101_v49  ;;  %v5290_v60 = vld [vmem:[#allocation14_spill] sm:$0xff] }
 0x780   :  { %v2410_v0 = vsub.f32 %v4902_v24, %v5290_v60 }
 0x781   :  { %v2187_v58 = vpack.c.bf16 %v2115_v52, %v2099_v53  ;;  %v2058_v62 = vpop.permute.xlu0 %2057  ;;  %v2190_v18 = vpack.c.bf16 %v2118_v9, %v2102_v19  ;;  %v2314_v52 = vsub.f32 1.0, %v4902_v24 }
 0x782   :  { %v2065_v45 = vsel %vm103_vm0, %v2056_v42, %v2058_v62 }
 0x783   :  { %2242 = vmatpush1.bf16.msra.mxu0 %v2187_v58  ;;  %2282 = vmatprep.subr.bf16.mxu1 %v2190_v18  ;;  %v2060_v8 = vpop.permute.xlu1 %2059  ;;  %v2068_v29 = vmul.f32 %v2065_v45, %v5256_v55 }
 0x784   :  { %2283 = vmatpush1.bf16.msra.mxu1 %v2189_v47  ;;  %v2064_v57 = vsel %vm103_vm0, %v2058_v62, %v2060_v8 }
 0x785   :  { %v2062_v17 = vpop.permute.xlu0 %2061  ;;  %v2069_v51 = vmul.f32 %v2064_v57, %v5257_v46  ;;  %v4890_v46 = vld [vmem:[%s4975_s0 + $0x8] sm:$0xff] }
 0x786   :  { %v2063_v43 = vsel %vm103_vm0, %v2060_v8, %v2062_v17  ;;  %v2066_v39 = vsel %vm103_vm0, %v2062_v17, %v2056_v42  ;;  %vm5284_vm0 = vcmask 588800   ;;  %v2408_v41 = vsub.f32 %v4890_v46, %v5288_v16 }
 0x787   :  { %v2072_v35 = vpop.permute.xlu1 %2071  ;;  %v2067_v30 = vmul.f32 %v2066_v39, %v5258_v6  ;;  %v2070_v38 = vmul.f32 %v2063_v43, %v5259_v63  ;;  %v2396_v6 = vmax.f32 %v4890_v46, 0.05  ;;  %v4896_v63 = vld [vmem:[%s4975_s0 + $0x10] sm:$0xff]  ;;  %v2312_v28 = vsub.f32 1.0, %v4890_v46 }
 0x788   :  { %v2397_v2 = vmax.f32 %v4896_v63, 0.05  ;;  %v2313_v12 = vsub.f32 1.0, %v4896_v63  ;;  %v2409_v7 = vsub.f32 %v4896_v63, %v5289_v31  ;;  %v2342_v8 = vrot.slane %v2314_v52, 1 }
 0x789   :  { %v2074_v56 = vpop.permute.xlu0 %2073  ;;  %v2340_v62 = vrot.slane %v2312_v28, 1  ;;  %v2326_v45 = vrot.slane %v4896_v63, %v4906_v10 }
 0x78a   :  { %v2081_v36 = vsel %vm170_vm1, %v2072_v35, %v2074_v56  ;;  %v2341_v42 = vrot.slane %v2313_v12, 1  ;;  %v2350_v57 = vmul.f32 %v4902_v24, %v2342_v8  ;;  %v5295_v8 = vld [vmem:[#allocation6_spill] sm:$0xff] }
 0x78b   :  { %v2084_v44 = vmul.f32 %v2081_v36, %v5252_v3  ;;  %v2076_v61 = vpop.permute.xlu1 %2075 }
 0x78c   :  { %v2080_v22 = vsel %vm170_vm1, %v2074_v56, %v2076_v61  ;;  %v2349_v56 = vmul.f32 %v4896_v63, %v2341_v42  ;;  %v2386_v42 = vrot.slane %v2313_v12, %v4906_v10 }
 0x78d   :  { %v2078_v27 = vpop.permute.xlu0 %2077  ;;  %v2184_v23 = vpack.c.bf16 %v2084_v44, %v2068_v29  ;;  %v2085_v11 = vmul.f32 %v2080_v22, %v5253_v50  ;;  %v2322_v44 = vrot.slane %v4890_v46, %v4906_v10  ;;  %v2330_v22 = vrot.slane %v4902_v24, %v4906_v10 }
 0x78e   :  { %v2079_v3 = vsel %vm170_vm1, %v2076_v61, %v2078_v27  ;;  %v2082_v55 = vsel %vm170_vm1, %v2078_v27, %v2072_v35  ;;  %vm5285_vm1 = vmmov %vm5284_vm0  ;;  %v2348_v61 = vmul.f32 %v4890_v46, %v2340_v62 }
 0x78f   :  { %v2083_v48 = vmul.f32 %v2082_v55, %v5254_v14  ;;  %v2086_v13 = vmul.f32 %v2079_v3, %v5255_v20  ;;  %2243 = vmatprep.subr.bf16.mxu0 %v2184_v23  ;;  %v2185_v50 = vpack.c.bf16 %v2085_v11, %v2069_v51  ;;  %v4884_v14 = vld [vmem:[%s4975_s0] sm:$0xff]  ;;  %v5291_v23 = vld [vmem:[#allocation8_spill] sm:$0xff]  ;;  %v2332_v51 = vmul.f32 %v4890_v46, %v2322_v44 }
 0x790   :  { %v2395_v20 = vmax.f32 %v4884_v14, 0.05  ;;  %v2311_v21 = vsub.f32 1.0, %v4884_v14  ;;  %v2407_v1 = vsub.f32 %v4884_v14, %v5287_v34  ;;  %v2318_v17 = vrot.slane %v4884_v14, %v4906_v10 }
 0x791   :  { %v2183_v54 = vpack.c.bf16 %v2083_v48, %v2067_v30  ;;  %v2186_v4 = vpack.c.bf16 %v2086_v13, %v2070_v38  ;;  %v2435_v3 = vrot.slane %v4884_v14, 5  ;;  %v2333_v30 = vmul.f32 %v4896_v63, %v2326_v45 }
 0x792   :  { %2670 = vrcp.f32 %v2395_v20  ;;  %v2339_v9 = vrot.slane %v2311_v21, 1  ;;  %v2331_v27 = vmul.f32 %v4884_v14, %v2318_v17  ;;  %v2362_v38 = vrot.slane %v2349_v56, %v5291_v23 }
 0x793   :  { %2244 = vmatpush1.bf16.msra.mxu0 %v2183_v54  ;;  %2284 = vmatprep.subr.bf16.mxu1 %v2186_v4  ;;  %2672 = vrcp.f32 %v2396_v6  ;;  %v2437_v48 = vrot.slane %v4896_v63, 5  ;;  %v2358_v54 = vrot.slane %v2348_v61, %v5291_v23  ;;  %v2436_v4 = vrot.slane %v4890_v46, 5 }
 0x794   :  { %2285 = vmatpush1.bf16.msra.mxu1 %v2185_v50  ;;  %2674 = vrcp.f32 %v2397_v2  ;;  %v2347_v35 = vmul.f32 %v4884_v14, %v2339_v9  ;;  %v2366_v20 = vrot.slane %v2350_v57, %v5291_v23  ;;  %v2438_v6 = vrot.slane %v4902_v24, 5 }
 0x795   :  { %2676 = vrcp.f32 %v2398_v32 }
 0x796   :  { %2625 = vmatmul.mubr.msk.bf16.vlgmr.msra.gmra.mxu0 %vm5284_vm0, %v2203_v40  ;;  %v2354_v11 = vrot.slane %v2347_v35, %v5291_v23  ;;  %v2390_v35 = vrot.slane %v2314_v52, %v4906_v10 }
 0x797   :  { %2627 = vmatmul.mubr.msk.bf16.vlgmr.msra.gmra.mxu1 %vm5285_vm1, %v2203_v40  ;;  %v2334_v40 = vmul.f32 %v4902_v24, %v2330_v22 }
 0x798   :  { %v2367_v32 = vadd.f32 %v2354_v11, %v2331_v27 }
 0x79f   :  { %v2671_v33 = vpop.eup %2670 }
 0x7a0   :  { %v2673_v25 = vpop.eup %2672  ;;  %v2414_v15 = vrot.slane %v2671_v33, %v4906_v10  ;;  %v2447_v55 = vsub.f32 1.0, %v2671_v33 }
 0x7a1   :  { %v2675_v5 = vpop.eup %2674  ;;  %v2418_v59 = vrot.slane %v2673_v25, %v4906_v10  ;;  %v2448_v50 = vsub.f32 1.0, %v2673_v25  ;;  %v2370_v25 = vadd.f32 %v2366_v20, %v2334_v40 }
 0x7a2   :  { %v2677_v26 = vpop.eup %2676  ;;  %v2422_v53 = vrot.slane %v2675_v5, %v4906_v10  ;;  %v2427_v49 = vmul.f32 %v2414_v15, %v2407_v1  ;;  %v2449_v13 = vsub.f32 1.0, %v2675_v5  ;;  %v2369_v1 = vadd.f32 %v2362_v38, %v2333_v30 }
 0x7a3   :  { %v2426_v19 = vrot.slane %v2677_v26, %v4906_v10  ;;  %v2428_v58 = vmul.f32 %v2418_v59, %v2408_v41  ;;  %v2450_v2 = vsub.f32 1.0, %v2677_v26  ;;  %v2368_v41 = vadd.f32 %v2358_v54, %v2332_v51 }
 0x7a4   :  { %v2429_v18 = vmul.f32 %v2422_v53, %v2409_v7  ;;  %v2431_v36 = vadd.f32 %v2427_v49, %v5287_v34  ;;  %v2454_v34 = vrot.slane %v2447_v55, %v4906_v10  ;;  %v2458_v7 = vrot.slane %v2448_v50, %v4906_v10 }
 0x7a5   :  { %v2430_v47 = vmul.f32 %v2426_v19, %v2410_v0  ;;  %v2432_v29 = vadd.f32 %v2428_v58, %v5288_v16  ;;  %v2462_v16 = vrot.slane %v2449_v13, %v4906_v10  ;;  %v2466_v59 = vrot.slane %v2450_v2, %v4906_v10  ;;  %v5293_v19 = vld [vmem:[#allocation4_spill] sm:$0xff]  ;;  %v5294_v58 = vld [vmem:[#allocation3_spill] sm:$0xff] }
 0x7a6   :  { %v2433_v43 = vadd.f32 %v2429_v18, %v5289_v31  ;;  %v2443_v33 = vsub.f32 %v2431_v36, %v2435_v3  ;;  %v2378_v26 = vrot.slane %v2311_v21, %v4906_v10  ;;  %v2373_v9 = vsub.f32 %v2369_v1, %v5293_v19 }
 0x7a7   :  { %v2434_v39 = vadd.f32 %v2430_v47, %v5290_v60  ;;  %v2444_v31 = vsub.f32 %v2432_v29, %v2436_v4  ;;  %v5292_v60 = vld [vmem:[#allocation5_spill] sm:$0xff]  ;;  %v2372_v62 = vsub.f32 %v2368_v41, %v5294_v58  ;;  %v2382_v18 = vrot.slane %v2312_v28, %v4906_v10 }
 0x7a8   :  { %v2445_v5 = vsub.f32 %v2433_v43, %v2437_v48  ;;  %v2371_v0 = vsub.f32 %v2367_v32, %v5292_v60  ;;  %v2467_v53 = vmul.f32 %v2454_v34, %v2443_v33  ;;  %v2374_v17 = vsub.f32 %v2370_v25, %v5295_v8 }
 0x7a9   :  { %v2446_v15 = vsub.f32 %v2434_v39, %v2438_v6  ;;  %v2468_v47 = vmul.f32 %v2458_v7, %v2444_v31  ;;  %v2393_v29 = vmul.f32 %v2386_v42, %v2373_v9  ;;  %v2392_v44 = vmul.f32 %v2382_v18, %v2372_v62 }
 0x7aa   :  { %v2469_v49 = vmul.f32 %v2462_v16, %v2445_v5  ;;  %v2391_v56 = vmul.f32 %v2378_v26, %v2371_v0  ;;  %v2475_v36 = vrot.slane %v2467_v53, 3  ;;  %v2394_v43 = vmul.f32 %v2390_v35, %v2374_v17  ;;  %v5296_v26 = vld [vmem:[#allocation9_spill] sm:$0xff] }
 0x7ab   :  { %v2470_v45 = vmul.f32 %v2466_v59, %v2446_v15  ;;  %v2476_v61 = vrot.slane %v2468_v47, 3  ;;  %v2208_v15 = vpop.permute.xlu1 %2207 }
 0x7ac   :  { %v2477_v21 = vrot.slane %v2469_v49, 3  ;;  %v2483_v12 = vadd.f32 %v2475_v36, %v2391_v56  ;;  %v2213_v53 = vrot.slane %v2208_v15, %v5296_v26 }
 0x7ad   :  { %v2478_v39 = vrot.slane %v2470_v45, 3  ;;  %v2484_v57 = vadd.f32 %v2476_v61, %v2392_v44  ;;  %v2707_v45 = vmov 1966171168  }
 0x7ae   :  { %v2485_v22 = vadd.f32 %v2477_v21, %v2393_v29  ;;  %v2491_v23 = vrot.slane %v2483_v12, 5  ;;  %v2564_v56 = vunpack.c.l.s4 %v2707_v45 }
 0x7af   :  { %v2486_v27 = vadd.f32 %v2478_v39, %v2394_v43  ;;  %v2492_v11 = vrot.slane %v2484_v57, 5 }
 0x7b0   :  { %v2493_v28 = vrot.slane %v2485_v22, 5  ;;  %v2500_v55 = vsel %vm2499_vm2, %v2491_v23, 0.0 }
 0x7b1   :  { %v2494_v3 = vrot.slane %v2486_v27, 5  ;;  %v2507_v52 = vsel %vm2499_vm2, %v2492_v11, 0.0  ;;  %v2501_v30 = vrot.slane %v2500_v55, 4 }
 0x7b2   :  { %v2514_v10 = vsel %vm2499_vm2, %v2493_v28, 0.0  ;;  %v2508_v13 = vrot.slane %v2507_v52, 4  ;;  %v2565_v28 = vunpack.c.0.s8 %v2564_v56 }
 0x7b3   :  { %v2521_v38 = vsel %vm2499_vm2, %v2494_v3, 0.0  ;;  %v2515_v48 = vrot.slane %v2514_v10, 4  ;;  %v2502_v54 = vadd.f32 %v2501_v30, %v2500_v55 }
 0x7b4   :  { %v2522_v51 = vrot.slane %v2521_v38, 4  ;;  %v2509_v50 = vadd.f32 %v2508_v13, %v2507_v52 }
 0x7b5   :  { %v2516_v4 = vadd.f32 %v2515_v48, %v2514_v10  ;;  %v2503_v20 = vrot.slane %v2502_v54, 2  ;;  %v2568_v48 = vsub.s32 %v2565_v28, %v5286_v37 }
 0x7b6   :  { %v2523_v40 = vadd.f32 %v2522_v51, %v2521_v38  ;;  %v2510_v2 = vrot.slane %v2509_v50, 2 }
 0x7b7   :  { %v2517_v6 = vrot.slane %v2516_v4, 2  ;;  %v2504_v33 = vadd.f32 %v2503_v20, %v2502_v54 }
 0x7b8   :  { %v2524_v32 = vrot.slane %v2523_v40, 2  ;;  %v2511_v1 = vadd.f32 %v2510_v2, %v2509_v50  ;;  %v5297_v2 = vlaneseq }
 0x7b9   :  { %v2518_v34 = vadd.f32 %v2517_v6, %v2516_v4  ;;  %v2505_v16 = vrot.slane %v2504_v33, 1 }
 0x7ba   :  { %v2525_v5 = vadd.f32 %v2524_v32, %v2523_v40  ;;  %v2512_v31 = vrot.slane %v2511_v1, 1  ;;  %vm2589_vm3 = vcmp.lt.s32.totalorder %v5297_v2, 512 }
 0x7bb   :  { %v2519_v41 = vrot.slane %v2518_v34, 1  ;;  %v2506_v25 = vadd.f32 %v2505_v16, %v2504_v33 }
 0x7bc   :  { %v2526_v7 = vrot.slane %v2525_v5, 1  ;;  %v2513_v60 = vadd.f32 %v2512_v31, %v2511_v1 }
 0x7bd   :  { %v2520_v59 = vadd.f32 %v2519_v41, %v2518_v34  ;;  %v2529_v19 = vmul.f32 0.33333334, %v2506_v25 }
 0x7be   :  { %v2527_v0 = vadd.f32 %v2526_v7, %v2525_v5  ;;  %v2530_v62 = vmul.f32 0.33333334, %v2513_v60 }
 0x7bf   :  { %v2531_v42 = vmul.f32 0.33333334, %v2520_v59 }
 0x7c0   :  { %v2532_v8 = vmul.f32 0.33333334, %v2527_v0 }
 0x856   :  { %v2263_v9 = vpop.f32.mrf.mxu0 }
 0x857   :  { %v2264_v49 = vadd.f32 %v2263_v9, %v2213_v53  ;;  %v2304_v58 = vpop.f32.mrf.mxu1 }
 0x858   :  { %v2305_v18 = vadd.f32 %v2304_v58, %v2213_v53  ;;  %v2265_v47 = vpop.f32.mrf.mxu0 }
 0x859   :  { %v2533_v17 = vadd.f32 %v2529_v19, %v2264_v49  ;;  %v2266_v35 = vadd.f32 %v2265_v47, %v2213_v53  ;;  %v2306_v36 = vpop.f32.mrf.mxu1 }
 0x85a   :  { %v2535_v29 = vadd.f32 %v2531_v42, %v2305_v18  ;;  %v2307_v21 = vadd.f32 %v2306_v36, %v2213_v53  ;;  %v2267_v44 = vpop.f32.mrf.mxu0 }
 0x85b   :  { %v2537_v61 = vmul.f32 0.1, %v2533_v17  ;;  %v2534_v43 = vadd.f32 %v2530_v62, %v2266_v35  ;;  %v2308_v39 = vpop.f32.mrf.mxu1 }
 0x85c   :  { %v2539_v12 = vmul.f32 0.1, %v2535_v29  ;;  %v2536_v22 = vadd.f32 %v2532_v8, %v2307_v21  ;;  %v2268_v57 = vpop.f32.mrf.mxu0 }
 0x85d   :  { %v2545_v27 = vrot.slane %v2537_v61, 5  ;;  %v2538_v23 = vmul.f32 0.1, %v2534_v43  ;;  %v2309_v11 = vpop.f32.mrf.mxu1 }
 0x85e   :  { %v2547_v3 = vrot.slane %v2539_v12, 5  ;;  %v2540_v55 = vmul.f32 0.1, %v2536_v22 }
 0x85f   :  { %v2546_v10 = vrot.slane %v2538_v23, 5  ;;  %v2553_v30 = vsub.f32 %v4884_v14, %v2545_v27 }
 0x860   :  { %v2548_v52 = vrot.slane %v2540_v55, 5  ;;  %v2555_v13 = vsub.f32 %v4896_v63, %v2547_v3 }
 0x861   :  { %v2554_v38 = vsub.f32 %v4890_v46, %v2546_v10 }
 0x862   :  { %v2556_v51 = vsub.f32 %v4902_v24, %v2548_v52 }
 0x863   :  { %v2561_v54 = vcombine.low %v2553_v30, %v2554_v38 }
 0x864   :  { %v2562_v4 = vcombine.low %v2555_v13, %v2556_v51 }
 0x865   :  { %v2569_v50 = vrot.slane %v2561_v54, %v2568_v48 }
 0x866   :  { %v2576_v40 = vrot.slane %v2562_v4, %v2568_v48 }
 0x868   :  { %v2577_v20 = vcombine.high %v2569_v50, %v2576_v40 }
 0x86a   :  { %v2584_v6 = vrot.slane %v2577_v20, %v2568_v48 }
 0x86c   :  { %v2585_v32 = vcombine.high %v2584_v6, %v2584_v6 }
 0x86e   :  { %2591 = vst.msk [vmem:[%s4988_s14] sm:$0xf] %vm2589_vm3, %v2585_v32 }

</bundles_post_ra>
